<compile_context>
chip_gen: v5e
topology: v5e:2x2
jax: 0.10.0
libtpu: 0.0.40
codegen_flags: <defaults>
</compile_context>

<pallas_src>
import math

import jax
import jax.numpy as jnp
from jax.experimental import pallas as pl
from jax.experimental.pallas import tpu as pltpu


# ----------------------------------------------------------------------------
# Fused kernel: attention (both layers) -> GCN layer1 -> GCN layer2 -> head
# ----------------------------------------------------------------------------
def _concate_gcn_kernel(adjs_ref,   # (B, N, N)
                        afms_ref,   # (B, N, Fin)
                        attp_ref,   # (B, Ctot*N, N)   channel-packed attention inputs
                        s_ref,      # (2*R*N, Ctot*N)  conv-weight selection matrix
                        cm1_ref,    # (R, 1, ngc1)     relation column masks, layer 1
                        cm2_ref,    # (R, 1, ngc2)
                        w1_ref, g1_ref, h1_ref,        # layer-1 Wcat / affine
                        w2_ref, g2_ref, h2_ref,        # layer-2 Wcat / affine
                        mbs_ref, mbt_ref,              # molfp bias + molfp_bn (folded)
                        wd1_ref, d1s_ref, d1t_ref,     # den1 + bn_den1
                        wd2_ref, d2s_ref, d2t_ref,     # den2 + bn_den2
                        wd3_ref,                       # den3
                        out_ref):                      # (B, nclass)
    B, N, _ = adjs_ref.shape
    R = cm1_ref.shape[0]
    LR = 2 * R                                        # (layer, relation) pairs

    # hoist all parameters out of the batch loop
    s_mat = s_ref[...]
    w1 = w1_ref[...]; g1 = g1_ref[...]; h1 = h1_ref[...]
    w2 = w2_ref[...]; g2 = g2_ref[...]; h2 = h2_ref[...]
    mbs = mbs_ref[...]; mbt = mbt_ref[...]
    wd1 = wd1_ref[...]; d1s = d1s_ref[...]; d1t = d1t_ref[...]
    wd2 = wd2_ref[...]; d2s = d2s_ref[...]; d2t = d2t_ref[...]
    wd3 = wd3_ref[...]

    for b in range(B):                                # B is tiny & static
        adj = adjs_ref[b]                             # (N, N)
        mask = (1.0 - adj) * (-1e9)                   # computed once per graph
        mask_blank = jnp.max(adj, axis=-1, keepdims=True)      # (N, 1)

        # ---- all 10 attention logit maps in a single MXU contraction -------
        logits = jnp.dot(s_mat, attp_ref[b],
                         preferred_element_type=jnp.float32)   # (LR*N, N)
        logits = logits + jnp.concatenate([mask] * LR, axis=0)

        # ---- masked softmax over neighbours, stacked over all heads --------
        m = jnp.max(logits, axis=-1, keepdims=True)
        e = jnp.exp(logits - m)
        inv = pl.reciprocal(jnp.sum(e, axis=-1, keepdims=True), approx=True)
        A = (e * inv) * jnp.concatenate([mask_blank] * LR, axis=0)   # (LR*N, N)

        # ---- layer 1:  A_r @ (afms @ W1cat), keep relation-r columns --------
        xw1 = jnp.dot(afms_ref[b], w1, preferred_element_type=jnp.float32)   # (N, ngc1)
        y1 = jnp.dot(A[:R * N, :], xw1, preferred_element_type=jnp.float32)  # (R*N, ngc1)
        x1 = y1[:N, :] * cm1_ref[0]
        for r in range(1, R):
            x1 = x1 + y1[r * N:(r + 1) * N, :] * cm1_ref[r]
        # (bias + eval-BN folded into g1/h1), ReLU, mask3
        x1 = jnp.maximum(x1 * g1 + h1, 0.0) * mask_blank

        # ---- layer 2 --------------------------------------------------------
        xw2 = jnp.dot(x1, w2, preferred_element_type=jnp.float32)            # (N, ngc2)
        y2 = jnp.dot(A[R * N:, :], xw2, preferred_element_type=jnp.float32)  # (R*N, ngc2)
        x2 = y2[:N, :] * cm2_ref[0]
        for r in range(1, R):
            x2 = x2 + y2[r * N:(r + 1) * N, :] * cm2_ref[r]
        x2 = jnp.maximum(x2 * g2 + h2, 0.0) * mask_blank                      # mask4 fused

        # ---- head: MolFP (sum over atoms) + BN + Dense/BN/ReLU x2 + Dense ---
        fp = jnp.sum(x2, axis=0, keepdims=True)                               # (1, ngc2)
        hx = fp * mbs + mbt                       # molfp bias + molfp_bn folded
        hx = jnp.dot(hx, wd1, preferred_element_type=jnp.float32)
        hx = jnp.maximum(hx * d1s + d1t, 0.0)
        hx = jnp.dot(hx, wd2, preferred_element_type=jnp.float32)
        hx = jnp.maximum(hx * d2s + d2t, 0.0)
        hx = jnp.dot(hx, wd3, preferred_element_type=jnp.float32)             # (1, nclass)
        out_ref[b:b + 1, :] = hx


def concate_gcn_forward(adjs, afms, attp, S, cm1, cm2,
                        w1, g1, h1, w2, g2, h2,
                        mbs, mbt, wd1, d1s, d1t, wd2, d2s, d2t, wd3):
    B = adjs.shape[0]
    nclass = wd3.shape[-1]
    args = (adjs, afms, attp, S, cm1, cm2, w1, g1, h1, w2, g2, h2,
            mbs, mbt, wd1, d1s, d1t, wd2, d2s, d2t, wd3)
    return pl.pallas_call(
        _concate_gcn_kernel,
        out_shape=jax.ShapeDtypeStruct((B, nclass), jnp.float32),
        in_specs=[pl.BlockSpec(memory_space=pltpu.MemorySpace.VMEM)
                  for _ in args],
        out_specs=pl.BlockSpec(memory_space=pltpu.MemorySpace.VMEM),
    )(*args)


# ----------------------------------------------------------------------------
# Host-side parameter packing helpers
# ----------------------------------------------------------------------------
def build_select_matrix(wconv_layers, att_channels, N):
    """S[(l*R+r)*N + i, c*N + j] = wconv[l][r][c_local] * (i == j)."""
    Ctot = sum(att_channels)
    offs = [0]
    for c in att_channels:
        offs.append(offs[-1] + c)
    eye = jnp.eye(N, dtype=jnp.float32)
    rows = []
    for wlist in wconv_layers:                   # 2 layers
        for r in range(len(att_channels)):
            blk = jnp.kron(wlist[r].reshape(1, -1), eye)          # (N, C_r*N)
            left = jnp.zeros((N, offs[r] * N), jnp.float32)
            right = jnp.zeros((N, (Ctot - offs[r + 1]) * N), jnp.float32)
            rows.append(jnp.concatenate([left, blk, right], axis=1))
    return jnp.concatenate(rows, axis=0)                           # (2*R*N, Ctot*N)


def build_col_masks(sizes):
    total = sum(sizes)
    masks, off = [], 0
    for s in sizes:
        masks.append(jnp.zeros((1, total), jnp.float32).at[:, off:off + s].set(1.0))
        off += s
    return jnp.stack(masks, axis=0)                                # (R, 1, total)


# ----------------------------------------------------------------------------
# Driver
# ----------------------------------------------------------------------------
if __name__ == "__main__":
    B, N = 2, 16
    n_bfeat, n_afeat = 6, 12
    n_sgc1 = [8, 8, 8, 8, 8]
    n_sgc2 = [8, 8, 8, 8, 8]
    ngc1, ngc2 = sum(n_sgc1), sum(n_sgc2)
    n_den1, n_den2, nclass = 32, 16, 3
    att_channels = [n_bfeat, 5, 3, 3, 3]   # bfts, OrderAtt, AromAtt, ConjAtt, RingAtt
    R = len(att_channels)
    Ctot = sum(att_channels)
    eps = 1e-5

    key = jax.random.PRNGKey(0)
    _keys = iter(jax.random.split(key, 256))

    def nk():
        return next(_keys)

    def unif(shape, stdv):
        return jax.random.uniform(nk(), shape, jnp.float32, -stdv, stdv)

    def bn_affine(nf):
        # eval-mode BatchNorm: running_mean=0, running_var=1 -> affine
        gamma = unif((nf,), 1.0) * 0.5 + 1.0
        beta = unif((nf,), 0.1)
        rm = jnp.zeros((nf,), jnp.float32)
        rv = jnp.ones((nf,), jnp.float32)
        scale = gamma / jnp.sqrt(rv + eps)
        shift = beta - rm * scale
        return scale.reshape(1, nf), shift.reshape(1, nf)

    def make_layer(in_feat, out_feats):
        wconvs, ws, bs, scs, shs = [], [], [], [], []
        for k in range(R):
            C = att_channels[k]
            wconvs.append(unif((C,), 1.0 / math.sqrt(C)))          # Conv2d(C,1,1) weight
            stdv = 1.0 / math.sqrt(out_feats[k])                   # GraphConvolution init
            ws.append(unif((in_feat, out_feats[k]), stdv))
            bs.append(unif((1, out_feats[k]), stdv))
            s, t = bn_affine(out_feats[k])
            scs.append(s)
            shs.append(t)
        wcat = jnp.concatenate(ws, axis=1)
        bcat = jnp.concatenate(bs, axis=1)
        scat = jnp.concatenate(scs, axis=1)
        tcat = jnp.concatenate(shs, axis=1)
        hcat = bcat * scat + tcat        # fold GC bias into eval-BN shift
        return wconvs, wcat, scat, hcat

    wconv1, w1cat, g1, h1 = make_layer(n_afeat, n_sgc1)
    wconv2, w2cat, g2, h2 = make_layer(ngc1, n_sgc2)

    molfp_b = unif((1, ngc2), 1.0 / math.sqrt(ngc2))
    mbs, mbt0 = bn_affine(ngc2)
    mbt = molfp_b * mbs + mbt0           # fold MolFP bias into molfp_bn shift
    wd1 = unif((ngc2, n_den1), 1.0 / math.sqrt(n_den1))
    d1s, d1t = bn_affine(n_den1)
    wd2 = unif((n_den1, n_den2), 1.0 / math.sqrt(n_den2))
    d2s, d2t = bn_affine(n_den2)
    wd3 = unif((n_den2, nclass), 1.0 / math.sqrt(nclass))

    S = build_select_matrix([wconv1, wconv2], att_channels, N)     # (160, 320)
    cm1 = build_col_masks(n_sgc1)                                  # (5, 1, 40)
    cm2 = build_col_masks(n_sgc2)                                  # (5, 1, 40)

    # ---- deterministic synthetic inputs -------------------------------------
    adjs = (jax.random.uniform(nk(), (B, N, N)) > 0.6).astype(jnp.float32)
    adjs = jnp.maximum(adjs, jnp.transpose(adjs, (0, 2, 1)))
    adjs = jnp.maximum(adjs, jnp.eye(N, dtype=jnp.float32)[None])
    afms = jax.random.normal(nk(), (B, N, n_afeat), jnp.float32)
    bfts = jax.random.normal(nk(), (B, n_bfeat, N, N), jnp.float32)
    OrderAtt = jax.random.normal(nk(), (B, 5, N, N), jnp.float32)
    AromAtt = jax.random.normal(nk(), (B, 3, N, N), jnp.float32)
    ConjAtt = jax.random.normal(nk(), (B, 3, N, N), jnp.float32)
    RingAtt = jax.random.normal(nk(), (B, 3, N, N), jnp.float32)

    # pack all attention inputs channel-wise, then flatten (C, N) rows
    attin = jnp.concatenate([bfts, OrderAtt, AromAtt, ConjAtt, RingAtt],
                            axis=1)                                 # (B, Ctot, N, N)
    attp = attin.reshape(B, Ctot * N, N)                            # (B, Ctot*N, N)

    # ---- single fused forward pass ------------------------------------------
    out = concate_gcn_forward(adjs, afms, attp, S, cm1, cm2,
                              w1cat, g1, h1, w2cat, g2, h2,
                              mbs, mbt, wd1, d1s, d1t, wd2, d2s, d2t, wd3)

    out = jax.block_until_ready(out)
    assert out.shape == (B, nclass) and out.dtype == jnp.float32
    assert bool(jnp.all(jnp.isfinite(out)))
    print("KERNEL_OK")
</pallas_src>

<mosaic_0001>
module attributes {stable_mosaic.version = 11 : i64} {
  func.func @_concate_gcn_kernel(%arg0: memref<2x16x16xf32, #tpu.memory_space<vmem>>, %arg1: memref<2x16x12xf32, #tpu.memory_space<vmem>>, %arg2: memref<2x320x16xf32, #tpu.memory_space<vmem>>, %arg3: memref<160x320xf32, #tpu.memory_space<vmem>>, %arg4: memref<5x1x40xf32, #tpu.memory_space<vmem>>, %arg5: memref<5x1x40xf32, #tpu.memory_space<vmem>>, %arg6: memref<12x40xf32, #tpu.memory_space<vmem>>, %arg7: memref<1x40xf32, #tpu.memory_space<vmem>>, %arg8: memref<1x40xf32, #tpu.memory_space<vmem>>, %arg9: memref<40x40xf32, #tpu.memory_space<vmem>>, %arg10: memref<1x40xf32, #tpu.memory_space<vmem>>, %arg11: memref<1x40xf32, #tpu.memory_space<vmem>>, %arg12: memref<1x40xf32, #tpu.memory_space<vmem>>, %arg13: memref<1x40xf32, #tpu.memory_space<vmem>>, %arg14: memref<40x32xf32, #tpu.memory_space<vmem>>, %arg15: memref<1x32xf32, #tpu.memory_space<vmem>>, %arg16: memref<1x32xf32, #tpu.memory_space<vmem>>, %arg17: memref<32x16xf32, #tpu.memory_space<vmem>>, %arg18: memref<1x16xf32, #tpu.memory_space<vmem>>, %arg19: memref<1x16xf32, #tpu.memory_space<vmem>>, %arg20: memref<16x3xf32, #tpu.memory_space<vmem>>, %arg21: memref<2x3xf32, #tpu.memory_space<vmem>>) attributes {dimension_semantics = [], scalar_prefetch = 0 : i64, scratch_operands = 0 : i64, tpu.core_type = #tpu.core_type<tc>} {
    %c0 = arith.constant 0 : index
    %c0_0 = arith.constant 0 : index
    %0 = vector.load %arg3[%c0, %c0_0] : memref<160x320xf32, #tpu.memory_space<vmem>>, vector<160x320xf32>
    %c0_1 = arith.constant 0 : index
    %c0_2 = arith.constant 0 : index
    %1 = vector.load %arg6[%c0_1, %c0_2] : memref<12x40xf32, #tpu.memory_space<vmem>>, vector<12x40xf32>
    %c0_3 = arith.constant 0 : index
    %c0_4 = arith.constant 0 : index
    %2 = vector.load %arg7[%c0_3, %c0_4] : memref<1x40xf32, #tpu.memory_space<vmem>>, vector<1x40xf32>
    %c0_5 = arith.constant 0 : index
    %c0_6 = arith.constant 0 : index
    %3 = vector.load %arg8[%c0_5, %c0_6] : memref<1x40xf32, #tpu.memory_space<vmem>>, vector<1x40xf32>
    %c0_7 = arith.constant 0 : index
    %c0_8 = arith.constant 0 : index
    %4 = vector.load %arg9[%c0_7, %c0_8] : memref<40x40xf32, #tpu.memory_space<vmem>>, vector<40x40xf32>
    %c0_9 = arith.constant 0 : index
    %c0_10 = arith.constant 0 : index
    %5 = vector.load %arg10[%c0_9, %c0_10] : memref<1x40xf32, #tpu.memory_space<vmem>>, vector<1x40xf32>
    %c0_11 = arith.constant 0 : index
    %c0_12 = arith.constant 0 : index
    %6 = vector.load %arg11[%c0_11, %c0_12] : memref<1x40xf32, #tpu.memory_space<vmem>>, vector<1x40xf32>
    %c0_13 = arith.constant 0 : index
    %c0_14 = arith.constant 0 : index
    %7 = vector.load %arg12[%c0_13, %c0_14] : memref<1x40xf32, #tpu.memory_space<vmem>>, vector<1x40xf32>
    %c0_15 = arith.constant 0 : index
    %c0_16 = arith.constant 0 : index
    %8 = vector.load %arg13[%c0_15, %c0_16] : memref<1x40xf32, #tpu.memory_space<vmem>>, vector<1x40xf32>
    %c0_17 = arith.constant 0 : index
    %c0_18 = arith.constant 0 : index
    %9 = vector.load %arg14[%c0_17, %c0_18] : memref<40x32xf32, #tpu.memory_space<vmem>>, vector<40x32xf32>
    %c0_19 = arith.constant 0 : index
    %c0_20 = arith.constant 0 : index
    %10 = vector.load %arg15[%c0_19, %c0_20] : memref<1x32xf32, #tpu.memory_space<vmem>>, vector<1x32xf32>
    %c0_21 = arith.constant 0 : index
    %c0_22 = arith.constant 0 : index
    %11 = vector.load %arg16[%c0_21, %c0_22] : memref<1x32xf32, #tpu.memory_space<vmem>>, vector<1x32xf32>
    %c0_23 = arith.constant 0 : index
    %c0_24 = arith.constant 0 : index
    %12 = vector.load %arg17[%c0_23, %c0_24] : memref<32x16xf32, #tpu.memory_space<vmem>>, vector<32x16xf32>
    %c0_25 = arith.constant 0 : index
    %c0_26 = arith.constant 0 : index
    %13 = vector.load %arg18[%c0_25, %c0_26] : memref<1x16xf32, #tpu.memory_space<vmem>>, vector<1x16xf32>
    %c0_27 = arith.constant 0 : index
    %c0_28 = arith.constant 0 : index
    %14 = vector.load %arg19[%c0_27, %c0_28] : memref<1x16xf32, #tpu.memory_space<vmem>>, vector<1x16xf32>
    %c0_29 = arith.constant 0 : index
    %c0_30 = arith.constant 0 : index
    %15 = vector.load %arg20[%c0_29, %c0_30] : memref<16x3xf32, #tpu.memory_space<vmem>>, vector<16x3xf32>
    %c0_31 = arith.constant 0 : index
    %c0_32 = arith.constant 0 : index
    %c0_33 = arith.constant 0 : index
    %16 = vector.load %arg0[%c0_31, %c0_32, %c0_33] : memref<2x16x16xf32, #tpu.memory_space<vmem>>, vector<1x16x16xf32>
    %17 = vector.shape_cast %16 : vector<1x16x16xf32> to vector<16x16xf32>
    %cst = arith.constant 1.000000e+00 : f32
    %18 = vector.broadcast %cst : f32 to vector<16x16xf32>
    %19 = arith.subf %18, %17 : vector<16x16xf32>
    %cst_34 = arith.constant -1.000000e+09 : f32
    %20 = vector.broadcast %cst_34 : f32 to vector<16x16xf32>
    %21 = arith.mulf %19, %20 : vector<16x16xf32>
    %cst_35 = arith.constant dense<0xFF800000> : vector<16xf32>
    %22 = vector.multi_reduction <maximumf>, %17, %cst_35 [1] : vector<16x16xf32> to vector<16xf32>
    %23 = vector.shape_cast %22 : vector<16xf32> to vector<16x1xf32>
    %c0_36 = arith.constant 0 : index
    %c0_37 = arith.constant 0 : index
    %c0_38 = arith.constant 0 : index
    %24 = vector.load %arg2[%c0_36, %c0_37, %c0_38] : memref<2x320x16xf32, #tpu.memory_space<vmem>>, vector<1x320x16xf32>
    %25 = vector.shape_cast %24 : vector<1x320x16xf32> to vector<320x16xf32>
    %cst_39 = arith.constant dense<0.000000e+00> : vector<160x16xf32>
    %26 = tpu.matmul %0, %25, %cst_39 {dimension_numbers = #tpu.dot_dimension_numbers<[1], [0], [0], [1], [0, 0, 1, 1], [], []>} : vector<160x320xf32>, vector<320x16xf32>, vector<160x16xf32> -> vector<160x16xf32>
    %27 = tpu.concatenate %21, %21, %21, %21, %21, %21, %21, %21, %21, %21 in 0 : vector<16x16xf32>, vector<16x16xf32>, vector<16x16xf32>, vector<16x16xf32>, vector<16x16xf32>, vector<16x16xf32>, vector<16x16xf32>, vector<16x16xf32>, vector<16x16xf32>, vector<16x16xf32> -> vector<160x16xf32>
    %28 = arith.addf %26, %27 : vector<160x16xf32>
    %cst_40 = arith.constant dense<0xFF800000> : vector<160xf32>
    %29 = vector.multi_reduction <maximumf>, %28, %cst_40 [1] : vector<160x16xf32> to vector<160xf32>
    %30 = vector.shape_cast %29 : vector<160xf32> to vector<160x1xf32>
    %31 = vector.broadcast %30 : vector<160x1xf32> to vector<160x16xf32>
    %32 = arith.subf %28, %31 : vector<160x16xf32>
    %33 = math.exp %32 : vector<160x16xf32>
    %cst_41 = arith.constant dense<0.000000e+00> : vector<160xf32>
    %34 = vector.multi_reduction <add>, %33, %cst_41 [1] : vector<160x16xf32> to vector<160xf32>
    %35 = vector.shape_cast %34 : vector<160xf32> to vector<160x1xf32>
    %36 = tpu.reciprocal %35 {approx = true} : vector<160x1xf32> -> vector<160x1xf32>
    %37 = vector.broadcast %36 : vector<160x1xf32> to vector<160x16xf32>
    %38 = arith.mulf %33, %37 : vector<160x16xf32>
    %39 = tpu.concatenate %23, %23, %23, %23, %23, %23, %23, %23, %23, %23 in 0 : vector<16x1xf32>, vector<16x1xf32>, vector<16x1xf32>, vector<16x1xf32>, vector<16x1xf32>, vector<16x1xf32>, vector<16x1xf32>, vector<16x1xf32>, vector<16x1xf32>, vector<16x1xf32> -> vector<160x1xf32>
    %40 = vector.broadcast %39 : vector<160x1xf32> to vector<160x16xf32>
    %41 = arith.mulf %38, %40 : vector<160x16xf32>
    %c0_42 = arith.constant 0 : index
    %c0_43 = arith.constant 0 : index
    %c0_44 = arith.constant 0 : index
    %42 = vector.load %arg1[%c0_42, %c0_43, %c0_44] : memref<2x16x12xf32, #tpu.memory_space<vmem>>, vector<1x16x12xf32>
    %43 = vector.shape_cast %42 : vector<1x16x12xf32> to vector<16x12xf32>
    %cst_45 = arith.constant dense<0.000000e+00> : vector<16x40xf32>
    %44 = tpu.matmul %43, %1, %cst_45 {dimension_numbers = #tpu.dot_dimension_numbers<[1], [0], [0], [1], [0, 0, 1, 1], [], []>} : vector<16x12xf32>, vector<12x40xf32>, vector<16x40xf32> -> vector<16x40xf32>
    %45 = vector.extract_strided_slice %41 {offsets = [0, 0], sizes = [80, 16], strides = [1, 1]} : vector<160x16xf32> to vector<80x16xf32>
    %cst_46 = arith.constant dense<0.000000e+00> : vector<80x40xf32>
    %46 = tpu.matmul %45, %44, %cst_46 {dimension_numbers = #tpu.dot_dimension_numbers<[1], [0], [0], [1], [0, 0, 1, 1], [], []>} : vector<80x16xf32>, vector<16x40xf32>, vector<80x40xf32> -> vector<80x40xf32>
    %47 = vector.extract_strided_slice %46 {offsets = [0, 0], sizes = [16, 40], strides = [1, 1]} : vector<80x40xf32> to vector<16x40xf32>
    %c0_47 = arith.constant 0 : index
    %c0_48 = arith.constant 0 : index
    %c0_49 = arith.constant 0 : index
    %48 = vector.load %arg4[%c0_47, %c0_48, %c0_49] : memref<5x1x40xf32, #tpu.memory_space<vmem>>, vector<1x1x40xf32>
    %49 = vector.shape_cast %48 : vector<1x1x40xf32> to vector<1x40xf32>
    %50 = vector.broadcast %49 : vector<1x40xf32> to vector<16x40xf32>
    %51 = arith.mulf %47, %50 : vector<16x40xf32>
    %52 = vector.extract_strided_slice %46 {offsets = [16, 0], sizes = [16, 40], strides = [1, 1]} : vector<80x40xf32> to vector<16x40xf32>
    %c1 = arith.constant 1 : index
    %c0_50 = arith.constant 0 : index
    %c0_51 = arith.constant 0 : index
    %53 = vector.load %arg4[%c1, %c0_50, %c0_51] : memref<5x1x40xf32, #tpu.memory_space<vmem>>, vector<1x1x40xf32>
    %54 = vector.shape_cast %53 : vector<1x1x40xf32> to vector<1x40xf32>
    %55 = vector.broadcast %54 : vector<1x40xf32> to vector<16x40xf32>
    %56 = arith.mulf %52, %55 : vector<16x40xf32>
    %57 = arith.addf %51, %56 : vector<16x40xf32>
    %58 = vector.extract_strided_slice %46 {offsets = [32, 0], sizes = [16, 40], strides = [1, 1]} : vector<80x40xf32> to vector<16x40xf32>
    %c2 = arith.constant 2 : index
    %c0_52 = arith.constant 0 : index
    %c0_53 = arith.constant 0 : index
    %59 = vector.load %arg4[%c2, %c0_52, %c0_53] : memref<5x1x40xf32, #tpu.memory_space<vmem>>, vector<1x1x40xf32>
    %60 = vector.shape_cast %59 : vector<1x1x40xf32> to vector<1x40xf32>
    %61 = vector.broadcast %60 : vector<1x40xf32> to vector<16x40xf32>
    %62 = arith.mulf %58, %61 : vector<16x40xf32>
    %63 = arith.addf %57, %62 : vector<16x40xf32>
    %64 = vector.extract_strided_slice %46 {offsets = [48, 0], sizes = [16, 40], strides = [1, 1]} : vector<80x40xf32> to vector<16x40xf32>
    %c3 = arith.constant 3 : index
    %c0_54 = arith.constant 0 : index
    %c0_55 = arith.constant 0 : index
    %65 = vector.load %arg4[%c3, %c0_54, %c0_55] : memref<5x1x40xf32, #tpu.memory_space<vmem>>, vector<1x1x40xf32>
    %66 = vector.shape_cast %65 : vector<1x1x40xf32> to vector<1x40xf32>
    %67 = vector.broadcast %66 : vector<1x40xf32> to vector<16x40xf32>
    %68 = arith.mulf %64, %67 : vector<16x40xf32>
    %69 = arith.addf %63, %68 : vector<16x40xf32>
    %70 = vector.extract_strided_slice %46 {offsets = [64, 0], sizes = [16, 40], strides = [1, 1]} : vector<80x40xf32> to vector<16x40xf32>
    %c4 = arith.constant 4 : index
    %c0_56 = arith.constant 0 : index
    %c0_57 = arith.constant 0 : index
    %71 = vector.load %arg4[%c4, %c0_56, %c0_57] : memref<5x1x40xf32, #tpu.memory_space<vmem>>, vector<1x1x40xf32>
    %72 = vector.shape_cast %71 : vector<1x1x40xf32> to vector<1x40xf32>
    %73 = vector.broadcast %72 : vector<1x40xf32> to vector<16x40xf32>
    %74 = arith.mulf %70, %73 : vector<16x40xf32>
    %75 = arith.addf %69, %74 : vector<16x40xf32>
    %76 = vector.broadcast %2 : vector<1x40xf32> to vector<16x40xf32>
    %77 = arith.mulf %75, %76 : vector<16x40xf32>
    %78 = vector.broadcast %3 : vector<1x40xf32> to vector<16x40xf32>
    %79 = arith.addf %77, %78 : vector<16x40xf32>
    %cst_58 = arith.constant 0.000000e+00 : f32
    %80 = vector.broadcast %cst_58 : f32 to vector<16x40xf32>
    %81 = arith.maximumf %79, %80 : vector<16x40xf32>
    %82 = vector.broadcast %23 : vector<16x1xf32> to vector<16x40xf32>
    %83 = arith.mulf %81, %82 : vector<16x40xf32>
    %cst_59 = arith.constant dense<0.000000e+00> : vector<16x40xf32>
    %84 = tpu.matmul %83, %4, %cst_59 {dimension_numbers = #tpu.dot_dimension_numbers<[1], [0], [0], [1], [0, 0, 1, 1], [], []>} : vector<16x40xf32>, vector<40x40xf32>, vector<16x40xf32> -> vector<16x40xf32>
    %85 = vector.extract_strided_slice %41 {offsets = [80, 0], sizes = [80, 16], strides = [1, 1]} : vector<160x16xf32> to vector<80x16xf32>
    %cst_60 = arith.constant dense<0.000000e+00> : vector<80x40xf32>
    %86 = tpu.matmul %85, %84, %cst_60 {dimension_numbers = #tpu.dot_dimension_numbers<[1], [0], [0], [1], [0, 0, 1, 1], [], []>} : vector<80x16xf32>, vector<16x40xf32>, vector<80x40xf32> -> vector<80x40xf32>
    %87 = vector.extract_strided_slice %86 {offsets = [0, 0], sizes = [16, 40], strides = [1, 1]} : vector<80x40xf32> to vector<16x40xf32>
    %c0_61 = arith.constant 0 : index
    %c0_62 = arith.constant 0 : index
    %c0_63 = arith.constant 0 : index
    %88 = vector.load %arg5[%c0_61, %c0_62, %c0_63] : memref<5x1x40xf32, #tpu.memory_space<vmem>>, vector<1x1x40xf32>
    %89 = vector.shape_cast %88 : vector<1x1x40xf32> to vector<1x40xf32>
    %90 = vector.broadcast %89 : vector<1x40xf32> to vector<16x40xf32>
    %91 = arith.mulf %87, %90 : vector<16x40xf32>
    %92 = vector.extract_strided_slice %86 {offsets = [16, 0], sizes = [16, 40], strides = [1, 1]} : vector<80x40xf32> to vector<16x40xf32>
    %c1_64 = arith.constant 1 : index
    %c0_65 = arith.constant 0 : index
    %c0_66 = arith.constant 0 : index
    %93 = vector.load %arg5[%c1_64, %c0_65, %c0_66] : memref<5x1x40xf32, #tpu.memory_space<vmem>>, vector<1x1x40xf32>
    %94 = vector.shape_cast %93 : vector<1x1x40xf32> to vector<1x40xf32>
    %95 = vector.broadcast %94 : vector<1x40xf32> to vector<16x40xf32>
    %96 = arith.mulf %92, %95 : vector<16x40xf32>
    %97 = arith.addf %91, %96 : vector<16x40xf32>
    %98 = vector.extract_strided_slice %86 {offsets = [32, 0], sizes = [16, 40], strides = [1, 1]} : vector<80x40xf32> to vector<16x40xf32>
    %c2_67 = arith.constant 2 : index
    %c0_68 = arith.constant 0 : index
    %c0_69 = arith.constant 0 : index
    %99 = vector.load %arg5[%c2_67, %c0_68, %c0_69] : memref<5x1x40xf32, #tpu.memory_space<vmem>>, vector<1x1x40xf32>
    %100 = vector.shape_cast %99 : vector<1x1x40xf32> to vector<1x40xf32>
    %101 = vector.broadcast %100 : vector<1x40xf32> to vector<16x40xf32>
    %102 = arith.mulf %98, %101 : vector<16x40xf32>
    %103 = arith.addf %97, %102 : vector<16x40xf32>
    %104 = vector.extract_strided_slice %86 {offsets = [48, 0], sizes = [16, 40], strides = [1, 1]} : vector<80x40xf32> to vector<16x40xf32>
    %c3_70 = arith.constant 3 : index
    %c0_71 = arith.constant 0 : index
    %c0_72 = arith.constant 0 : index
    %105 = vector.load %arg5[%c3_70, %c0_71, %c0_72] : memref<5x1x40xf32, #tpu.memory_space<vmem>>, vector<1x1x40xf32>
    %106 = vector.shape_cast %105 : vector<1x1x40xf32> to vector<1x40xf32>
    %107 = vector.broadcast %106 : vector<1x40xf32> to vector<16x40xf32>
    %108 = arith.mulf %104, %107 : vector<16x40xf32>
    %109 = arith.addf %103, %108 : vector<16x40xf32>
    %110 = vector.extract_strided_slice %86 {offsets = [64, 0], sizes = [16, 40], strides = [1, 1]} : vector<80x40xf32> to vector<16x40xf32>
    %c4_73 = arith.constant 4 : index
    %c0_74 = arith.constant 0 : index
    %c0_75 = arith.constant 0 : index
    %111 = vector.load %arg5[%c4_73, %c0_74, %c0_75] : memref<5x1x40xf32, #tpu.memory_space<vmem>>, vector<1x1x40xf32>
    %112 = vector.shape_cast %111 : vector<1x1x40xf32> to vector<1x40xf32>
    %113 = vector.broadcast %112 : vector<1x40xf32> to vector<16x40xf32>
    %114 = arith.mulf %110, %113 : vector<16x40xf32>
    %115 = arith.addf %109, %114 : vector<16x40xf32>
    %116 = vector.broadcast %5 : vector<1x40xf32> to vector<16x40xf32>
    %117 = arith.mulf %115, %116 : vector<16x40xf32>
    %118 = vector.broadcast %6 : vector<1x40xf32> to vector<16x40xf32>
    %119 = arith.addf %117, %118 : vector<16x40xf32>
    %cst_76 = arith.constant 0.000000e+00 : f32
    %120 = vector.broadcast %cst_76 : f32 to vector<16x40xf32>
    %121 = arith.maximumf %119, %120 : vector<16x40xf32>
    %122 = vector.broadcast %23 : vector<16x1xf32> to vector<16x40xf32>
    %123 = arith.mulf %121, %122 : vector<16x40xf32>
    %cst_77 = arith.constant dense<0.000000e+00> : vector<40xf32>
    %124 = vector.multi_reduction <add>, %123, %cst_77 [0] : vector<16x40xf32> to vector<40xf32>
    %125 = vector.shape_cast %124 : vector<40xf32> to vector<1x40xf32>
    %126 = arith.mulf %125, %7 : vector<1x40xf32>
    %127 = arith.addf %126, %8 : vector<1x40xf32>
    %cst_78 = arith.constant dense<0.000000e+00> : vector<1x32xf32>
    %128 = tpu.matmul %127, %9, %cst_78 {dimension_numbers = #tpu.dot_dimension_numbers<[1], [0], [0], [1], [0, 0, 1, 1], [], []>} : vector<1x40xf32>, vector<40x32xf32>, vector<1x32xf32> -> vector<1x32xf32>
    %129 = arith.mulf %128, %10 : vector<1x32xf32>
    %130 = arith.addf %129, %11 : vector<1x32xf32>
    %cst_79 = arith.constant 0.000000e+00 : f32
    %131 = vector.broadcast %cst_79 : f32 to vector<1x32xf32>
    %132 = arith.maximumf %130, %131 : vector<1x32xf32>
    %cst_80 = arith.constant dense<0.000000e+00> : vector<1x16xf32>
    %133 = tpu.matmul %132, %12, %cst_80 {dimension_numbers = #tpu.dot_dimension_numbers<[1], [0], [0], [1], [0, 0, 1, 1], [], []>} : vector<1x32xf32>, vector<32x16xf32>, vector<1x16xf32> -> vector<1x16xf32>
    %134 = arith.mulf %133, %13 : vector<1x16xf32>
    %135 = arith.addf %134, %14 : vector<1x16xf32>
    %cst_81 = arith.constant 0.000000e+00 : f32
    %136 = vector.broadcast %cst_81 : f32 to vector<1x16xf32>
    %137 = arith.maximumf %135, %136 : vector<1x16xf32>
    %cst_82 = arith.constant dense<0.000000e+00> : vector<1x3xf32>
    %138 = tpu.matmul %137, %15, %cst_82 {dimension_numbers = #tpu.dot_dimension_numbers<[1], [0], [0], [1], [0, 0, 1, 1], [], []>} : vector<1x16xf32>, vector<16x3xf32>, vector<1x3xf32> -> vector<1x3xf32>
    %c0_83 = arith.constant 0 : index
    %c0_84 = arith.constant 0 : index
    %139 = vector.load %arg21[%c0_83, %c0_84] : memref<2x3xf32, #tpu.memory_space<vmem>>, vector<1x3xf32>
    tpu.vector_store %arg21[%c0_83, %c0_84], %138 {strides = array<i32>} : memref<2x3xf32, #tpu.memory_space<vmem>>, vector<1x3xf32>,
    %c1_85 = arith.constant 1 : index
    %c0_86 = arith.constant 0 : index
    %c0_87 = arith.constant 0 : index
    %140 = vector.load %arg0[%c1_85, %c0_86, %c0_87] : memref<2x16x16xf32, #tpu.memory_space<vmem>>, vector<1x16x16xf32>
    %141 = vector.shape_cast %140 : vector<1x16x16xf32> to vector<16x16xf32>
    %cst_88 = arith.constant 1.000000e+00 : f32
    %142 = vector.broadcast %cst_88 : f32 to vector<16x16xf32>
    %143 = arith.subf %142, %141 : vector<16x16xf32>
    %cst_89 = arith.constant -1.000000e+09 : f32
    %144 = vector.broadcast %cst_89 : f32 to vector<16x16xf32>
    %145 = arith.mulf %143, %144 : vector<16x16xf32>
    %cst_90 = arith.constant dense<0xFF800000> : vector<16xf32>
    %146 = vector.multi_reduction <maximumf>, %141, %cst_90 [1] : vector<16x16xf32> to vector<16xf32>
    %147 = vector.shape_cast %146 : vector<16xf32> to vector<16x1xf32>
    %c1_91 = arith.constant 1 : index
    %c0_92 = arith.constant 0 : index
    %c0_93 = arith.constant 0 : index
    %148 = vector.load %arg2[%c1_91, %c0_92, %c0_93] : memref<2x320x16xf32, #tpu.memory_space<vmem>>, vector<1x320x16xf32>
    %149 = vector.shape_cast %148 : vector<1x320x16xf32> to vector<320x16xf32>
    %cst_94 = arith.constant dense<0.000000e+00> : vector<160x16xf32>
    %150 = tpu.matmul %0, %149, %cst_94 {dimension_numbers = #tpu.dot_dimension_numbers<[1], [0], [0], [1], [0, 0, 1, 1], [], []>} : vector<160x320xf32>, vector<320x16xf32>, vector<160x16xf32> -> vector<160x16xf32>
    %151 = tpu.concatenate %145, %145, %145, %145, %145, %145, %145, %145, %145, %145 in 0 : vector<16x16xf32>, vector<16x16xf32>, vector<16x16xf32>, vector<16x16xf32>, vector<16x16xf32>, vector<16x16xf32>, vector<16x16xf32>, vector<16x16xf32>, vector<16x16xf32>, vector<16x16xf32> -> vector<160x16xf32>
    %152 = arith.addf %150, %151 : vector<160x16xf32>
    %cst_95 = arith.constant dense<0xFF800000> : vector<160xf32>
    %153 = vector.multi_reduction <maximumf>, %152, %cst_95 [1] : vector<160x16xf32> to vector<160xf32>
    %154 = vector.shape_cast %153 : vector<160xf32> to vector<160x1xf32>
    %155 = vector.broadcast %154 : vector<160x1xf32> to vector<160x16xf32>
    %156 = arith.subf %152, %155 : vector<160x16xf32>
    %157 = math.exp %156 : vector<160x16xf32>
    %cst_96 = arith.constant dense<0.000000e+00> : vector<160xf32>
    %158 = vector.multi_reduction <add>, %157, %cst_96 [1] : vector<160x16xf32> to vector<160xf32>
    %159 = vector.shape_cast %158 : vector<160xf32> to vector<160x1xf32>
    %160 = tpu.reciprocal %159 {approx = true} : vector<160x1xf32> -> vector<160x1xf32>
    %161 = vector.broadcast %160 : vector<160x1xf32> to vector<160x16xf32>
    %162 = arith.mulf %157, %161 : vector<160x16xf32>
    %163 = tpu.concatenate %147, %147, %147, %147, %147, %147, %147, %147, %147, %147 in 0 : vector<16x1xf32>, vector<16x1xf32>, vector<16x1xf32>, vector<16x1xf32>, vector<16x1xf32>, vector<16x1xf32>, vector<16x1xf32>, vector<16x1xf32>, vector<16x1xf32>, vector<16x1xf32> -> vector<160x1xf32>
    %164 = vector.broadcast %163 : vector<160x1xf32> to vector<160x16xf32>
    %165 = arith.mulf %162, %164 : vector<160x16xf32>
    %c1_97 = arith.constant 1 : index
    %c0_98 = arith.constant 0 : index
    %c0_99 = arith.constant 0 : index
    %166 = vector.load %arg1[%c1_97, %c0_98, %c0_99] : memref<2x16x12xf32, #tpu.memory_space<vmem>>, vector<1x16x12xf32>
    %167 = vector.shape_cast %166 : vector<1x16x12xf32> to vector<16x12xf32>
    %cst_100 = arith.constant dense<0.000000e+00> : vector<16x40xf32>
    %168 = tpu.matmul %167, %1, %cst_100 {dimension_numbers = #tpu.dot_dimension_numbers<[1], [0], [0], [1], [0, 0, 1, 1], [], []>} : vector<16x12xf32>, vector<12x40xf32>, vector<16x40xf32> -> vector<16x40xf32>
    %169 = vector.extract_strided_slice %165 {offsets = [0, 0], sizes = [80, 16], strides = [1, 1]} : vector<160x16xf32> to vector<80x16xf32>
    %cst_101 = arith.constant dense<0.000000e+00> : vector<80x40xf32>
    %170 = tpu.matmul %169, %168, %cst_101 {dimension_numbers = #tpu.dot_dimension_numbers<[1], [0], [0], [1], [0, 0, 1, 1], [], []>} : vector<80x16xf32>, vector<16x40xf32>, vector<80x40xf32> -> vector<80x40xf32>
    %171 = vector.extract_strided_slice %170 {offsets = [0, 0], sizes = [16, 40], strides = [1, 1]} : vector<80x40xf32> to vector<16x40xf32>
    %c0_102 = arith.constant 0 : index
    %c0_103 = arith.constant 0 : index
    %c0_104 = arith.constant 0 : index
    %172 = vector.load %arg4[%c0_102, %c0_103, %c0_104] : memref<5x1x40xf32, #tpu.memory_space<vmem>>, vector<1x1x40xf32>
    %173 = vector.shape_cast %172 : vector<1x1x40xf32> to vector<1x40xf32>
    %174 = vector.broadcast %173 : vector<1x40xf32> to vector<16x40xf32>
    %175 = arith.mulf %171, %174 : vector<16x40xf32>
    %176 = vector.extract_strided_slice %170 {offsets = [16, 0], sizes = [16, 40], strides = [1, 1]} : vector<80x40xf32> to vector<16x40xf32>
    %c1_105 = arith.constant 1 : index
    %c0_106 = arith.constant 0 : index
    %c0_107 = arith.constant 0 : index
    %177 = vector.load %arg4[%c1_105, %c0_106, %c0_107] : memref<5x1x40xf32, #tpu.memory_space<vmem>>, vector<1x1x40xf32>
    %178 = vector.shape_cast %177 : vector<1x1x40xf32> to vector<1x40xf32>
    %179 = vector.broadcast %178 : vector<1x40xf32> to vector<16x40xf32>
    %180 = arith.mulf %176, %179 : vector<16x40xf32>
    %181 = arith.addf %175, %180 : vector<16x40xf32>
    %182 = vector.extract_strided_slice %170 {offsets = [32, 0], sizes = [16, 40], strides = [1, 1]} : vector<80x40xf32> to vector<16x40xf32>
    %c2_108 = arith.constant 2 : index
    %c0_109 = arith.constant 0 : index
    %c0_110 = arith.constant 0 : index
    %183 = vector.load %arg4[%c2_108, %c0_109, %c0_110] : memref<5x1x40xf32, #tpu.memory_space<vmem>>, vector<1x1x40xf32>
    %184 = vector.shape_cast %183 : vector<1x1x40xf32> to vector<1x40xf32>
    %185 = vector.broadcast %184 : vector<1x40xf32> to vector<16x40xf32>
    %186 = arith.mulf %182, %185 : vector<16x40xf32>
    %187 = arith.addf %181, %186 : vector<16x40xf32>
    %188 = vector.extract_strided_slice %170 {offsets = [48, 0], sizes = [16, 40], strides = [1, 1]} : vector<80x40xf32> to vector<16x40xf32>
    %c3_111 = arith.constant 3 : index
    %c0_112 = arith.constant 0 : index
    %c0_113 = arith.constant 0 : index
    %189 = vector.load %arg4[%c3_111, %c0_112, %c0_113] : memref<5x1x40xf32, #tpu.memory_space<vmem>>, vector<1x1x40xf32>
    %190 = vector.shape_cast %189 : vector<1x1x40xf32> to vector<1x40xf32>
    %191 = vector.broadcast %190 : vector<1x40xf32> to vector<16x40xf32>
    %192 = arith.mulf %188, %191 : vector<16x40xf32>
    %193 = arith.addf %187, %192 : vector<16x40xf32>
    %194 = vector.extract_strided_slice %170 {offsets = [64, 0], sizes = [16, 40], strides = [1, 1]} : vector<80x40xf32> to vector<16x40xf32>
    %c4_114 = arith.constant 4 : index
    %c0_115 = arith.constant 0 : index
    %c0_116 = arith.constant 0 : index
    %195 = vector.load %arg4[%c4_114, %c0_115, %c0_116] : memref<5x1x40xf32, #tpu.memory_space<vmem>>, vector<1x1x40xf32>
    %196 = vector.shape_cast %195 : vector<1x1x40xf32> to vector<1x40xf32>
    %197 = vector.broadcast %196 : vector<1x40xf32> to vector<16x40xf32>
    %198 = arith.mulf %194, %197 : vector<16x40xf32>
    %199 = arith.addf %193, %198 : vector<16x40xf32>
    %200 = vector.broadcast %2 : vector<1x40xf32> to vector<16x40xf32>
    %201 = arith.mulf %199, %200 : vector<16x40xf32>
    %202 = vector.broadcast %3 : vector<1x40xf32> to vector<16x40xf32>
    %203 = arith.addf %201, %202 : vector<16x40xf32>
    %cst_117 = arith.constant 0.000000e+00 : f32
    %204 = vector.broadcast %cst_117 : f32 to vector<16x40xf32>
    %205 = arith.maximumf %203, %204 : vector<16x40xf32>
    %206 = vector.broadcast %147 : vector<16x1xf32> to vector<16x40xf32>
    %207 = arith.mulf %205, %206 : vector<16x40xf32>
    %cst_118 = arith.constant dense<0.000000e+00> : vector<16x40xf32>
    %208 = tpu.matmul %207, %4, %cst_118 {dimension_numbers = #tpu.dot_dimension_numbers<[1], [0], [0], [1], [0, 0, 1, 1], [], []>} : vector<16x40xf32>, vector<40x40xf32>, vector<16x40xf32> -> vector<16x40xf32>
    %209 = vector.extract_strided_slice %165 {offsets = [80, 0], sizes = [80, 16], strides = [1, 1]} : vector<160x16xf32> to vector<80x16xf32>
    %cst_119 = arith.constant dense<0.000000e+00> : vector<80x40xf32>
    %210 = tpu.matmul %209, %208, %cst_119 {dimension_numbers = #tpu.dot_dimension_numbers<[1], [0], [0], [1], [0, 0, 1, 1], [], []>} : vector<80x16xf32>, vector<16x40xf32>, vector<80x40xf32> -> vector<80x40xf32>
    %211 = vector.extract_strided_slice %210 {offsets = [0, 0], sizes = [16, 40], strides = [1, 1]} : vector<80x40xf32> to vector<16x40xf32>
    %c0_120 = arith.constant 0 : index
    %c0_121 = arith.constant 0 : index
    %c0_122 = arith.constant 0 : index
    %212 = vector.load %arg5[%c0_120, %c0_121, %c0_122] : memref<5x1x40xf32, #tpu.memory_space<vmem>>, vector<1x1x40xf32>
    %213 = vector.shape_cast %212 : vector<1x1x40xf32> to vector<1x40xf32>
    %214 = vector.broadcast %213 : vector<1x40xf32> to vector<16x40xf32>
    %215 = arith.mulf %211, %214 : vector<16x40xf32>
    %216 = vector.extract_strided_slice %210 {offsets = [16, 0], sizes = [16, 40], strides = [1, 1]} : vector<80x40xf32> to vector<16x40xf32>
    %c1_123 = arith.constant 1 : index
    %c0_124 = arith.constant 0 : index
    %c0_125 = arith.constant 0 : index
    %217 = vector.load %arg5[%c1_123, %c0_124, %c0_125] : memref<5x1x40xf32, #tpu.memory_space<vmem>>, vector<1x1x40xf32>
    %218 = vector.shape_cast %217 : vector<1x1x40xf32> to vector<1x40xf32>
    %219 = vector.broadcast %218 : vector<1x40xf32> to vector<16x40xf32>
    %220 = arith.mulf %216, %219 : vector<16x40xf32>
    %221 = arith.addf %215, %220 : vector<16x40xf32>
    %222 = vector.extract_strided_slice %210 {offsets = [32, 0], sizes = [16, 40], strides = [1, 1]} : vector<80x40xf32> to vector<16x40xf32>
    %c2_126 = arith.constant 2 : index
    %c0_127 = arith.constant 0 : index
    %c0_128 = arith.constant 0 : index
    %223 = vector.load %arg5[%c2_126, %c0_127, %c0_128] : memref<5x1x40xf32, #tpu.memory_space<vmem>>, vector<1x1x40xf32>
    %224 = vector.shape_cast %223 : vector<1x1x40xf32> to vector<1x40xf32>
    %225 = vector.broadcast %224 : vector<1x40xf32> to vector<16x40xf32>
    %226 = arith.mulf %222, %225 : vector<16x40xf32>
    %227 = arith.addf %221, %226 : vector<16x40xf32>
    %228 = vector.extract_strided_slice %210 {offsets = [48, 0], sizes = [16, 40], strides = [1, 1]} : vector<80x40xf32> to vector<16x40xf32>
    %c3_129 = arith.constant 3 : index
    %c0_130 = arith.constant 0 : index
    %c0_131 = arith.constant 0 : index
    %229 = vector.load %arg5[%c3_129, %c0_130, %c0_131] : memref<5x1x40xf32, #tpu.memory_space<vmem>>, vector<1x1x40xf32>
    %230 = vector.shape_cast %229 : vector<1x1x40xf32> to vector<1x40xf32>
    %231 = vector.broadcast %230 : vector<1x40xf32> to vector<16x40xf32>
    %232 = arith.mulf %228, %231 : vector<16x40xf32>
    %233 = arith.addf %227, %232 : vector<16x40xf32>
    %234 = vector.extract_strided_slice %210 {offsets = [64, 0], sizes = [16, 40], strides = [1, 1]} : vector<80x40xf32> to vector<16x40xf32>
    %c4_132 = arith.constant 4 : index
    %c0_133 = arith.constant 0 : index
    %c0_134 = arith.constant 0 : index
    %235 = vector.load %arg5[%c4_132, %c0_133, %c0_134] : memref<5x1x40xf32, #tpu.memory_space<vmem>>, vector<1x1x40xf32>
    %236 = vector.shape_cast %235 : vector<1x1x40xf32> to vector<1x40xf32>
    %237 = vector.broadcast %236 : vector<1x40xf32> to vector<16x40xf32>
    %238 = arith.mulf %234, %237 : vector<16x40xf32>
    %239 = arith.addf %233, %238 : vector<16x40xf32>
    %240 = vector.broadcast %5 : vector<1x40xf32> to vector<16x40xf32>
    %241 = arith.mulf %239, %240 : vector<16x40xf32>
    %242 = vector.broadcast %6 : vector<1x40xf32> to vector<16x40xf32>
    %243 = arith.addf %241, %242 : vector<16x40xf32>
    %cst_135 = arith.constant 0.000000e+00 : f32
    %244 = vector.broadcast %cst_135 : f32 to vector<16x40xf32>
    %245 = arith.maximumf %243, %244 : vector<16x40xf32>
    %246 = vector.broadcast %147 : vector<16x1xf32> to vector<16x40xf32>
    %247 = arith.mulf %245, %246 : vector<16x40xf32>
    %cst_136 = arith.constant dense<0.000000e+00> : vector<40xf32>
    %248 = vector.multi_reduction <add>, %247, %cst_136 [0] : vector<16x40xf32> to vector<40xf32>
    %249 = vector.shape_cast %248 : vector<40xf32> to vector<1x40xf32>
    %250 = arith.mulf %249, %7 : vector<1x40xf32>
    %251 = arith.addf %250, %8 : vector<1x40xf32>
    %cst_137 = arith.constant dense<0.000000e+00> : vector<1x32xf32>
    %252 = tpu.matmul %251, %9, %cst_137 {dimension_numbers = #tpu.dot_dimension_numbers<[1], [0], [0], [1], [0, 0, 1, 1], [], []>} : vector<1x40xf32>, vector<40x32xf32>, vector<1x32xf32> -> vector<1x32xf32>
    %253 = arith.mulf %252, %10 : vector<1x32xf32>
    %254 = arith.addf %253, %11 : vector<1x32xf32>
    %cst_138 = arith.constant 0.000000e+00 : f32
    %255 = vector.broadcast %cst_138 : f32 to vector<1x32xf32>
    %256 = arith.maximumf %254, %255 : vector<1x32xf32>
    %cst_139 = arith.constant dense<0.000000e+00> : vector<1x16xf32>
    %257 = tpu.matmul %256, %12, %cst_139 {dimension_numbers = #tpu.dot_dimension_numbers<[1], [0], [0], [1], [0, 0, 1, 1], [], []>} : vector<1x32xf32>, vector<32x16xf32>, vector<1x16xf32> -> vector<1x16xf32>
    %258 = arith.mulf %257, %13 : vector<1x16xf32>
    %259 = arith.addf %258, %14 : vector<1x16xf32>
    %cst_140 = arith.constant 0.000000e+00 : f32
    %260 = vector.broadcast %cst_140 : f32 to vector<1x16xf32>
    %261 = arith.maximumf %259, %260 : vector<1x16xf32>
    %cst_141 = arith.constant dense<0.000000e+00> : vector<1x3xf32>
    %262 = tpu.matmul %261, %15, %cst_141 {dimension_numbers = #tpu.dot_dimension_numbers<[1], [0], [0], [1], [0, 0, 1, 1], [], []>} : vector<1x16xf32>, vector<16x3xf32>, vector<1x3xf32> -> vector<1x3xf32>
    %c1_142 = arith.constant 1 : index
    %c0_143 = arith.constant 0 : index
    %263 = vector.load %arg21[%c1_142, %c0_143] : memref<2x3xf32, #tpu.memory_space<vmem>>, vector<1x3xf32>
    tpu.vector_store %arg21[%c1_142, %c0_143], %262 {strides = array<i32>} : memref<2x3xf32, #tpu.memory_space<vmem>>, vector<1x3xf32>,
    return
  }
}

</mosaic_0001>

<bundles_post_ra>
// kernel: tpu_custom_call.1
= control target key start
LH: loop header
LB: loop body
LE: loop exit
PB: predicated region body
PF: predicated region fallthrough
CT: control target
= control target key end

     0   :  { %s4238_s0 = inlined_call_operand.vmem [shape: f32[2,16,16], index: 0, kind: input, shape index: {}]   ;;  %s4239_s1 = inlined_call_operand.vmem [shape: f32[2,16,12], index: 1, kind: input, shape index: {}]   ;;  %s4240_s2 = inlined_call_operand.vmem [shape: f32[2,320,16], index: 2, kind: input, shape index: {}]   ;;  %s4241_s3 = inlined_call_operand.vmem [shape: f32[160,320], index: 3, kind: input, shape index: {}]   ;;  %s4242_s4 = inlined_call_operand.vmem [shape: f32[5,1,40], index: 4, kind: input, shape index: {}]   ;;  %s4243_s5 = inlined_call_operand.vmem [shape: f32[5,1,40], index: 5, kind: input, shape index: {}]   ;;  %s4244_s6 = inlined_call_operand.vmem [shape: f32[12,40], index: 6, kind: input, shape index: {}]   ;;  %s4245_s7 = inlined_call_operand.vmem [shape: f32[1,40], index: 7, kind: input, shape index: {}]   ;;  %s4246_s8 = inlined_call_operand.vmem [shape: f32[1,40], index: 8, kind: input, shape index: {}]   ;;  %s4247_s9 = inlined_call_operand.vmem [shape: f32[40,40], index: 9, kind: input, shape index: {}]   ;;  %s4248_s10 = inlined_call_operand.vmem [shape: f32[1,40], index: 10, kind: input, shape index: {}]   ;;  %s4249_s11 = inlined_call_operand.vmem [shape: f32[1,40], index: 11, kind: input, shape index: {}]   ;;  %s4250_s12 = inlined_call_operand.vmem [shape: f32[1,40], index: 12, kind: input, shape index: {}]   ;;  %s4251_s13 = inlined_call_operand.vmem [shape: f32[1,40], index: 13, kind: input, shape index: {}]   ;;  %s4252_s14 = inlined_call_operand.vmem [shape: f32[40,32], index: 14, kind: input, shape index: {}]   ;;  %s4253_s15 = inlined_call_operand.vmem [shape: f32[1,32], index: 15, kind: input, shape index: {}]   ;;  %s4254_s16 = inlined_call_operand.vmem [shape: f32[1,32], index: 16, kind: input, shape index: {}]   ;;  %s4255_s17 = inlined_call_operand.vmem [shape: f32[32,16], index: 17, kind: input, shape index: {}]   ;;  %s4256_s18 = inlined_call_operand.vmem [shape: f32[1,16], index: 18, kind: input, shape index: {}]   ;;  %s4257_s19 = inlined_call_operand.vmem [shape: f32[1,16], index: 19, kind: input, shape index: {}]   ;;  %s4258_s20 = inlined_call_operand.vmem [shape: f32[16,3], index: 20, kind: input, shape index: {}]   ;;  %s4259_s21 = inlined_call_operand.hbm [shape: f32[2,3], index: 21, kind: output, shape index: {}]  }
   0x1   :  { %4266 = sst [smem:[#allocation5_spill]] %s4238_s0 }
   0x2   :  { %4267 = sst [smem:[#allocation6_spill]] %s4239_s1 }
   0x3   :  { %4268 = sst [smem:[#allocation7_spill]] %s4240_s2 }
   0x4   :  { %4269 = sst [smem:[#allocation8_spill]] %s4241_s3 }
   0x5   :  { %4270 = sst [smem:[#allocation9_spill]] %s4242_s4 }
   0x6   :  { %4271 = sst [smem:[#allocation10_spill]] %s4243_s5 }
   0x7   :  { %4272 = sst [smem:[#allocation11_spill]] %s4259_s21 }
   0x8   :  { %s4273_s26 = sld [smem:[#allocation7_spill]]  ;;  %vm210_vm0 = vcmask 523264  }
   0x9   :  { %s4274_s0 = sld [smem:[#allocation8_spill]] }
   0xe   :  { %v185_v0 = vld [vmem:[%s4273_s26 + $0x78] sm:$0xff]  ;;  %v184_v1 = vld [vmem:[%s4273_s26 + $0x70] sm:$0xff]  ;;  %v183_v4 = vld [vmem:[%s4273_s26 + $0x68] sm:$0xff] }
   0xf   :  { %v201_v2 = vld [vmem:[%s4273_s26 + $0xf8] sm:$0xff]  ;;  %271 = vmatpush.msra.mxu0 %v185_v0  ;;  %v200_v3 = vld [vmem:[%s4273_s26 + $0xf0] sm:$0xff]  ;;  %v199_v5 = vld [vmem:[%s4273_s26 + $0xe8] sm:$0xff] }
  0x10   :  { %348 = vmatpush.msra.mxu1 %v201_v2  ;;  %v182_v6 = vld [vmem:[%s4273_s26 + $0x60] sm:$0xff]  ;;  %v209_v8 = vld [vmem:[%s4273_s26 + $0x138] sm:$0xff]  ;;  %v208_v11 = vld [vmem:[%s4273_s26 + $0x130] sm:$0xff] }
  0x11   :  { %272 = vmatpush.msra.mxu0 %v184_v1  ;;  %v198_v7 = vld [vmem:[%s4273_s26 + $0xe0] sm:$0xff]  ;;  %v181_v9 = vld [vmem:[%s4273_s26 + $0x58] sm:$0xff]  ;;  %433 = vmatpush.msra.mxu2 %v209_v8  ;;  %v207_v12 = vld [vmem:[%s4273_s26 + $0x128] sm:$0xff] }
  0x12   :  { %349 = vmatpush.msra.mxu1 %v200_v3  ;;  %v197_v10 = vld [vmem:[%s4273_s26 + $0xd8] sm:$0xff]  ;;  %v180_v13 = vld [vmem:[%s4273_s26 + $0x50] sm:$0xff]  ;;  %v206_v15 = vld [vmem:[%s4273_s26 + $0x120] sm:$0xff] }
  0x13   :  { %273 = vmatpush.msra.mxu0 %v183_v4  ;;  %v196_v14 = vld [vmem:[%s4273_s26 + $0xd0] sm:$0xff]  ;;  %434 = vmatpush.msra.mxu2 %v208_v11  ;;  %v179_v16 = vld [vmem:[%s4273_s26 + $0x48] sm:$0xff]  ;;  %v205_v18 = vld [vmem:[%s4273_s26 + $0x118] sm:$0xff] }
  0x14   :  { %350 = vmatpush.msra.mxu1 %v199_v5  ;;  %v195_v17 = vld [vmem:[%s4273_s26 + $0xc8] sm:$0xff]  ;;  %v178_v19 = vld [vmem:[%s4273_s26 + $0x40] sm:$0xff]  ;;  %v204_v21 = vld [vmem:[%s4273_s26 + $0x110] sm:$0xff] }
  0x15   :  { %274 = vmatpush.msra.mxu0 %v182_v6  ;;  %435 = vmatpush.msra.mxu2 %v207_v12  ;;  %v194_v20 = vld [vmem:[%s4273_s26 + $0xc0] sm:$0xff]  ;;  %v177_v22 = vld [vmem:[%s4273_s26 + $0x38] sm:$0xff]  ;;  %v176_v24 = vld [vmem:[%s4273_s26 + $0x30] sm:$0xff] }
  0x16   :  { %351 = vmatpush.msra.mxu1 %v198_v7  ;;  %v193_v23 = vld [vmem:[%s4273_s26 + $0xb8] sm:$0xff]  ;;  %v203_v25 = vld [vmem:[%s4273_s26 + $0x108] sm:$0xff]  ;;  %v192_v27 = vld [vmem:[%s4273_s26 + $0xb0] sm:$0xff] }
  0x17   :  { %275 = vmatpush.msra.mxu0 %v181_v9  ;;  %436 = vmatpush.msra.mxu2 %v206_v15  ;;  %v175_v26 = vld [vmem:[%s4273_s26 + $0x28] sm:$0xff]  ;;  %v202_v29 = vld [vmem:[%s4273_s26 + $0x100] sm:$0xff]  ;;  %v71_v30 = vld [vmem:[%s4274_s0 + $0x10] sm:$0xff] }
  0x18   :  { %352 = vmatpush.msra.mxu1 %v197_v10  ;;  %v191_v28 = vld [vmem:[%s4273_s26 + $0xa8] sm:$0xff]  ;;  %v174_v31 = vld [vmem:[%s4273_s26 + $0x20] sm:$0xff]  ;;  %v173_v33 = vld [vmem:[%s4273_s26 + $0x18] sm:$0xff] }
  0x19   :  { %276 = vmatpush.msra.mxu0 %v180_v13  ;;  %437 = vmatpush.msra.mxu2 %v205_v18  ;;  %v190_v32 = vld [vmem:[%s4273_s26 + $0xa0] sm:$0xff]  ;;  %v189_v34 = vld [vmem:[%s4273_s26 + $0x98] sm:$0xff]  ;;  %v172_v35 = vld [vmem:[%s4273_s26 + $0x10] sm:$0xff] }
  0x1a   :  { %353 = vmatpush.msra.mxu1 %v196_v14  ;;  %v188_v36 = vld [vmem:[%s4273_s26 + $0x90] sm:$0xff]  ;;  %v171_v37 = vld [vmem:[%s4273_s26 + $0x8] sm:$0xff] }
  0x1b   :  { %277 = vmatpush.msra.mxu0 %v179_v16  ;;  %438 = vmatpush.msra.mxu2 %v204_v21  ;;  %v187_v38 = vld [vmem:[%s4273_s26 + $0x88] sm:$0xff] }
  0x1c   :  { %354 = vmatpush.msra.mxu1 %v195_v17 }
  0x1d   :  { %278 = vmatpush.msra.mxu0 %v178_v19  ;;  %439 = vmatpush.msra.mxu2 %v203_v25 }
  0x1e   :  { %355 = vmatpush.msra.mxu1 %v194_v20 }
  0x1f   :  { %279 = vmatpush.msra.mxu0 %v177_v22  ;;  %440 = vmatpush.msra.mxu2 %v202_v29 }
  0x20   :  { %356 = vmatpush.msra.mxu1 %v193_v23  ;;  %2118 = vmatmul.msk.f32.vlgmr.msra.gmra.mxu2 %vm210_vm0, %v71_v30 }
  0x21   :  { %280 = vmatpush.msra.mxu0 %v176_v24 }
  0x22   :  { %357 = vmatpush.msra.mxu1 %v192_v27 }
  0x23   :  { %281 = vmatpush.msra.mxu0 %v175_v26 }
  0x24   :  { %358 = vmatpush.msra.mxu1 %v191_v28 }
  0x25   :  { %282 = vmatpush.msra.mxu0 %v174_v31 }
  0x26   :  { %359 = vmatpush.msra.mxu1 %v190_v32 }
  0x27   :  { %283 = vmatpush.msra.mxu0 %v173_v33 }
  0x28   :  { %360 = vmatpush.msra.mxu1 %v189_v34 }
  0x29   :  { %26 = vsyncpa [#allocation3], 0  ;;  %284 = vmatpush.msra.mxu0 %v172_v35  ;;  %v74_v39 = vld [vmem:[%s4274_s0 + $0x28] sm:$0xff]  ;;  %v170_v40 = vld [vmem:[%s4273_s26] sm:$0xff]  ;;  %s4275_s5 = sld [smem:[#allocation5_spill]]  ;;  %vm163_vm1 = vcmask 130048  }
  0x2a   :  { %361 = vmatpush.msra.mxu1 %v188_v36  ;;  %v186_v41 = vld [vmem:[%s4273_s26 + $0x80] sm:$0xff]  ;;  %v70_v43 = vld [vmem:[%s4274_s0 + $0x8] sm:$0xff]  ;;  %2119 = vmatmul.msk.f32.gmra.mxu2 %vm210_vm0, %v74_v39  ;;  %v72_v45 = vld [vmem:[%s4274_s0 + $0x18] sm:$0xff]  ;;  %vm761_vm2 = vcmask 1043456   ;;  %s4276_s28 = sld [smem:[#allocation6_spill]]  ;;  %vm754_vm3 = vcmask 97280  }
  0x2b   :  { %285 = vmatpush.msra.mxu0 %v171_v37  ;;  %v69_v42 = vld [vmem:[%s4274_s0] sm:$0xff]  ;;  %v80_v47 = vld [vmem:[%s4274_s0 + $0x58] sm:$0xff]  ;;  %v75_v48 = vld [vmem:[%s4274_s0 + $0x30] sm:$0xff]  ;;  %s4277_s23 = sld [smem:[#allocation9_spill]]  ;;  %vm921_vm4 = vcmask 326656   ;;  %vm1121_vm5 = vcmask 261120  }
  0x2c   :  { %362 = vmatpush.msra.mxu1 %v187_v38  ;;  %v77_v44 = vld [vmem:[%s4274_s0 + $0x40] sm:$0xff]  ;;  %v76_v49 = vld [vmem:[%s4274_s0 + $0x38] sm:$0xff]  ;;  %v83_v50 = vld [vmem:[%s4274_s0 + $0x70] sm:$0xff]  ;;  %s4278_s2 = sld [smem:[#allocation10_spill]]  ;;  %vm1171_vm6 = vcmask 16384  }
  0x2d   :  { %286 = vmatpush.msra.mxu0 %v170_v40  ;;  %v73_v46 = vld [vmem:[%s4274_s0 + $0x20] sm:$0xff]  ;;  %v78_v51 = vld [vmem:[%s4274_s0 + $0x48] sm:$0xff]  ;;  %v79_v52 = vld [vmem:[%s4274_s0 + $0x50] sm:$0xff] }
  0x2e   :  { %363 = vmatpush.msra.mxu1 %v186_v41  ;;  %287 = vmatmul.f32.vlgmr.msra.gmra.mxu0 %v69_v42  ;;  %v86_v53 = vld [vmem:[%s4274_s0 + $0x88] sm:$0xff]  ;;  %v81_v54 = vld [vmem:[%s4274_s0 + $0x60] sm:$0xff]  ;;  %v84_v57 = vld [vmem:[%s4274_s0 + $0x78] sm:$0xff] }
  0x2f   :  { %364 = vmatmul.f32.vlgmr.msra.gmra.mxu1 %v70_v43  ;;  %v82_v55 = vld [vmem:[%s4274_s0 + $0x68] sm:$0xff]  ;;  %v89_v56 = vld [vmem:[%s4274_s0 + $0xa0] sm:$0xff]  ;;  %v92_v59 = vld [vmem:[%s4274_s0 + $0xb8] sm:$0xff] }
  0x30   :  { %v85_v58 = vld [vmem:[%s4274_s0 + $0x80] sm:$0xff]  ;;  %v87_v60 = vld [vmem:[%s4274_s0 + $0x90] sm:$0xff]  ;;  %v88_v61 = vld [vmem:[%s4274_s0 + $0x98] sm:$0xff] }
  0x31   :  { %v95_v62 = vld [vmem:[%s4274_s0 + $0xd0] sm:$0xff]  ;;  %v90_v63 = vld [vmem:[%s4274_s0 + $0xa8] sm:$0xff]  ;;  %v93_v2 = vld [vmem:[%s4274_s0 + $0xc0] sm:$0xff] }
  0x32   :  { %2120 = vmatmul.msk.f32.gmra.mxu2 %vm210_vm0, %v77_v44  ;;  %v91_v0 = vld [vmem:[%s4274_s0 + $0xb0] sm:$0xff]  ;;  %v98_v1 = vld [vmem:[%s4274_s0 + $0xe8] sm:$0xff]  ;;  %v96_v4 = vld [vmem:[%s4274_s0 + $0xd8] sm:$0xff] }
  0x33   :  { %v94_v3 = vld [vmem:[%s4274_s0 + $0xc8] sm:$0xff]  ;;  %v97_v5 = vld [vmem:[%s4274_s0 + $0xe0] sm:$0xff]  ;;  %v99_v39 = vld [vmem:[%s4274_s0 + $0xf0] sm:$0xff] }
  0x34   :  { %v157_v6 = vld [vmem:[%s4275_s5] sm:$0xff]  ;;  %v158_v11 = vld [vmem:[%s4275_s5 + $0x8] sm:$0xff]  ;;  %v100_v42 = vld [vmem:[%s4274_s0 + $0xf8] sm:$0xff] }
  0x35   :  { %v164_v7 = vsel %vm163_vm1, %v157_v6, -inf  ;;  %v159_v8 = vsub.f32 1.0, %v157_v6  ;;  %v160_v15 = vsub.f32 1.0, %v158_v11  ;;  %v101_v37 = vld [vmem:[%s4274_s0 + $0x100] sm:$0xff] }
  0x36   :  { %290 = vmatmul.f32.gmra.mxu0 %v72_v45  ;;  %165 = vmax.xlane.f32.xlu1 %v164_v7  ;;  %v109_v7 = vld [vmem:[%s4274_s0 + $0x140] sm:$0xff] }
  0x37   :  { %367 = vmatmul.f32.gmra.mxu1 %v73_v46  ;;  %v2906_v10 = vmul.f32 -1e+09, %v159_v8  ;;  %v2912_v18 = vmul.f32 -1e+09, %v160_v15 }
  0x3a   :  { %2121 = vmatmul.msk.f32.gmra.mxu2 %vm210_vm0, %v80_v47  ;;  %v104_v47 = vld [vmem:[%s4274_s0 + $0x118] sm:$0xff] }
  0x3e   :  { %293 = vmatmul.f32.gmra.mxu0 %v75_v48 }
  0x3f   :  { %370 = vmatmul.f32.gmra.mxu1 %v76_v49  ;;  %v102_v49 = vld [vmem:[%s4274_s0 + $0x108] sm:$0xff] }
  0x42   :  { %2122 = vmatmul.msk.f32.gmra.mxu2 %vm210_vm0, %v83_v50 }
  0x46   :  { %296 = vmatmul.f32.gmra.mxu0 %v78_v51 }
  0x47   :  { %373 = vmatmul.f32.gmra.mxu1 %v79_v52  ;;  %v103_v52 = vld [vmem:[%s4274_s0 + $0x110] sm:$0xff] }
  0x4a   :  { %2123 = vmatmul.msk.f32.gmra.mxu2 %vm210_vm0, %v86_v53 }
  0x4e   :  { %299 = vmatmul.f32.gmra.mxu0 %v81_v54  ;;  %v167_v54 = vsel %vm163_vm1, %v158_v11, -inf }
  0x4f   :  { %376 = vmatmul.f32.gmra.mxu1 %v82_v55 }
  0x52   :  { %2124 = vmatmul.msk.f32.gmra.mxu2 %vm210_vm0, %v89_v56 }
  0x56   :  { %302 = vmatmul.f32.gmra.mxu0 %v84_v57 }
  0x57   :  { %379 = vmatmul.f32.gmra.mxu1 %v85_v58  ;;  %v107_v58 = vld [vmem:[%s4274_s0 + $0x130] sm:$0xff] }
  0x5a   :  { %2125 = vmatmul.msk.f32.gmra.mxu2 %vm210_vm0, %v92_v59 }
  0x5e   :  { %305 = vmatmul.f32.gmra.mxu0 %v87_v60  ;;  %v105_v60 = vld [vmem:[%s4274_s0 + $0x120] sm:$0xff] }
  0x5f   :  { %382 = vmatmul.f32.gmra.mxu1 %v88_v61 }
  0x62   :  { %2126 = vmatmul.msk.f32.gmra.mxu2 %vm210_vm0, %v95_v62 }
  0x66   :  { %308 = vmatmul.f32.gmra.mxu0 %v90_v63  ;;  %v106_v63 = vld [vmem:[%s4274_s0 + $0x128] sm:$0xff] }
  0x67   :  { %385 = vmatmul.f32.gmra.mxu1 %v91_v0 }
  0x6a   :  { %2127 = vmatmul.msk.f32.gmra.mxu2 %vm210_vm0, %v98_v1 }
  0x6e   :  { %311 = vmatmul.f32.gmra.mxu0 %v93_v2 }
  0x6f   :  { %388 = vmatmul.f32.gmra.mxu1 %v94_v3 }
  0x72   :  { %2128 = vmatmul.msk.f32.gmra.mxu2 %vm210_vm0, %v101_v37  ;;  %v119_v37 = vld [vmem:[%s4274_s0 + $0x190] sm:$0xff] }
  0x76   :  { %314 = vmatmul.f32.gmra.mxu0 %v96_v4  ;;  %v110_v4 = vld [vmem:[%s4274_s0 + $0x148] sm:$0xff] }
  0x77   :  { %391 = vmatmul.f32.gmra.mxu1 %v97_v5  ;;  %v108_v5 = vld [vmem:[%s4274_s0 + $0x138] sm:$0xff] }
  0x7a   :  { %2129 = vmatmul.msk.f32.gmra.mxu2 %vm210_vm0, %v104_v47 }
  0x7e   :  { %317 = vmatmul.f32.gmra.mxu0 %v99_v39 }
  0x7f   :  { %394 = vmatmul.f32.gmra.mxu1 %v100_v42 }
  0x82   :  { %2130 = vmatmul.msk.f32.gmra.mxu2 %vm210_vm0, %v107_v58 }
  0x86   :  { %320 = vmatmul.f32.gmra.mxu0 %v102_v49 }
  0x87   :  { %397 = vmatmul.f32.gmra.mxu1 %v103_v52  ;;  %v752_v52 = vld [vmem:[%s4276_s28] sm:$0xff] }
  0x8a   :  { %2131 = vmatmul.msk.f32.gmra.mxu2 %vm210_vm0, %v110_v4 }
  0x8e   :  { %323 = vmatmul.f32.gmra.mxu0 %v105_v60 }
  0x8f   :  { %400 = vmatmul.f32.gmra.mxu1 %v106_v63 }
  0x96   :  { %326 = vmatmul.f32.gmra.mxu0 %v108_v5 }
  0x97   :  { %403 = vmatmul.f32.gmra.mxu1 %v109_v7 }
  0xa3   :  { %v442_v9 = vpop.f32.mrf.mxu2 }
  0xab   :  { %v288_v12 = vpop.f32.mrf.mxu0 }
  0xac   :  { %v365_v13 = vpop.f32.mrf.mxu1  ;;  %v289_v14 = vadd.f32 %v288_v12, %v2906_v10  ;;  %v130_v12 = vld [vmem:[%s4244_s6 + $0x8] sm:$0xf] }
  0xad   :  { %v445_v17 = vpop.f32.mrf.mxu2  ;;  %2138 = vmatpush.msk.msra.mxu3 %vm761_vm2, %v130_v12 }
  0xae   :  { %v366_v16 = vadd.f32 %v365_v13, %v289_v14  ;;  %v129_v13 = vld [vmem:[%s4244_s6] sm:$0xff] }
  0xaf   :  { %v113_v14 = vld [vmem:[%s4274_s0 + $0x160] sm:$0xff]  ;;  %780 = vmatpush.msra.mxu3 %v129_v13 }
  0xb0   :  { %v2914_v19 = vadd.f32 %v442_v9, %v366_v16  ;;  %2132 = vmatmul.msk.f32.gmra.mxu2 %vm210_vm0, %v113_v14  ;;  %2139 = vmatmul.msk.f32.vlgmr.msra.gmra.mxu3 %vm754_vm3, %v752_v52 }
  0xb2   :  { %v502_v20 = vsel %vm163_vm1, %v2914_v19, -inf }
  0xb3   :  { %v291_v21 = vpop.f32.mrf.mxu0  ;;  %503 = vmax.xlane.f32.xlu0 %v502_v20  ;;  %v111_v20 = vld [vmem:[%s4274_s0 + $0x150] sm:$0xff] }
  0xb4   :  { %v368_v22 = vpop.f32.mrf.mxu1  ;;  %v292_v23 = vadd.f32 %v291_v21, %v2912_v18  ;;  %329 = vmatmul.f32.gmra.mxu0 %v111_v20 }
  0xb5   :  { %v448_v25 = vpop.f32.mrf.mxu2 }
  0xb6   :  { %v369_v24 = vadd.f32 %v368_v22, %v292_v23  ;;  %v112_v22 = vld [vmem:[%s4274_s0 + $0x158] sm:$0xff] }
  0xb7   :  { %406 = vmatmul.f32.gmra.mxu1 %v112_v22 }
  0xb8   :  { %v2919_v26 = vadd.f32 %v445_v17, %v369_v24 }
  0xba   :  { %v505_v27 = vsel %vm163_vm1, %v2919_v26, -inf }
  0xbb   :  { %v294_v28 = vpop.f32.mrf.mxu0  ;;  %506 = vmax.xlane.f32.xlu0 %v505_v27 }
  0xbc   :  { %v371_v29 = vpop.f32.mrf.mxu1  ;;  %v295_v30 = vadd.f32 %v294_v28, %v2906_v10 }
  0xbd   :  { %v451_v32 = vpop.f32.mrf.mxu2 }
  0xbe   :  { %v372_v31 = vadd.f32 %v371_v29, %v295_v30 }
  0xc0   :  { %v2924_v33 = vadd.f32 %v448_v25, %v372_v31  ;;  %v116_v25 = vld [vmem:[%s4274_s0 + $0x178] sm:$0xff]  ;;  %v114_v31 = vld [vmem:[%s4274_s0 + $0x168] sm:$0xff] }
  0xc1   :  { %2133 = vmatmul.msk.f32.gmra.mxu2 %vm210_vm0, %v116_v25  ;;  %332 = vmatmul.f32.gmra.mxu0 %v114_v31 }
  0xc2   :  { %v508_v34 = vsel %vm163_vm1, %v2924_v33, -inf }
  0xc3   :  { %v297_v35 = vpop.f32.mrf.mxu0  ;;  %509 = vmax.xlane.f32.xlu1 %v508_v34  ;;  %v115_v34 = vld [vmem:[%s4274_s0 + $0x170] sm:$0xff] }
  0xc4   :  { %v374_v36 = vpop.f32.mrf.mxu1  ;;  %v298_v38 = vadd.f32 %v297_v35, %v2912_v18  ;;  %409 = vmatmul.f32.gmra.mxu1 %v115_v34 }
  0xc5   :  { %v454_v41 = vpop.f32.mrf.mxu2 }
  0xc6   :  { %v375_v40 = vadd.f32 %v374_v36, %v298_v38 }
  0xc8   :  { %v2939_v43 = vadd.f32 %v451_v32, %v375_v40 }
  0xc9   :  { %2134 = vmatmul.msk.f32.gmra.mxu2 %vm210_vm0, %v119_v37 }
  0xca   :  { %v511_v44 = vsel %vm163_vm1, %v2939_v43, -inf }
  0xcb   :  { %v300_v45 = vpop.f32.mrf.mxu0  ;;  %512 = vmax.xlane.f32.xlu2 %v511_v44 }
  0xcc   :  { %v377_v46 = vpop.f32.mrf.mxu1  ;;  %v301_v48 = vadd.f32 %v300_v45, %v2906_v10  ;;  %v118_v45 = vld [vmem:[%s4274_s0 + $0x188] sm:$0xff] }
  0xcd   :  { %v457_v51 = vpop.f32.mrf.mxu2  ;;  %412 = vmatmul.f32.gmra.mxu1 %v118_v45 }
  0xce   :  { %v378_v50 = vadd.f32 %v377_v46, %v301_v48  ;;  %v122_v48 = vld [vmem:[%s4274_s0 + $0x1a8] sm:$0xff] }
  0xd0   :  { %v2954_v53 = vadd.f32 %v454_v41, %v378_v50  ;;  %v117_v41 = vld [vmem:[%s4274_s0 + $0x180] sm:$0xff]  ;;  %v120_v50 = vld [vmem:[%s4274_s0 + $0x198] sm:$0xff] }
  0xd1   :  { %335 = vmatmul.f32.gmra.mxu0 %v117_v41  ;;  %2135 = vmatmul.msk.f32.gmra.mxu2 %vm210_vm0, %v122_v48  ;;  %v125_v48 = vld [vmem:[%s4274_s0 + $0x1c0] sm:$0xff] }
  0xd2   :  { %v514_v55 = vsel %vm163_vm1, %v2954_v53, -inf }
  0xd3   :  { %v303_v56 = vpop.f32.mrf.mxu0  ;;  %168 = vmax.xlane.f32.xlu2 %v167_v54  ;;  %515 = vmax.xlane.f32.xlu0 %v514_v55  ;;  %v753_v54 = vld [vmem:[%s4276_s28 + $0x8] sm:$0xff]  ;;  %v2570_v55 = vmov 0  }
  0xd4   :  { %v380_v57 = vpop.f32.mrf.mxu1  ;;  %v304_v59 = vadd.f32 %v303_v56, %v2912_v18  ;;  %2140 = vmatmul.msk.f32.gmra.mxu3 %vm754_vm3, %v753_v54  ;;  %2282 = vset.pattern.permute.xlu1 %v2570_v55 }
  0xd5   :  { %v460_v62 = vpop.f32.mrf.mxu2  ;;  %2281 = vset.pattern.permute.xlu0 %v2570_v55 }
  0xd6   :  { %v381_v61 = vadd.f32 %v380_v57, %v304_v59  ;;  %v3060_v59 = vpop.xlane.xlu1 %165 }
  0xd8   :  { %v2970_v0 = vadd.f32 %v457_v51, %v381_v61  ;;  %v121_v51 = vld [vmem:[%s4274_s0 + $0x1a0] sm:$0xff] }
  0xd9   :  { %338 = vmatmul.f32.gmra.mxu0 %v120_v50  ;;  %415 = vmatmul.f32.gmra.mxu1 %v121_v51 }
  0xda   :  { %v517_v1 = vsel %vm163_vm1, %v2970_v0, -inf  ;;  %2136 = vmatmul.msk.f32.gmra.mxu2 %vm210_vm0, %v125_v48 }
  0xdb   :  { %v306_v2 = vpop.f32.mrf.mxu0  ;;  %518 = vmax.xlane.f32.xlu1 %v517_v1 }
  0xdc   :  { %v383_v3 = vpop.f32.mrf.mxu1  ;;  %v307_v6 = vadd.f32 %v306_v2, %v2906_v10 }
  0xdd   :  { %v463_v11 = vpop.f32.mrf.mxu2 }
  0xde   :  { %v384_v8 = vadd.f32 %v383_v3, %v307_v6 }
  0xe0   :  { %v2985_v9 = vadd.f32 %v460_v62, %v384_v8 }
  0xe2   :  { %v520_v15 = vsel %vm163_vm1, %v2985_v9, -inf }
  0xe3   :  { %v309_v16 = vpop.f32.mrf.mxu0  ;;  %521 = vmax.xlane.f32.xlu2 %v520_v15 }
  0xe4   :  { %v386_v17 = vpop.f32.mrf.mxu1  ;;  %v310_v21 = vadd.f32 %v309_v16, %v2912_v18 }
  0xe5   :  { %v466_v28 = vpop.f32.mrf.mxu2 }
  0xe6   :  { %v387_v23 = vadd.f32 %v386_v17, %v310_v21 }
  0xe8   :  { %v3007_v24 = vadd.f32 %v463_v11, %v387_v23 }
  0xea   :  { %v523_v27 = vsel %vm163_vm1, %v3007_v24, -inf }
  0xeb   :  { %v312_v29 = vpop.f32.mrf.mxu0  ;;  %524 = vmax.xlane.f32.xlu1 %v523_v27 }
  0xec   :  { %v389_v30 = vpop.f32.mrf.mxu1  ;;  %v313_v32 = vadd.f32 %v312_v29, %v2906_v10 }
  0xed   :  { %v469_v44 = vpop.f32.mrf.mxu2 }
  0xee   :  { %v390_v35 = vadd.f32 %v389_v30, %v313_v32 }
  0xf0   :  { %v3022_v36 = vadd.f32 %v466_v28, %v390_v35 }
  0xf2   :  { %v526_v38 = vsel %vm163_vm1, %v3022_v36, -inf }
  0xf3   :  { %v315_v39 = vpop.f32.mrf.mxu0  ;;  %527 = vmax.xlane.f32.xlu1 %v526_v38 }
  0xf4   :  { %v392_v40 = vpop.f32.mrf.mxu1  ;;  %v316_v42 = vadd.f32 %v315_v39, %v2912_v18 }
  0xf6   :  { %v393_v46 = vadd.f32 %v392_v40, %v316_v42 }
  0xf8   :  { %v3037_v47 = vadd.f32 %v469_v44, %v393_v46 }
  0xfa   :  { %v529_v49 = vsel %vm163_vm1, %v3037_v47, -inf }
  0xfb   :  { %530 = vmax.xlane.f32.xlu2 %v529_v49  ;;  %v123_v49 = vld [vmem:[%s4274_s0 + $0x1b0] sm:$0xff] }
  0xfc   :  { %v3079_v12 = vpop.f32.mrf.mxu1  ;;  %341 = vmatmul.f32.gmra.mxu0 %v123_v49 }
 0x104   :  { %v3094_v22 = vpop.f32.mrf.mxu1 }
 0x10c   :  { %v3105_v31 = vpop.f32.mrf.mxu1 }
 0x114   :  { %v404_v38 = vpop.f32.mrf.mxu1 }
 0x126   :  { %v504_v56 = vpop.xlane.xlu0 %503 }
 0x127   :  { %v562_v57 = vsub.f32 %v2914_v19, %v504_v56 }
 0x129   :  { %v582_v58 = vmul.f32 1.442695, %v562_v57  ;;  %v128_v57 = vld [vmem:[%s4274_s0 + $0x1d8] sm:$0xff] }
 0x12a   :  { %2137 = vmatmul.msk.f32.gmra.mxu2 %vm210_vm0, %v128_v57 }
 0x12b   :  { %2307 = vpow2.f32 %v582_v58  ;;  %v126_v58 = vld [vmem:[%s4274_s0 + $0x1c8] sm:$0xff] }
 0x12c   :  { %344 = vmatmul.f32.gmra.mxu0 %v126_v58 }
 0x12e   :  { %v507_v60 = vpop.xlane.xlu0 %506 }
 0x12f   :  { %v563_v61 = vsub.f32 %v2919_v26, %v507_v60  ;;  %v127_v60 = vld [vmem:[%s4274_s0 + $0x1d0] sm:$0xff] }
 0x131   :  { %v3063_v62 = vpop.eup %2307  ;;  %v584_v63 = vmul.f32 1.442695, %v563_v61 }
 0x132   :  { %v622_v1 = vsel %vm163_vm1, %v3063_v62, 0.0 }
 0x133   :  { %2309 = vpow2.f32 %v584_v63  ;;  %623 = vadd.xlane.f32.xlu0 %v622_v1  ;;  %v782_v57 = vpop.f32.mrf.mxu3 }
 0x136   :  { %v510_v2 = vpop.xlane.xlu1 %509 }
 0x137   :  { %v564_v3 = vsub.f32 %v2924_v33, %v510_v2  ;;  %v3077_v33 = vpop.f32.mrf.mxu0 }
 0x139   :  { %v3068_v4 = vpop.eup %2309  ;;  %v586_v19 = vmul.f32 1.442695, %v564_v3 }
 0x13a   :  { %v625_v5 = vsel %vm163_vm1, %v3068_v4, 0.0 }
 0x13b   :  { %2311 = vpow2.f32 %v586_v19  ;;  %626 = vadd.xlane.f32.xlu2 %v625_v5 }
 0x13e   :  { %v513_v26 = vpop.xlane.xlu2 %512 }
 0x13f   :  { %v565_v6 = vsub.f32 %v2939_v43, %v513_v26  ;;  %v3086_v43 = vpop.f32.mrf.mxu2  ;;  %v3092_v21 = vpop.f32.mrf.mxu0 }
 0x141   :  { %v3073_v7 = vpop.eup %2311  ;;  %v588_v8 = vmul.f32 1.442695, %v565_v6 }
 0x142   :  { %v628_v11 = vsel %vm163_vm1, %v3073_v7, 0.0 }
 0x143   :  { %2313 = vpow2.f32 %v588_v8  ;;  %629 = vadd.xlane.f32.xlu2 %v628_v11 }
 0x146   :  { %v3081_v13 = vpop.xlane.xlu2 %168  ;;  %v516_v14 = vpop.xlane.xlu0 %515 }
 0x147   :  { %v566_v15 = vsub.f32 %v2954_v53, %v516_v14  ;;  %729 = vperm.xlu1 %2282, %v3081_v13   ;;  %724 = vperm.xlu0 %2281, %v3060_v59   ;;  %v3097_v25 = vpop.f32.mrf.mxu2  ;;  %v3103_v30 = vpop.f32.mrf.mxu0 }
 0x149   :  { %v3088_v16 = vpop.eup %2313  ;;  %v590_v17 = vmul.f32 1.442695, %v566_v15 }
 0x14a   :  { %v631_v20 = vsel %vm163_vm1, %v3088_v16, 0.0 }
 0x14b   :  { %2315 = vpow2.f32 %v590_v17  ;;  %632 = vadd.xlane.f32.xlu2 %v631_v20 }
 0x14e   :  { %v519_v23 = vpop.xlane.xlu1 %518 }
 0x14f   :  { %v567_v53 = vsub.f32 %v2970_v0, %v519_v23  ;;  %v3107_v32 = vpop.f32.mrf.mxu2  ;;  %v327_v37 = vpop.f32.mrf.mxu0  ;;  %v319_v23 = vadd.f32 %v3077_v33, %v2906_v10 }
 0x150   :  { %v328_v55 = vadd.f32 %v327_v37, %v2912_v18 }
 0x151   :  { %v3099_v27 = vpop.eup %2315  ;;  %v592_v28 = vmul.f32 1.442695, %v567_v53 }
 0x152   :  { %v634_v29 = vsel %vm163_vm1, %v3099_v27, 0.0  ;;  %v405_v3 = vadd.f32 %v404_v38, %v328_v55  ;;  %v396_v38 = vadd.f32 %v3079_v12, %v319_v23  ;;  %v325_v55 = vadd.f32 %v3103_v30, %v2906_v10 }
 0x153   :  { %2317 = vpow2.f32 %v592_v28  ;;  %635 = vadd.xlane.f32.xlu2 %v634_v29 }
 0x156   :  { %v522_v35 = vpop.xlane.xlu2 %521 }
 0x157   :  { %v568_v39 = vsub.f32 %v2985_v9, %v522_v35  ;;  %v481_v42 = vpop.f32.mrf.mxu2  ;;  %v3115_v46 = vpop.f32.mrf.mxu0  ;;  %v124_v9 = vld [vmem:[%s4274_s0 + $0x1b8] sm:$0xff] }
 0x158   :  { %418 = vmatmul.f32.gmra.mxu1 %v124_v9  ;;  %v3157_v17 = vadd.f32 %v481_v42, %v405_v3  ;;  %v3176_v42 = vadd.f32 %v3086_v43, %v396_v38 }
 0x159   :  { %v3109_v34 = vpop.eup %2317  ;;  %v594_v44 = vmul.f32 1.442695, %v568_v39 }
 0x15a   :  { %v637_v0 = vsel %vm163_vm1, %v3109_v34, 0.0  ;;  %v541_v29 = vsel %vm163_vm1, %v3157_v17, -inf }
 0x15b   :  { %638 = vadd.xlane.f32.xlu2 %v637_v0  ;;  %2319 = vpow2.f32 %v594_v44  ;;  %v322_v44 = vadd.f32 %v3092_v21, %v2912_v18 }
 0x15e   :  { %v525_v40 = vpop.xlane.xlu1 %524 }
 0x15f   :  { %v569_v41 = vsub.f32 %v3007_v24, %v525_v40  ;;  %v3127_v24 = vpop.f32.mrf.mxu1  ;;  %v3130_v52 = vpop.f32.mrf.mxu2 }
 0x160   :  { %v333_v56 = vpop.f32.mrf.mxu0  ;;  %421 = vmatmul.f32.gmra.mxu1 %v127_v60  ;;  %v331_v60 = vadd.f32 %v3115_v46, %v2906_v10 }
 0x161   :  { %v596_v45 = vmul.f32 1.442695, %v569_v41  ;;  %v334_v61 = vadd.f32 %v333_v56, %v2912_v18  ;;  %v402_v56 = vadd.f32 %v3105_v31, %v325_v55 }
 0x163   :  { %2321 = vpow2.f32 %v596_v45  ;;  %v3199_v58 = vadd.f32 %v3107_v32, %v402_v56 }
 0x166   :  { %v528_v50 = vpop.xlane.xlu1 %527 }
 0x167   :  { %v570_v51 = vsub.f32 %v3022_v36, %v528_v50  ;;  %v3142_v36 = vpop.eup %2319  ;;  %v410_v1 = vpop.f32.mrf.mxu1  ;;  %v399_v50 = vadd.f32 %v3094_v22, %v322_v44 }
 0x168   :  { %v411_v19 = vadd.f32 %v410_v1, %v334_v61  ;;  %v487_v26 = vpop.f32.mrf.mxu2  ;;  %v640_v6 = vsel %vm163_vm1, %v3142_v36, 0.0  ;;  %v408_v61 = vadd.f32 %v3127_v24, %v331_v60  ;;  %v785_v1 = vpop.f32.mrf.mxu3 }
 0x169   :  { %v598_v54 = vmul.f32 1.442695, %v570_v51  ;;  %v3146_v63 = vpop.eup %2321  ;;  %v532_v51 = vsel %vm163_vm1, %v3176_v42, -inf  ;;  %v3191_v21 = vadd.f32 %v3097_v25, %v399_v50  ;;  %v538_v25 = vsel %vm163_vm1, %v3199_v58, -inf  ;;  %832 = vmatpush.msrb.mxu3 %v785_v1 }
 0x16a   :  { %v643_v8 = vsel %vm163_vm1, %v3146_v63, 0.0  ;;  %v3159_v20 = vadd.f32 %v487_v26, %v411_v19  ;;  %v3207_v30 = vadd.f32 %v3130_v52, %v408_v61 }
 0x16b   :  { %2323 = vpow2.f32 %v598_v54  ;;  %v535_v22 = vsel %vm163_vm1, %v3191_v21, -inf  ;;  %833 = vmatpush.msrb.mxu3 %v782_v57 }
 0x16c   :  { %v547_v35 = vsel %vm163_vm1, %v3159_v20, -inf  ;;  %v544_v31 = vsel %vm163_vm1, %v3207_v30, -inf }
 0x16e   :  { %v531_v2 = vpop.xlane.xlu2 %530 }
 0x16f   :  { %v571_v5 = vsub.f32 %v3037_v47, %v531_v2  ;;  %v336_v47 = vpop.f32.mrf.mxu0  ;;  %v413_v28 = vpop.f32.mrf.mxu1 }
 0x170   :  { %v337_v53 = vadd.f32 %v336_v47, %v2906_v10  ;;  %v490_v37 = vpop.f32.mrf.mxu2 }
 0x171   :  { %v3153_v11 = vpop.eup %2323  ;;  %v600_v14 = vmul.f32 1.442695, %v571_v5  ;;  %641 = vadd.xlane.f32.xlu1 %v640_v6  ;;  %644 = vadd.xlane.f32.xlu0 %v643_v8 }
 0x172   :  { %v646_v15 = vsel %vm163_vm1, %v3153_v11, 0.0  ;;  %v414_v0 = vadd.f32 %v413_v28, %v337_v53 }
 0x173   :  { %2325 = vpow2.f32 %v600_v14  ;;  %647 = vadd.xlane.f32.xlu2 %v646_v15 }
 0x174   :  { %v3173_v40 = vadd.f32 %v490_v37, %v414_v0 }
 0x176   :  { %v550_v48 = vsel %vm163_vm1, %v3173_v40, -inf }
 0x177   :  { %v339_v41 = vpop.f32.mrf.mxu0  ;;  %v416_v12 = vpop.f32.mrf.mxu1 }
 0x178   :  { %v340_v45 = vadd.f32 %v339_v41, %v2912_v18  ;;  %v493_v9 = vpop.f32.mrf.mxu2 }
 0x179   :  { %v3169_v39 = vpop.eup %2325  ;;  %542 = vmax.xlane.f32.xlu1 %v541_v29  ;;  %548 = vmax.xlane.f32.xlu0 %v547_v35 }
 0x17a   :  { %v649_v33 = vsel %vm163_vm1, %v3169_v39, 0.0  ;;  %v417_v49 = vadd.f32 %v416_v12, %v340_v45 }
 0x17b   :  { %650 = vadd.xlane.f32.xlu2 %v649_v33 }
 0x17c   :  { %v3186_v54 = vadd.f32 %v493_v9, %v417_v49 }
 0x17e   :  { %v553_v43 = vsel %vm163_vm1, %v3186_v54, -inf }
 0x17f   :  { %v342_v55 = vpop.f32.mrf.mxu0 }
 0x180   :  { %v343_v60 = vadd.f32 %v342_v55, %v2906_v10 }
 0x181   :  { %551 = vmax.xlane.f32.xlu1 %v550_v48  ;;  %554 = vmax.xlane.f32.xlu0 %v553_v43 }
 0x183   :  { %533 = vmax.xlane.f32.xlu2 %v532_v51 }
 0x18b   :  { %536 = vmax.xlane.f32.xlu2 %v535_v22 }
 0x193   :  { %539 = vmax.xlane.f32.xlu2 %v538_v25 }
 0x19b   :  { %545 = vmax.xlane.f32.xlu2 %v544_v31  ;;  %v496_v31 = vpop.f32.mrf.mxu2 }
 0x1a6   :  { %v624_v32 = vpop.xlane.xlu0 %623 }
 0x1a7   :  { %2327 = vrcp.f32 %v624_v32 }
 0x1ad   :  { %v2328_v46 = vpop.eup %2327 }
 0x1ae   :  { %v627_v2 = vpop.xlane.xlu2 %626  ;;  %v702_v24 = vmul.f32 %v2328_v46, %v3063_v62  ;;  %v345_v46 = vpop.f32.mrf.mxu0 }
 0x1af   :  { %2329 = vrcp.f32 %v627_v2 }
 0x1b5   :  { %v2330_v52 = vpop.eup %2329 }
 0x1b6   :  { %v630_v3 = vpop.xlane.xlu2 %629  ;;  %v703_v8 = vmul.f32 %v2330_v52, %v3068_v4 }
 0x1b7   :  { %2331 = vrcp.f32 %v630_v3 }
 0x1b9   :  { %v3212_v19 = vpop.permute.xlu0 %724  ;;  %v3216_v6 = vpop.permute.xlu1 %729 }
 0x1ba   :  { %v732_v5 = vmul.f32 %v3212_v19, %v702_v24  ;;  %v733_v14 = vmul.f32 %v3216_v6, %v703_v8 }
 0x1bc   :  { %2141 = vmatmul.msk.f32.vlgmr.msrb.gmra.mxu3 %vm163_vm1, %v732_v5 }
 0x1bd   :  { %v2332_v15 = vpop.eup %2331 }
 0x1be   :  { %v633_v26 = vpop.xlane.xlu2 %632  ;;  %v704_v62 = vmul.f32 %v2332_v15, %v3073_v7 }
 0x1bf   :  { %2333 = vrcp.f32 %v633_v26 }
 0x1c0   :  { %v734_v23 = vmul.f32 %v3212_v19, %v704_v62 }
 0x1c4   :  { %2142 = vmatmul.msk.f32.gmra.mxu3 %vm163_vm1, %v733_v14 }
 0x1c5   :  { %v2334_v53 = vpop.eup %2333 }
 0x1c6   :  { %v636_v47 = vpop.xlane.xlu2 %635  ;;  %v705_v28 = vmul.f32 %v2334_v53, %v3088_v16 }
 0x1c7   :  { %2335 = vrcp.f32 %v636_v47 }
 0x1c8   :  { %v735_v4 = vmul.f32 %v3216_v6, %v705_v28  ;;  %v499_v28 = vpop.f32.mrf.mxu2 }
 0x1cc   :  { %2143 = vmatmul.msk.f32.gmra.mxu3 %vm163_vm1, %v734_v23 }
 0x1cd   :  { %v2336_v0 = vpop.eup %2335 }
 0x1ce   :  { %v639_v29 = vpop.xlane.xlu2 %638  ;;  %v706_v35 = vmul.f32 %v2336_v0, %v3099_v27 }
 0x1cf   :  { %2337 = vrcp.f32 %v639_v29 }
 0x1d0   :  { %v736_v7 = vmul.f32 %v3212_v19, %v706_v35 }
 0x1d4   :  { %2144 = vmatmul.msk.f32.gmra.mxu3 %vm163_vm1, %v735_v4 }
 0x1d5   :  { %v2338_v37 = vpop.eup %2337  ;;  %v419_v57 = vpop.f32.mrf.mxu1 }
 0x1d6   :  { %v707_v38 = vmul.f32 %v2338_v37, %v3109_v34  ;;  %v420_v32 = vadd.f32 %v419_v57, %v343_v60  ;;  %v3316_v57 = vld [vmem:[%s4247_s9 + $0x8] sm:$0xff] }
 0x1d8   :  { %v737_v33 = vmul.f32 %v3216_v6, %v707_v38 }
 0x1dc   :  { %2145 = vmatmul.msk.f32.gmra.mxu3 %vm163_vm1, %v736_v7 }
 0x1dd   :  { %v422_v26 = vpop.f32.mrf.mxu1 }
 0x1e4   :  { %v642_v41 = vpop.xlane.xlu1 %641  ;;  %2146 = vmatmul.msk.f32.gmra.mxu3 %vm163_vm1, %v737_v33  ;;  %v645_v16 = vpop.xlane.xlu0 %644 }
 0x1e5   :  { %2339 = vrcp.f32 %v642_v41 }
 0x1e6   :  { %v648_v44 = vpop.xlane.xlu2 %647  ;;  %2341 = vrcp.f32 %v645_v16 }
 0x1e7   :  { %2343 = vrcp.f32 %v648_v44 }
 0x1eb   :  { %v2340_v45 = vpop.eup %2339 }
 0x1ec   :  { %v708_v12 = vmul.f32 %v2340_v45, %v3142_v36  ;;  %v2342_v49 = vpop.eup %2341  ;;  %v543_v22 = vpop.xlane.xlu1 %542 }
 0x1ed   :  { %v709_v34 = vmul.f32 %v2342_v49, %v3146_v63  ;;  %v2344_v51 = vpop.eup %2343  ;;  %v549_v5 = vpop.xlane.xlu0 %548 }
 0x1ee   :  { %v651_v27 = vpop.xlane.xlu2 %650  ;;  %v738_v48 = vmul.f32 %v3212_v19, %v708_v12  ;;  %v710_v56 = vmul.f32 %v2344_v51, %v3153_v11  ;;  %v577_v15 = vsub.f32 %v3159_v20, %v549_v5  ;;  %v3304_v51 = vld [vmem:[%s4247_s9 + $0x18] sm:$0xff] }
 0x1ef   :  { %v739_v50 = vmul.f32 %v3216_v6, %v709_v34  ;;  %2345 = vrcp.f32 %v651_v27 }
 0x1f0   :  { %2147 = vmatmul.msk.f32.gmra.mxu3 %vm163_vm1, %v738_v48  ;;  %v740_v63 = vmul.f32 %v3212_v19, %v710_v56  ;;  %v612_v4 = vmul.f32 1.442695, %v577_v15 }
 0x1f4   :  { %v552_v52 = vpop.xlane.xlu1 %551 }
 0x1f5   :  { %v2346_v25 = vpop.eup %2345  ;;  %v555_v0 = vpop.xlane.xlu0 %554 }
 0x1f6   :  { %v534_v9 = vpop.xlane.xlu2 %533  ;;  %v711_v10 = vmul.f32 %v2346_v25, %v3169_v39  ;;  %v578_v39 = vsub.f32 %v3173_v40, %v552_v52  ;;  %v579_v33 = vsub.f32 %v3186_v54, %v555_v0 }
 0x1f7   :  { %v572_v43 = vsub.f32 %v3176_v42, %v534_v9  ;;  %v575_v42 = vsub.f32 %v3157_v17, %v543_v22  ;;  %v346_v17 = vadd.f32 %v345_v46, %v2912_v18 }
 0x1f8   :  { %2148 = vmatmul.msk.f32.gmra.mxu3 %vm163_vm1, %v739_v50  ;;  %v741_v14 = vmul.f32 %v3216_v6, %v711_v10  ;;  %v614_v20 = vmul.f32 1.442695, %v578_v39  ;;  %v3298_v50 = vld [vmem:[%s4247_s9 + $0x20] sm:$0xff] }
 0x1f9   :  { %v602_v36 = vmul.f32 1.442695, %v572_v43  ;;  %v608_v24 = vmul.f32 1.442695, %v575_v42  ;;  %v423_v23 = vadd.f32 %v422_v26, %v346_v17  ;;  %939 = vmatpush.msra.mxu3 %v3298_v50  ;;  %v2284_v42 = vld [vmem:[%s4277_s23 + $0x1] ss:$0 sm:$0xff] }
 0x1fb   :  { %2347 = vpow2.f32 %v602_v36  ;;  %940 = vmatpush.msra.mxu3 %v3304_v51  ;;  %v3310_v36 = vld [vmem:[%s4247_s9 + $0x10] sm:$0xff] }
 0x1fd   :  { %941 = vmatpush.msra.mxu3 %v3310_v36 }
 0x1fe   :  { %v537_v61 = vpop.xlane.xlu2 %536 }
 0x1ff   :  { %v573_v1 = vsub.f32 %v3191_v21, %v537_v61  ;;  %v3251_v21 = vadd.f32 %v496_v31, %v420_v32  ;;  %942 = vmatpush.msra.mxu3 %v3316_v57  ;;  %v2283_v31 = vld [vmem:[%s4277_s23] ss:$0 sm:$0xff]  ;;  %v2285_v32 = vld [vmem:[%s4277_s23 + $0x2] ss:$0 sm:$0xff] }
 0x200   :  { %2149 = vmatmul.msk.f32.gmra.mxu3 %vm163_vm1, %v740_v63  ;;  %v3322_v63 = vld [vmem:[%s4247_s9] sm:$0xff] }
 0x201   :  { %v3246_v2 = vpop.eup %2347  ;;  %v604_v11 = vmul.f32 1.442695, %v573_v1  ;;  %v556_v47 = vsel %vm163_vm1, %v3251_v21, -inf  ;;  %943 = vmatpush.msra.mxu3 %v3322_v63 }
 0x202   :  { %v652_v3 = vsel %vm163_vm1, %v3246_v2, 0.0 }
 0x203   :  { %2349 = vpow2.f32 %v604_v11  ;;  %653 = vadd.xlane.f32.xlu2 %v652_v3  ;;  %v2286_v3 = vld [vmem:[%s4277_s23 + $0x3] ss:$0 sm:$0xff] }
 0x204   :  { %2351 = vpow2.f32 %v608_v24 }
 0x206   :  { %v540_v8 = vpop.xlane.xlu2 %539 }
 0x207   :  { %v574_v62 = vsub.f32 %v3199_v58, %v540_v8  ;;  %v3265_v58 = vadd.f32 %v499_v28, %v423_v23  ;;  %v2288_v28 = vld [vmem:[%s4245_s7] ss:$0 sm:$0xff] }
 0x208   :  { %2150 = vmatmul.msk.f32.gmra.mxu3 %vm163_vm1, %v741_v14  ;;  %v2287_v14 = vld [vmem:[%s4277_s23 + $0x4] ss:$0 sm:$0xff] }
 0x209   :  { %v3261_v53 = vpop.eup %2349  ;;  %v606_v18 = vmul.f32 1.442695, %v574_v62  ;;  %v559_v38 = vsel %vm163_vm1, %v3265_v58, -inf }
 0x20a   :  { %v655_v29 = vsel %vm163_vm1, %v3261_v53, 0.0  ;;  %v3267_v40 = vpop.eup %2351 }
 0x20b   :  { %2353 = vpow2.f32 %v606_v18  ;;  %557 = vmax.xlane.f32.xlu2 %v556_v47  ;;  %656 = vadd.xlane.f32.xlu1 %v655_v29  ;;  %v661_v37 = vsel %vm163_vm1, %v3267_v40, 0.0 }
 0x20c   :  { %2355 = vpow2.f32 %v612_v4 }
 0x20d   :  { %2357 = vpow2.f32 %v614_v20  ;;  %v2289_v20 = vld [vmem:[%s4246_s8] ss:$0 sm:$0xff] }
 0x20e   :  { %v546_v35 = vpop.xlane.xlu2 %545 }
 0x20f   :  { %v576_v7 = vsub.f32 %v3207_v30, %v546_v35  ;;  %v616_v30 = vmul.f32 1.442695, %v579_v33 }
 0x211   :  { %v3275_v41 = vpop.eup %2353  ;;  %v610_v16 = vmul.f32 1.442695, %v576_v7 }
 0x212   :  { %v658_v44 = vsel %vm163_vm1, %v3275_v41, 0.0  ;;  %v3279_v45 = vpop.eup %2355 }
 0x213   :  { %2359 = vpow2.f32 %v610_v16  ;;  %662 = vadd.xlane.f32.xlu2 %v661_v37  ;;  %560 = vmax.xlane.f32.xlu1 %v559_v38  ;;  %v3281_v12 = vpop.eup %2357  ;;  %v667_v54 = vsel %vm163_vm1, %v3279_v45, 0.0 }
 0x214   :  { %659 = vadd.xlane.f32.xlu0 %v658_v44  ;;  %2361 = vpow2.f32 %v616_v30  ;;  %v670_v27 = vsel %vm163_vm1, %v3281_v12, 0.0 }
 0x219   :  { %v3287_v48 = vpop.eup %2359 }
 0x21a   :  { %v664_v49 = vsel %vm163_vm1, %v3287_v48, 0.0  ;;  %v3291_v34 = vpop.eup %2361 }
 0x21b   :  { %671 = vadd.xlane.f32.xlu2 %v670_v27  ;;  %668 = vadd.xlane.f32.xlu1 %v667_v54  ;;  %v673_v9 = vsel %vm163_vm1, %v3291_v34, 0.0 }
 0x21c   :  { %665 = vadd.xlane.f32.xlu0 %v664_v49 }
 0x224   :  { %674 = vadd.xlane.f32.xlu0 %v673_v9 }
 0x23f   :  { %v835_v43 = vpop.f32.mrf.mxu3 }
 0x240   :  { %v869_v10 = vmul.f32 %v2283_v31, %v835_v43 }
 0x247   :  { %v838_v55 = vpop.f32.mrf.mxu3 }
 0x248   :  { %v870_v29 = vmul.f32 %v2283_v31, %v838_v55 }
 0x24f   :  { %v841_v56 = vpop.f32.mrf.mxu3 }
 0x250   :  { %v876_v46 = vmul.f32 %v2284_v42, %v841_v56 }
 0x252   :  { %v878_v26 = vadd.f32 %v876_v46, %v869_v10 }
 0x257   :  { %v844_v22 = vpop.f32.mrf.mxu3 }
 0x258   :  { %v877_v47 = vmul.f32 %v2284_v42, %v844_v22 }
 0x25a   :  { %v879_v7 = vadd.f32 %v877_v47, %v870_v29 }
 0x25f   :  { %v847_v60 = vpop.f32.mrf.mxu3 }
 0x260   :  { %v885_v24 = vmul.f32 %v2285_v32, %v847_v60 }
 0x262   :  { %v887_v62 = vadd.f32 %v885_v24, %v878_v26 }
 0x267   :  { %v850_v61 = vpop.f32.mrf.mxu3 }
 0x268   :  { %v886_v4 = vmul.f32 %v2285_v32, %v850_v61 }
 0x26a   :  { %v888_v44 = vadd.f32 %v886_v4, %v879_v7 }
 0x273   :  { %v853_v25 = vpop.f32.mrf.mxu3 }
 0x274   :  { %v894_v8 = vmul.f32 %v2286_v3, %v853_v25 }
 0x276   :  { %v654_v1 = vpop.xlane.xlu2 %653  ;;  %v896_v23 = vadd.f32 %v894_v8, %v887_v62 }
 0x27b   :  { %v856_v11 = vpop.f32.mrf.mxu3 }
 0x27c   :  { %v895_v37 = vmul.f32 %v2286_v3, %v856_v11 }
 0x27e   :  { %v657_v5 = vpop.xlane.xlu1 %656  ;;  %v558_v17 = vpop.xlane.xlu2 %557  ;;  %v897_v49 = vadd.f32 %v895_v37, %v888_v44 }
 0x27f   :  { %v580_v52 = vsub.f32 %v3251_v21, %v558_v17 }
 0x281   :  { %v618_v15 = vmul.f32 1.442695, %v580_v52 }
 0x283   :  { %2363 = vpow2.f32 %v618_v15  ;;  %v859_v39 = vpop.f32.mrf.mxu3 }
 0x284   :  { %v903_v18 = vmul.f32 %v2287_v14, %v859_v39 }
 0x286   :  { %v905_v21 = vadd.f32 %v903_v18, %v896_v23  ;;  %v561_v0 = vpop.xlane.xlu1 %560  ;;  %v663_v52 = vpop.xlane.xlu2 %662 }
 0x287   :  { %v581_v35 = vsub.f32 %v3265_v58, %v561_v0  ;;  %v660_v10 = vpop.xlane.xlu0 %659 }
 0x288   :  { %v910_v38 = vmul.f32 %v2288_v28, %v905_v21  ;;  %v3381_v21 = vld [vmem:[%s4252_s14 + $0x20] sm:$0xff] }
 0x289   :  { %v3348_v33 = vpop.eup %2363  ;;  %v620_v16 = vmul.f32 1.442695, %v581_v35  ;;  %1109 = vmatpush.msrb.mxu2 %v3381_v21 }
 0x28a   :  { %v915_v30 = vadd.f32 %v2289_v20, %v910_v38  ;;  %v676_v27 = vsel %vm163_vm1, %v3348_v33, 0.0 }
 0x28b   :  { %2365 = vpow2.f32 %v620_v16  ;;  %v862_v54 = vpop.f32.mrf.mxu3  ;;  %677 = vadd.xlane.f32.xlu1 %v676_v27 }
 0x28c   :  { %v917_v9 = vmax.f32 %v915_v30, 0.0  ;;  %v904_v43 = vmul.f32 %v2287_v14, %v862_v54  ;;  %2367 = vrcp.f32 %v654_v1 }
 0x28d   :  { %2369 = vrcp.f32 %v657_v5 }
 0x28e   :  { %v919_v58 = vmul.f32 %v917_v9, %v3060_v59  ;;  %v906_v55 = vadd.f32 %v904_v43, %v897_v49  ;;  %2371 = vrcp.f32 %v660_v10  ;;  %v669_v62 = vpop.xlane.xlu1 %668  ;;  %v672_v23 = vpop.xlane.xlu2 %671  ;;  %v2294_v10 = vld [vmem:[%s4278_s2 + $0x4] ss:$0 sm:$0xff] }
 0x28f   :  { %2373 = vrcp.f32 %v663_v52  ;;  %v666_v5 = vpop.xlane.xlu0 %665 }
 0x290   :  { %v911_v56 = vmul.f32 %v2288_v28, %v906_v55  ;;  %2155 = vmatmul.msk.f32.vlgmr.msra.gmra.mxu3 %vm921_vm4, %v919_v58  ;;  %2375 = vrcp.f32 %v666_v5 }
 0x291   :  { %v3354_v22 = vpop.eup %2365  ;;  %2377 = vrcp.f32 %v669_v62 }
 0x292   :  { %v679_v60 = vsel %vm163_vm1, %v3354_v22, 0.0  ;;  %v916_v61 = vadd.f32 %v2289_v20, %v911_v56  ;;  %v2368_v32 = vpop.eup %2367  ;;  %2379 = vrcp.f32 %v672_v23  ;;  %v2291_v56 = vld [vmem:[%s4278_s2 + $0x1] ss:$0 sm:$0xff] }
 0x293   :  { %680 = vadd.xlane.f32.xlu2 %v679_v60  ;;  %v712_v11 = vmul.f32 %v2368_v32, %v3246_v2  ;;  %v2370_v24 = vpop.eup %2369  ;;  %v2292_v60 = vld [vmem:[%s4278_s2 + $0x2] ss:$0 sm:$0xff] }
 0x294   :  { %v918_v25 = vmax.f32 %v916_v61, 0.0  ;;  %v713_v17 = vmul.f32 %v2370_v24, %v3261_v53  ;;  %v2372_v26 = vpop.eup %2371 }
 0x295   :  { %v742_v3 = vmul.f32 %v3212_v19, %v712_v11  ;;  %v714_v2 = vmul.f32 %v2372_v26, %v3275_v41  ;;  %v2374_v14 = vpop.eup %2373 }
 0x296   :  { %v920_v42 = vmul.f32 %v918_v25, %v3081_v13  ;;  %v743_v1 = vmul.f32 %v3216_v6, %v713_v17  ;;  %v715_v15 = vmul.f32 %v2374_v14, %v3267_v40  ;;  %v2376_v39 = vpop.eup %2375 }
 0x297   :  { %v744_v8 = vmul.f32 %v3212_v19, %v714_v2  ;;  %v716_v47 = vmul.f32 %v2376_v39, %v3287_v48  ;;  %v2378_v18 = vpop.eup %2377  ;;  %v675_v29 = vpop.xlane.xlu0 %674  ;;  %v3386_v48 = vld [vmem:[%s4252_s14 + $0x18] sm:$0xff]  ;;  %v2295_v2 = vld [vmem:[%s4248_s10] ss:$0 sm:$0xff] }
 0x298   :  { %2156 = vmatmul.msk.f32.gmra.mxu3 %vm921_vm4, %v920_v42  ;;  %v745_v53 = vmul.f32 %v3216_v6, %v715_v15  ;;  %v717_v28 = vmul.f32 %v2378_v18, %v3279_v45  ;;  %v2380_v4 = vpop.eup %2379  ;;  %2381 = vrcp.f32 %v675_v29  ;;  %1110 = vmatpush.msrb.mxu2 %v3386_v48  ;;  %v2293_v42 = vld [vmem:[%s4278_s2 + $0x3] ss:$0 sm:$0xff]  ;;  %v2296_v39 = vld [vmem:[%s4249_s11] ss:$0 sm:$0xff]  ;;  %v2190_v18 = vld [vmem:[%s4273_s26 + $0x1b0] sm:$0xff] }
 0x299   :  { %v746_v41 = vmul.f32 %v3212_v19, %v716_v47  ;;  %v718_v45 = vmul.f32 %v2380_v4, %v3281_v12  ;;  %v2189_v4 = vld [vmem:[%s4273_s26 + $0x1a8] sm:$0xff] }
 0x29a   :  { %v747_v40 = vmul.f32 %v3216_v6, %v717_v28 }
 0x29b   :  { %v748_v0 = vmul.f32 %v3212_v19, %v718_v45  ;;  %v2207_v45 = vld [vmem:[%s4273_s26 + $0x238] sm:$0xff] }
 0x29e   :  { %v2382_v35 = vpop.eup %2381 }
 0x29f   :  { %v719_v7 = vmul.f32 %v2382_v35, %v3291_v34  ;;  %v3405_v34 = vld [vmem:[%s4252_s14 + $0x10] sm:$0xff]  ;;  %v2188_v35 = vld [vmem:[%s4273_s26 + $0x1a0] sm:$0xff] }
 0x2a0   :  { %1111 = vmatpush.msrb.mxu2 %v3405_v34 }
 0x2a1   :  { %v749_v38 = vmul.f32 %v3216_v6, %v719_v7  ;;  %v2205_v7 = vld [vmem:[%s4273_s26 + $0x228] sm:$0xff] }
 0x2fe   :  { %v678_v20 = vpop.xlane.xlu1 %677 }
 0x2ff   :  { %2383 = vrcp.f32 %v678_v20 }
 0x305   :  { %v2384_v16 = vpop.eup %2383 }
 0x306   :  { %v681_v37 = vpop.xlane.xlu2 %680  ;;  %v720_v12 = vmul.f32 %v2384_v16, %v3348_v33  ;;  %v2187_v16 = vld [vmem:[%s4273_s26 + $0x198] sm:$0xff] }
 0x307   :  { %2385 = vrcp.f32 %v681_v37 }
 0x308   :  { %v750_v44 = vmul.f32 %v3212_v19, %v720_v12  ;;  %v3411_v19 = vld [vmem:[%s4252_s14 + $0x8] sm:$0xff]  ;;  %v2204_v12 = vld [vmem:[%s4273_s26 + $0x220] sm:$0xff] }
 0x309   :  { %1112 = vmatpush.msrb.mxu2 %v3411_v19 }
 0x30d   :  { %v2386_v30 = vpop.eup %2385 }
 0x30e   :  { %v721_v27 = vmul.f32 %v2386_v30, %v3354_v22  ;;  %v2290_v22 = vld [vmem:[%s4278_s2] ss:$0 sm:$0xff]  ;;  %v3471_v30 = vld [vmem:[%s4255_s17 + $0x18] sm:$0xff] }
 0x310   :  { %v751_v54 = vmul.f32 %v3216_v6, %v721_v27  ;;  %v2186_v27 = vld [vmem:[%s4273_s26 + $0x190] sm:$0xff] }
 0x313   :  { %v945_v31 = vpop.f32.mrf.mxu3 }
 0x31b   :  { %v948_v46 = vpop.f32.mrf.mxu3 }
 0x31c   :  { %995 = vmatpush.msrb.mxu3 %v948_v46 }
 0x31e   :  { %996 = vmatpush.msrb.mxu3 %v945_v31  ;;  %v3429_v31 = vld [vmem:[%s4252_s14] sm:$0xff] }
 0x31f   :  { %2157 = vmatmul.msk.f32.vlgmr.msrb.gmra.mxu3 %vm163_vm1, %v742_v3  ;;  %1113 = vmatpush.msrb.mxu2 %v3429_v31 }
 0x320   :  { %1304 = vmatpush.msra.mxu3 %v2207_v45  ;;  %v2211_v45 = vld [vmem:[%s4273_s26 + $0x258] sm:$0xff] }
 0x321   :  { %1137 = vmatpush.msra.mxu2 %v3471_v30 }
 0x327   :  { %2158 = vmatmul.msk.f32.gmra.mxu3 %vm163_vm1, %v743_v1 }
 0x32f   :  { %2159 = vmatmul.msk.f32.gmra.mxu3 %vm163_vm1, %v744_v8 }
 0x337   :  { %2160 = vmatmul.msk.f32.gmra.mxu3 %vm163_vm1, %v745_v53 }
 0x33f   :  { %2161 = vmatmul.msk.f32.gmra.mxu3 %vm163_vm1, %v746_v41  ;;  %v2191_v41 = vld [vmem:[%s4273_s26 + $0x1b8] sm:$0xff] }
 0x340   :  { %1227 = vmatpush.msrb.mxu1 %v2191_v41  ;;  %v2196_v41 = vld [vmem:[%s4273_s26 + $0x1e0] sm:$0xff] }
 0x342   :  { %1228 = vmatpush.msrb.mxu1 %v2190_v18  ;;  %v2213_v18 = vld [vmem:[%s4273_s26 + $0x268] sm:$0xff] }
 0x344   :  { %1229 = vmatpush.msrb.mxu1 %v2189_v4  ;;  %v2177_v4 = vld [vmem:[%s4273_s26 + $0x148] sm:$0xff] }
 0x346   :  { %1230 = vmatpush.msrb.mxu1 %v2188_v35  ;;  %v2192_v35 = vld [vmem:[%s4273_s26 + $0x1c0] sm:$0xff] }
 0x347   :  { %2162 = vmatmul.msk.f32.gmra.mxu3 %vm163_vm1, %v747_v40 }
 0x348   :  { %1231 = vmatpush.msrb.mxu1 %v2187_v16  ;;  %v2176_v16 = vld [vmem:[%s4273_s26 + $0x140] sm:$0xff] }
 0x34a   :  { %1232 = vmatpush.msrb.mxu1 %v2186_v27  ;;  %v2475_v27 = vld [vmem:[%s4274_s0 + $0x48] sm:$0xff] }
 0x34f   :  { %2163 = vmatmul.msk.f32.gmra.mxu3 %vm163_vm1, %v748_v0  ;;  %v2206_v0 = vld [vmem:[%s4273_s26 + $0x230] sm:$0xff] }
 0x350   :  { %1305 = vmatpush.msra.mxu3 %v2206_v0  ;;  %v2210_v0 = vld [vmem:[%s4273_s26 + $0x250] sm:$0xff] }
 0x352   :  { %1306 = vmatpush.msra.mxu3 %v2205_v7  ;;  %v2209_v7 = vld [vmem:[%s4273_s26 + $0x248] sm:$0xff] }
 0x354   :  { %1307 = vmatpush.msra.mxu3 %v2204_v12  ;;  %v2468_v12 = vld [vmem:[%s4274_s0] sm:$0xff] }
 0x357   :  { %2164 = vmatmul.msk.f32.gmra.mxu3 %vm163_vm1, %v749_v38 }
 0x35f   :  { %2165 = vmatmul.msk.f32.gmra.mxu3 %vm163_vm1, %v750_v44 }
 0x367   :  { %2166 = vmatmul.msk.f32.gmra.mxu3 %vm163_vm1, %v751_v54  ;;  %v2203_v54 = vld [vmem:[%s4273_s26 + $0x218] sm:$0xff] }
 0x368   :  { %1308 = vmatpush.msra.mxu3 %v2203_v54  ;;  %v2476_v54 = vld [vmem:[%s4244_s6] sm:$0xff] }
 0x3a2   :  { %v998_v49 = vpop.f32.mrf.mxu3 }
 0x3a3   :  { %v1032_v32 = vmul.f32 %v2290_v22, %v998_v49  ;;  %v3483_v49 = vld [vmem:[%s4255_s17 + $0x10] sm:$0xff] }
 0x3a4   :  { %1138 = vmatpush.msra.mxu2 %v3483_v49 }
 0x3aa   :  { %v1001_v33 = vpop.f32.mrf.mxu3 }
 0x3ab   :  { %v1033_v5 = vmul.f32 %v2290_v22, %v1001_v33  ;;  %v2201_v22 = vld [vmem:[%s4273_s26 + $0x208] sm:$0xff] }
 0x3b2   :  { %v1004_v9 = vpop.f32.mrf.mxu3 }
 0x3b3   :  { %v1039_v25 = vmul.f32 %v2291_v56, %v1004_v9 }
 0x3b5   :  { %v1041_v46 = vadd.f32 %v1039_v25, %v1032_v32  ;;  %v2183_v25 = vld [vmem:[%s4273_s26 + $0x178] sm:$0xff] }
 0x3ba   :  { %v1007_v6 = vpop.f32.mrf.mxu3 }
 0x3bb   :  { %v1040_v52 = vmul.f32 %v2291_v56, %v1007_v6  ;;  %v3489_v6 = vld [vmem:[%s4255_s17 + $0x8] sm:$0xff]  ;;  %v2184_v56 = vld [vmem:[%s4273_s26 + $0x180] sm:$0xff] }
 0x3bc   :  { %1139 = vmatpush.msra.mxu2 %v3489_v6 }
 0x3bd   :  { %v1042_v15 = vadd.f32 %v1040_v52, %v1033_v5  ;;  %v2180_v52 = vld [vmem:[%s4273_s26 + $0x160] sm:$0xff] }
 0x3c2   :  { %v1010_v43 = vpop.f32.mrf.mxu3 }
 0x3c3   :  { %v1048_v11 = vmul.f32 %v2292_v60, %v1010_v43  ;;  %v2185_v43 = vld [vmem:[%s4273_s26 + $0x188] sm:$0xff] }
 0x3c4   :  { %1233 = vmatpush.msrb.mxu1 %v2185_v43  ;;  %v2481_v43 = vld [vmem:[%s4274_s0 + $0x80] sm:$0xff] }
 0x3c5   :  { %v1050_v24 = vadd.f32 %v1048_v11, %v1041_v46  ;;  %v2182_v11 = vld [vmem:[%s4273_s26 + $0x170] sm:$0xff]  ;;  %v2199_v46 = vld [vmem:[%s4273_s26 + $0x1f8] sm:$0xff] }
 0x3c6   :  { %1234 = vmatpush.msrb.mxu1 %v2184_v56  ;;  %v2485_v56 = vld [vmem:[%s4274_s0 + $0x90] sm:$0xff] }
 0x3c8   :  { %1235 = vmatpush.msrb.mxu1 %v2183_v25  ;;  %v2490_v25 = vld [vmem:[%s4274_s0 + $0xc8] sm:$0xff] }
 0x3ca   :  { %v1013_v58 = vpop.f32.mrf.mxu3  ;;  %1236 = vmatpush.msrb.mxu1 %v2182_v11  ;;  %v2493_v11 = vld [vmem:[%s4274_s0 + $0xe0] sm:$0xff] }
 0x3cb   :  { %v1049_v8 = vmul.f32 %v2292_v60, %v1013_v58  ;;  %v2202_v58 = vld [vmem:[%s4273_s26 + $0x210] sm:$0xff] }
 0x3cc   :  { %1309 = vmatpush.msra.mxu3 %v2202_v58  ;;  %v2482_v58 = vld [vmem:[%s4274_s0 + $0x78] sm:$0xff] }
 0x3cd   :  { %v1051_v47 = vadd.f32 %v1049_v8, %v1042_v15  ;;  %v140_v8 = vld [vmem:[%s4250_s12] sm:$0x1] }
 0x3ce   :  { %1310 = vmatpush.msra.mxu3 %v2201_v22  ;;  %v141_v15 = vld [vmem:[%s4251_s13] sm:$0x1]  ;;  %v2486_v22 = vld [vmem:[%s4274_s0 + $0x58] sm:$0xff] }
 0x3d2   :  { %v1016_v55 = vpop.f32.mrf.mxu3 }
 0x3d3   :  { %v1057_v3 = vmul.f32 %v2293_v42, %v1016_v55  ;;  %v3502_v55 = vld [vmem:[%s4255_s17] sm:$0xff] }
 0x3d4   :  { %1140 = vmatpush.msra.mxu2 %v3502_v55 }
 0x3d5   :  { %v1059_v1 = vadd.f32 %v1057_v3, %v1050_v24  ;;  %v2198_v24 = vld [vmem:[%s4273_s26 + $0x1f0] sm:$0xff] }
 0x3da   :  { %v1019_v61 = vpop.f32.mrf.mxu3 }
 0x3db   :  { %v1058_v62 = vmul.f32 %v2293_v42, %v1019_v61  ;;  %v2200_v42 = vld [vmem:[%s4273_s26 + $0x200] sm:$0xff] }
 0x3dc   :  { %1311 = vmatpush.msra.mxu3 %v2200_v42  ;;  %v2491_v42 = vld [vmem:[%s4274_s0 + $0xc0] sm:$0xff] }
 0x3dd   :  { %v1060_v28 = vadd.f32 %v1058_v62, %v1051_v47  ;;  %v2214_v47 = vld [vmem:[%s4273_s26 + $0x270] sm:$0xff] }
 0x3de   :  { %1312 = vmatpush.msra.mxu3 %v2199_v46  ;;  %v2494_v46 = vld [vmem:[%s4274_s0 + $0xd8] sm:$0xff] }
 0x3e0   :  { %1313 = vmatpush.msra.mxu3 %v2198_v24  ;;  %v2497_v24 = vld [vmem:[%s4274_s0 + $0xf0] sm:$0xff] }
 0x3e2   :  { %v1022_v17 = vpop.f32.mrf.mxu3 }
 0x3e3   :  { %v1066_v26 = vmul.f32 %v2294_v10, %v1022_v17 }
 0x3e5   :  { %v1068_v14 = vadd.f32 %v1066_v26, %v1059_v1  ;;  %v2197_v1 = vld [vmem:[%s4273_s26 + $0x1e8] sm:$0xff] }
 0x3e6   :  { %1314 = vmatpush.msra.mxu3 %v2197_v1  ;;  %v2500_v1 = vld [vmem:[%s4274_s0 + $0x108] sm:$0xff] }
 0x3e7   :  { %v1073_v53 = vmul.f32 %v2295_v2, %v1068_v14 }
 0x3e8   :  { %1315 = vmatpush.msra.mxu3 %v2196_v41  ;;  %v2512_v41 = vld [vmem:[%s4274_s0 + $0x168] sm:$0xff] }
 0x3e9   :  { %v1078_v29 = vadd.f32 %v2296_v39, %v1073_v53 }
 0x3ea   :  { %v1025_v23 = vpop.f32.mrf.mxu3 }
 0x3eb   :  { %v1067_v40 = vmul.f32 %v2294_v10, %v1025_v23  ;;  %v1080_v37 = vmax.f32 %v1078_v29, 0.0  ;;  %v2181_v10 = vld [vmem:[%s4273_s26 + $0x168] sm:$0xff]  ;;  %v2178_v23 = vld [vmem:[%s4273_s26 + $0x150] sm:$0xff]  ;;  %v2212_v29 = vld [vmem:[%s4273_s26 + $0x260] sm:$0xff] }
 0x3ec   :  { %1237 = vmatpush.msrb.mxu1 %v2181_v10  ;;  %v2496_v10 = vld [vmem:[%s4274_s0 + $0xf8] sm:$0xff] }
 0x3ed   :  { %v1069_v20 = vadd.f32 %v1067_v40, %v1060_v28  ;;  %v1082_v33 = vmul.f32 %v1080_v37, %v3060_v59  ;;  %v2195_v28 = vld [vmem:[%s4273_s26 + $0x1d8] sm:$0xff]  ;;  %v2194_v40 = vld [vmem:[%s4273_s26 + $0x1d0] sm:$0xff]  ;;  %v2208_v37 = vld [vmem:[%s4273_s26 + $0x240] sm:$0xff] }
 0x3ee   :  { %1238 = vmatpush.msrb.mxu1 %v2180_v52  ;;  %1316 = vmatpush.msra.mxu3 %v2195_v28  ;;  %v2499_v52 = vld [vmem:[%s4274_s0 + $0x110] sm:$0xff]  ;;  %v155_v28 = vld [vmem:[%s4258_s20] sm:$0xff] }
 0x3ef   :  { %v1074_v38 = vmul.f32 %v2295_v2, %v1069_v20  ;;  %v1084_v60 = vsel %vm921_vm4, %v1082_v33, 0.0  ;;  %v2179_v2 = vld [vmem:[%s4273_s26 + $0x158] sm:$0xff]  ;;  %v2193_v20 = vld [vmem:[%s4273_s26 + $0x1c8] sm:$0xff] }
 0x3f0   :  { %1239 = vmatpush.msrb.mxu1 %v2179_v2  ;;  %1317 = vmatpush.msra.mxu3 %v2194_v40  ;;  %v2478_v33 = vld [vmem:[%s4274_s0 + $0x68] sm:$0xff] }
 0x3f1   :  { %v1079_v44 = vadd.f32 %v2296_v39, %v1074_v38  ;;  %v2215_v39 = vld [vmem:[%s4273_s26 + $0x278] sm:$0xff]  ;;  %v2467_v38 = vld [vmem:[%s4274_s0 + $0x8] sm:$0xff] }
 0x3f2   :  { %1240 = vmatpush.msrb.mxu1 %v2178_v23  ;;  %1318 = vmatpush.msra.mxu3 %v2193_v20  ;;  %v2502_v2 = vld [vmem:[%s4274_s0 + $0x128] sm:$0xff]  ;;  %v2511_v23 = vld [vmem:[%s4274_s0 + $0x170] sm:$0xff]  ;;  %v2517_v20 = vld [vmem:[%s4274_s0 + $0x1a0] sm:$0xff] }
 0x3f3   :  { %v1081_v9 = vmax.f32 %v1079_v44, 0.0  ;;  %v2473_v44 = vld [vmem:[%s4274_s0 + $0x50] sm:$0xff]  ;;  %v2514_v40 = vld [vmem:[%s4274_s0 + $0x188] sm:$0xff] }
 0x3f4   :  { %1241 = vmatpush.msrb.mxu1 %v2177_v4  ;;  %1319 = vmatpush.msra.mxu3 %v2192_v35  ;;  %v2515_v4 = vld [vmem:[%s4274_s0 + $0x180] sm:$0xff]  ;;  %v2518_v35 = vld [vmem:[%s4274_s0 + $0x198] sm:$0xff] }
 0x3f5   :  { %v1083_v59 = vmul.f32 %v1081_v9, %v3081_v13  ;;  %1320 = vmatmul.f32.vlgmr.msra.gmra.mxu3 %v2467_v38  ;;  %v2479_v9 = vld [vmem:[%s4274_s0 + $0x60] sm:$0xff]  ;;  %v2520_v38 = vld [vmem:[%s4274_s0 + $0x1b8] sm:$0xff] }
 0x3f6   :  { %1242 = vmatpush.msrb.mxu1 %v2176_v16  ;;  %2274 = vmatpush.msrb.mxu3 %v3298_v50  ;;  %v2469_v50 = vld [vmem:[%s4274_s0 + $0x20] sm:$0xff]  ;;  %v2174_v16 = vld [vmem:[%s4275_s5 + $0x10] sm:$0xff] }
 0x3f7   :  { %v1085_v13 = vsel %vm921_vm4, %v1083_v59, 0.0  ;;  %1243 = vmatmul.f32.vlgmr.msrb.gmra.mxu1 %v2468_v12  ;;  %v2483_v59 = vld [vmem:[%s4274_s0 + $0x40] sm:$0xff]  ;;  %v2521_v12 = vld [vmem:[%s4274_s0 + $0x1b0] sm:$0xff] }
 0x3f8   :  { %v1086_v61 = vadd.f32 %v1085_v13, %v1084_v60  ;;  %2275 = vmatpush.msrb.mxu3 %v3304_v51  ;;  %2040 = vmatpush.msra.mxu1 %v3381_v21  ;;  %v2470_v51 = vld [vmem:[%s4274_s0 + $0x18] sm:$0xff]  ;;  %v2487_v60 = vld [vmem:[%s4274_s0 + $0xb0] sm:$0xff]  ;;  %v2488_v13 = vld [vmem:[%s4274_s0 + $0xa8] sm:$0xff] }
 0x3fa   :  { %v1087_v32 = vrot.slane %v1086_v61, 4  ;;  %2276 = vmatpush.msrb.mxu3 %v3310_v36  ;;  %2041 = vmatpush.msra.mxu1 %v3386_v48  ;;  %v147_v36 = vld [vmem:[%s4253_s15] sm:$0x1] }
 0x3fc   :  { %v1088_v3 = vadd.f32 %v1087_v32, %v1086_v61  ;;  %2277 = vmatpush.msrb.mxu3 %v3316_v57  ;;  %2042 = vmatpush.msra.mxu1 %v3405_v34  ;;  %v2471_v57 = vld [vmem:[%s4274_s0 + $0x38] sm:$0xff]  ;;  %v2472_v34 = vld [vmem:[%s4274_s0 + $0x30] sm:$0xff]  ;;  %v2492_v32 = vld [vmem:[%s4274_s0 + $0x88] sm:$0xff] }
 0x3fd   :  { %1323 = vmatmul.f32.gmra.mxu3 %v2469_v50  ;;  %v2489_v61 = vld [vmem:[%s4274_s0 + $0x70] sm:$0xff] }
 0x3fe   :  { %v1089_v17 = vrot.slane %v1088_v3, 2  ;;  %2278 = vmatpush.msrb.mxu3 %v3322_v63  ;;  %2043 = vmatpush.msra.mxu1 %v3411_v19  ;;  %v148_v63 = vld [vmem:[%s4254_s16] sm:$0x1] }
 0x3ff   :  { %1246 = vmatmul.f32.gmra.mxu1 %v2470_v51  ;;  %v1176_v51 = vsub.f32 1.0, %v2174_v16 }
 0x400   :  { %v1090_v26 = vadd.f32 %v1089_v17, %v1088_v3  ;;  %2067 = vmatpush.msra.mxu3 %v3471_v30  ;;  %2044 = vmatpush.msra.mxu1 %v3429_v31  ;;  %v2474_v30 = vld [vmem:[%s4244_s6 + $0x8] sm:$0xf]  ;;  %v2495_v3 = vld [vmem:[%s4274_s0 + $0xa0] sm:$0xff]  ;;  %v2498_v17 = vld [vmem:[%s4274_s0 + $0xb8] sm:$0xff] }
 0x402   :  { %v1091_v5 = vrot.slane %v1090_v26, 1  ;;  %2068 = vmatpush.msra.mxu3 %v3483_v49  ;;  %v2477_v49 = vld [vmem:[%s4274_s0 + $0x10] sm:$0xff] }
 0x404   :  { %v1092_v14 = vadd.f32 %v1091_v5, %v1090_v26  ;;  %2069 = vmatpush.msra.mxu3 %v3489_v6  ;;  %v2480_v6 = vld [vmem:[%s4274_s0 + $0x28] sm:$0xff]  ;;  %v2501_v26 = vld [vmem:[%s4274_s0 + $0xd0] sm:$0xff]  ;;  %v2503_v5 = vld [vmem:[%s4274_s0 + $0x120] sm:$0xff] }
 0x405   :  { %1326 = vmatmul.f32.gmra.mxu3 %v2471_v57  ;;  %v3807_v57 = vmul.f32 -1e+09, %v1176_v51 }
 0x406   :  { %v1093_v62 = vmul.f32 %v1092_v14, %v140_v8  ;;  %2070 = vmatpush.msra.mxu3 %v3502_v55  ;;  %v2484_v55 = vld [vmem:[%s4274_s0 + $0x98] sm:$0xff]  ;;  %v2504_v8 = vld [vmem:[%s4274_s0 + $0xe8] sm:$0xff]  ;;  %v2505_v14 = vld [vmem:[%s4274_s0 + $0x140] sm:$0xff] }
 0x407   :  { %1249 = vmatmul.f32.gmra.mxu1 %v2472_v34  ;;  %v2175_v34 = vld [vmem:[%s4275_s5 + $0x18] sm:$0xff] }
 0x408   :  { %v1094_v53 = vadd.f32 %v1093_v62, %v141_v15  ;;  %v2506_v15 = vld [vmem:[%s4274_s0 + $0x138] sm:$0xff]  ;;  %v2507_v62 = vld [vmem:[%s4274_s0 + $0x100] sm:$0xff] }
 0x40a   :  { %2171 = vmatmul.msk.f32.vlgmr.msrb.gmra.mxu2 %vm921_vm4, %v1094_v53  ;;  %v2508_v53 = vld [vmem:[%s4274_s0 + $0x158] sm:$0xff] }
 0x40b   :  { %1389 = vmatpush.msrb.mxu2 %v2215_v39  ;;  %v2509_v39 = vld [vmem:[%s4274_s0 + $0x150] sm:$0xff] }
 0x40d   :  { %1390 = vmatpush.msrb.mxu2 %v2214_v47  ;;  %1329 = vmatmul.f32.gmra.mxu3 %v2473_v44  ;;  %v2510_v47 = vld [vmem:[%s4274_s0 + $0x118] sm:$0xff] }
 0x40f   :  { %1391 = vmatpush.msrb.mxu2 %v2213_v18  ;;  %1252 = vmatmul.f32.gmra.mxu1 %v2475_v27  ;;  %v156_v18 = vld [vmem:[%s4258_s20 + $0x8] sm:$0xff] }
 0x410   :  { %1165 = vmatpush.msrb.mxu0 %v156_v18  ;;  %2095 = vmatpush.msrb.mxu1 %v156_v18 }
 0x411   :  { %1392 = vmatpush.msrb.mxu2 %v2212_v29  ;;  %v2513_v29 = vld [vmem:[%s4274_s0 + $0x130] sm:$0xff] }
 0x412   :  { %1166 = vmatpush.msrb.mxu0 %v155_v28  ;;  %2096 = vmatpush.msrb.mxu1 %v155_v28 }
 0x413   :  { %1393 = vmatpush.msrb.mxu2 %v2211_v45  ;;  %v2516_v45 = vld [vmem:[%s4274_s0 + $0x148] sm:$0xff] }
 0x415   :  { %1394 = vmatpush.msrb.mxu2 %v2210_v0  ;;  %1332 = vmatmul.f32.gmra.mxu3 %v2478_v33 }
 0x417   :  { %1395 = vmatpush.msrb.mxu2 %v2209_v7  ;;  %1255 = vmatmul.f32.gmra.mxu1 %v2479_v9 }
 0x419   :  { %1396 = vmatpush.msrb.mxu2 %v2208_v37  ;;  %v2519_v37 = vld [vmem:[%s4274_s0 + $0x160] sm:$0xff] }
 0x41d   :  { %1335 = vmatmul.f32.gmra.mxu3 %v2481_v43 }
 0x41f   :  { %1258 = vmatmul.f32.gmra.mxu1 %v2482_v58  ;;  %v2525_v58 = vld [vmem:[%s4274_s0 + $0x190] sm:$0xff] }
 0x425   :  { %1338 = vmatmul.f32.gmra.mxu3 %v2484_v55 }
 0x427   :  { %1261 = vmatmul.f32.gmra.mxu1 %v2485_v56 }
 0x42d   :  { %1341 = vmatmul.f32.gmra.mxu3 %v2487_v60 }
 0x42f   :  { %1264 = vmatmul.f32.gmra.mxu1 %v2488_v13 }
 0x435   :  { %1344 = vmatmul.f32.gmra.mxu3 %v2490_v25  ;;  %v2526_v25 = vld [vmem:[%s4274_s0 + $0x1a8] sm:$0xff] }
 0x437   :  { %1267 = vmatmul.f32.gmra.mxu1 %v2491_v42 }
 0x43d   :  { %1347 = vmatmul.f32.gmra.mxu3 %v2493_v11 }
 0x43f   :  { %1270 = vmatmul.f32.gmra.mxu1 %v2494_v46 }
 0x445   :  { %1350 = vmatmul.f32.gmra.mxu3 %v2496_v10 }
 0x447   :  { %1273 = vmatmul.f32.gmra.mxu1 %v2497_v24 }
 0x44d   :  { %1353 = vmatmul.f32.gmra.mxu3 %v2499_v52 }
 0x44f   :  { %1276 = vmatmul.f32.gmra.mxu1 %v2500_v1 }
 0x455   :  { %1356 = vmatmul.f32.gmra.mxu3 %v2502_v2 }
 0x457   :  { %1279 = vmatmul.f32.gmra.mxu1 %v2503_v5 }
 0x45d   :  { %1359 = vmatmul.f32.gmra.mxu3 %v2505_v14 }
 0x45f   :  { %1282 = vmatmul.f32.gmra.mxu1 %v2506_v15  ;;  %v2528_v15 = vld [vmem:[%s4274_s0 + $0x1d8] sm:$0xff] }
 0x465   :  { %1362 = vmatmul.f32.gmra.mxu3 %v2508_v53 }
 0x467   :  { %1285 = vmatmul.f32.gmra.mxu1 %v2509_v39 }
 0x46d   :  { %1365 = vmatmul.f32.gmra.mxu3 %v2511_v23  ;;  %v1183_v23 = vsel %vm163_vm1, %v2175_v34, -inf }
 0x46f   :  { %1288 = vmatmul.f32.gmra.mxu1 %v2512_v41 }
 0x474   :  { %v1244_v0 = vpop.f32.mrf.mxu1 }
 0x475   :  { %1368 = vmatmul.f32.gmra.mxu3 %v2514_v40  ;;  %v1245_v27 = vadd.f32 %v1244_v0, %v3807_v57 }
 0x477   :  { %1291 = vmatmul.f32.gmra.mxu1 %v2515_v4 }
 0x478   :  { %v1321_v7 = vpop.f32.mrf.mxu3 }
 0x47c   :  { %v1247_v50 = vpop.f32.mrf.mxu1 }
 0x47d   :  { %1371 = vmatmul.f32.gmra.mxu3 %v2517_v20 }
 0x47f   :  { %1294 = vmatmul.f32.gmra.mxu1 %v2518_v35 }
 0x485   :  { %1374 = vmatmul.f32.gmra.mxu3 %v2520_v38 }
 0x487   :  { %1297 = vmatmul.f32.gmra.mxu1 %v2521_v12 }
 0x48d   :  { %v1115_v21 = vpop.f32.mrf.mxu2 }
 0x48e   :  { %v1118_v48 = vmul.f32 %v1115_v21, %v147_v36  ;;  %v1324_v36 = vpop.f32.mrf.mxu3  ;;  %v2523_v21 = vld [vmem:[%s4274_s0 + $0x1d0] sm:$0xff] }
 0x48f   :  { %1377 = vmatmul.f32.gmra.mxu3 %v2523_v21 }
 0x490   :  { %v1119_v19 = vadd.f32 %v1118_v48, %v148_v63  ;;  %v2522_v63 = vld [vmem:[%s4274_s0 + $0x178] sm:$0xff]  ;;  %v153_v48 = vld [vmem:[%s4256_s18] sm:$0x1] }
 0x492   :  { %v1120_v31 = vmax.f32 %v1119_v19, 0.0  ;;  %v2524_v19 = vld [vmem:[%s4274_s0 + $0x1c8] sm:$0xff] }
 0x493   :  { %1300 = vmatmul.f32.gmra.mxu1 %v2524_v19 }
 0x494   :  { %2172 = vmatmul.msk.f32.vlgmr.msra.gmra.mxu2 %vm1121_vm5, %v1120_v31  ;;  %v154_v31 = vld [vmem:[%s4257_s19] sm:$0x1] }
 0x495   :  { %2238 = vmatpush.msk.msra.mxu2 %vm761_vm2, %v2474_v30 }
 0x497   :  { %1732 = vmatpush.msra.mxu2 %v2476_v54  ;;  %v1177_v54 = vsub.f32 1.0, %v2175_v34 }
 0x499   :  { %v3829_v43 = vmul.f32 -1e+09, %v1177_v54 }
 0x49c   :  { %2216 = vmatmul.msk.f32.vlgmr.msrb.gmra.mxu2 %vm210_vm0, %v2477_v49  ;;  %v1250_v49 = vpop.f32.mrf.mxu1 }
 0x49d   :  { %v1251_v46 = vadd.f32 %v1250_v49, %v3807_v57 }
 0x4a4   :  { %2217 = vmatmul.msk.f32.gmra.mxu2 %vm210_vm0, %v2480_v6  ;;  %v1322_v6 = vadd.f32 %v1321_v7, %v1245_v27  ;;  %v1253_v13 = vpop.f32.mrf.mxu1 }
 0x4a5   :  { %v1254_v2 = vadd.f32 %v1253_v13, %v3829_v43 }
 0x4ac   :  { %2218 = vmatmul.msk.f32.gmra.mxu2 %vm210_vm0, %v2483_v59  ;;  %v1327_v59 = vpop.f32.mrf.mxu3  ;;  %v1256_v52 = vpop.f32.mrf.mxu1 }
 0x4ad   :  { %v1328_v24 = vadd.f32 %v1327_v59, %v1251_v46  ;;  %v2237_v59 = vld [vmem:[%s4276_s28 + $0x18] sm:$0xff] }
 0x4b4   :  { %2219 = vmatmul.msk.f32.gmra.mxu2 %vm210_vm0, %v2486_v22  ;;  %v1248_v22 = vadd.f32 %v1247_v50, %v3829_v43  ;;  %v1259_v53 = vpop.f32.mrf.mxu1 }
 0x4b5   :  { %v1260_v4 = vadd.f32 %v1259_v53, %v3829_v43 }
 0x4bc   :  { %2220 = vmatmul.msk.f32.gmra.mxu2 %vm210_vm0, %v2489_v61  ;;  %v1325_v61 = vadd.f32 %v1324_v36, %v1248_v22 }
 0x4c4   :  { %2221 = vmatmul.msk.f32.gmra.mxu2 %vm210_vm0, %v2492_v32  ;;  %v1330_v32 = vpop.f32.mrf.mxu3 }
 0x4c5   :  { %v1331_v14 = vadd.f32 %v1330_v32, %v1254_v2 }
 0x4cc   :  { %2222 = vmatmul.msk.f32.gmra.mxu2 %vm210_vm0, %v2495_v3  ;;  %v1180_v3 = vsel %vm163_vm1, %v2174_v16, -inf  ;;  %v1333_v5 = vpop.f32.mrf.mxu3 }
 0x4d4   :  { %2223 = vmatmul.msk.f32.gmra.mxu2 %vm210_vm0, %v2498_v17  ;;  %v2527_v17 = vld [vmem:[%s4274_s0 + $0x1c0] sm:$0xff]  ;;  %v1336_v18 = vpop.f32.mrf.mxu3 }
 0x4d5   :  { %v1337_v0 = vadd.f32 %v1336_v18, %v1260_v4 }
 0x4dc   :  { %2224 = vmatmul.msk.f32.gmra.mxu2 %vm210_vm0, %v2501_v26  ;;  %v1339_v35 = vpop.f32.mrf.mxu3 }
 0x4e4   :  { %2225 = vmatmul.msk.f32.gmra.mxu2 %vm210_vm0, %v2504_v8  ;;  %v1342_v36 = vpop.f32.mrf.mxu3 }
 0x4ec   :  { %2226 = vmatmul.msk.f32.gmra.mxu2 %vm210_vm0, %v2507_v62  ;;  %v1345_v27 = vpop.f32.mrf.mxu3 }
 0x4f4   :  { %2227 = vmatmul.msk.f32.gmra.mxu2 %vm210_vm0, %v2510_v47  ;;  %v1257_v47 = vadd.f32 %v1256_v52, %v3807_v57  ;;  %v1348_v22 = vpop.f32.mrf.mxu3 }
 0x4f6   :  { %v1334_v28 = vadd.f32 %v1333_v5, %v1257_v47 }
 0x4fc   :  { %2228 = vmatmul.msk.f32.gmra.mxu2 %vm210_vm0, %v2513_v29  ;;  %v3906_v46 = vpop.f32.mrf.mxu3 }
 0x504   :  { %2229 = vmatmul.msk.f32.gmra.mxu2 %vm210_vm0, %v2516_v45  ;;  %v1262_v45 = vpop.f32.mrf.mxu1  ;;  %v1354_v5 = vpop.f32.mrf.mxu3 }
 0x505   :  { %v1263_v38 = vadd.f32 %v1262_v45, %v3807_v57 }
 0x507   :  { %v1340_v50 = vadd.f32 %v1339_v35, %v1263_v38 }
 0x50c   :  { %2230 = vmatmul.msk.f32.gmra.mxu2 %vm210_vm0, %v2519_v37  ;;  %v1265_v12 = vpop.f32.mrf.mxu1 }
 0x50d   :  { %v1266_v21 = vadd.f32 %v1265_v12, %v3829_v43 }
 0x50f   :  { %v1343_v34 = vadd.f32 %v1342_v36, %v1266_v21 }
 0x514   :  { %2231 = vmatmul.msk.f32.gmra.mxu2 %vm210_vm0, %v2522_v63  ;;  %v1268_v19 = vpop.f32.mrf.mxu1 }
 0x517   :  { %v1142_v44 = vpop.f32.mrf.mxu2 }
 0x518   :  { %v1145_v30 = vmul.f32 %v1142_v44, %v153_v48 }
 0x51a   :  { %v1146_v33 = vadd.f32 %v1145_v30, %v154_v31  ;;  %v1269_v30 = vadd.f32 %v1268_v19, %v3807_v57 }
 0x51c   :  { %v1147_v9 = vmax.f32 %v1146_v33, 0.0  ;;  %2232 = vmatmul.msk.f32.gmra.mxu2 %vm210_vm0, %v2525_v58  ;;  %v1346_v49 = vadd.f32 %v1345_v27, %v1269_v30  ;;  %v2236_v58 = vld [vmem:[%s4276_s28 + $0x10] sm:$0xff] }
 0x51e   :  { %2173 = vmatmul.msk.f32.vlgmr.msrb.gmra.mxu0 %vm163_vm1, %v1147_v9 }
 0x51f   :  { %v1398_v55 = vpop.f32.mrf.mxu2 }
 0x520   :  { %v3836_v56 = vadd.f32 %v1398_v55, %v1322_v6  ;;  %v1271_v55 = vpop.f32.mrf.mxu1 }
 0x522   :  { %v1458_v60 = vsel %vm163_vm1, %v3836_v56, -inf }
 0x523   :  { %1459 = vmax.xlane.f32.xlu0 %v1458_v60 }
 0x524   :  { %2233 = vmatmul.msk.f32.gmra.mxu2 %vm210_vm0, %v2526_v25 }
 0x527   :  { %v1401_v42 = vpop.f32.mrf.mxu2 }
 0x528   :  { %v3845_v11 = vadd.f32 %v1401_v42, %v1325_v61  ;;  %v3903_v32 = vpop.f32.mrf.mxu1 }
 0x52a   :  { %v1461_v10 = vsel %vm163_vm1, %v3845_v11, -inf }
 0x52b   :  { %1462 = vmax.xlane.f32.xlu1 %v1461_v10  ;;  %1181 = vmax.xlane.f32.xlu0 %v1180_v3 }
 0x52c   :  { %2234 = vmatmul.msk.f32.gmra.mxu2 %vm210_vm0, %v2527_v17 }
 0x52f   :  { %v1404_v1 = vpop.f32.mrf.mxu2 }
 0x530   :  { %v3855_v26 = vadd.f32 %v1404_v1, %v1328_v24  ;;  %v1277_v1 = vpop.f32.mrf.mxu1 }
 0x531   :  { %v1278_v2 = vadd.f32 %v1277_v1, %v3829_v43 }
 0x532   :  { %v1464_v8 = vsel %vm163_vm1, %v3855_v26, -inf }
 0x533   :  { %1465 = vmax.xlane.f32.xlu2 %v1464_v8 }
 0x534   :  { %2235 = vmatmul.msk.f32.gmra.mxu2 %vm210_vm0, %v2528_v15  ;;  %v1355_v15 = vadd.f32 %v1354_v5, %v1278_v2 }
 0x537   :  { %v1407_v62 = vpop.f32.mrf.mxu2 }
 0x538   :  { %v3864_v39 = vadd.f32 %v1407_v62, %v1331_v14 }
 0x53a   :  { %v1467_v41 = vsel %vm163_vm1, %v3864_v39, -inf }
 0x53b   :  { %1184 = vmax.xlane.f32.xlu2 %v1183_v23  ;;  %1468 = vmax.xlane.f32.xlu1 %v1467_v41  ;;  %v3923_v41 = vpop.f32.mrf.mxu1 }
 0x53c   :  { %2239 = vmatmul.msk.f32.vlgmr.msra.gmra.mxu2 %vm754_vm3, %v2236_v58 }
 0x53f   :  { %v1410_v29 = vpop.f32.mrf.mxu2 }
 0x540   :  { %v3870_v40 = vadd.f32 %v1410_v29, %v1334_v28  ;;  %v1272_v28 = vadd.f32 %v1271_v55, %v3829_v43  ;;  %v3928_v29 = vpop.f32.mrf.mxu3 }
 0x542   :  { %v1470_v20 = vsel %vm163_vm1, %v3870_v40, -inf  ;;  %v1349_v45 = vadd.f32 %v1348_v22, %v1272_v28 }
 0x543   :  { %1471 = vmax.xlane.f32.xlu0 %v1470_v20  ;;  %v1283_v35 = vpop.f32.mrf.mxu1 }
 0x544   :  { %2240 = vmatmul.msk.f32.gmra.mxu2 %vm754_vm3, %v2237_v59  ;;  %v1284_v38 = vadd.f32 %v1283_v35, %v3829_v43 }
 0x547   :  { %v1413_v7 = vpop.f32.mrf.mxu2 }
 0x548   :  { %v3875_v37 = vadd.f32 %v1413_v7, %v1337_v0 }
 0x54a   :  { %v1473_v16 = vsel %vm163_vm1, %v3875_v37, -inf }
 0x54b   :  { %1474 = vmax.xlane.f32.xlu1 %v1473_v16  ;;  %v1360_v16 = vpop.f32.mrf.mxu3 }
 0x54f   :  { %v1416_v51 = vpop.f32.mrf.mxu2 }
 0x550   :  { %v3880_v63 = vadd.f32 %v1416_v51, %v1340_v50  ;;  %v1361_v51 = vadd.f32 %v1360_v16, %v1284_v38 }
 0x552   :  { %v1476_v48 = vsel %vm163_vm1, %v3880_v63, -inf }
 0x553   :  { %1477 = vmax.xlane.f32.xlu2 %v1476_v48 }
 0x557   :  { %v1419_v31 = vpop.f32.mrf.mxu2 }
 0x558   :  { %v3885_v44 = vadd.f32 %v1419_v31, %v1343_v34  ;;  %v1286_v31 = vpop.f32.mrf.mxu1 }
 0x559   :  { %v1287_v1 = vadd.f32 %v1286_v31, %v3807_v57 }
 0x55a   :  { %v1479_v54 = vsel %vm163_vm1, %v3885_v44, -inf }
 0x55b   :  { %1480 = vmax.xlane.f32.xlu1 %v1479_v54 }
 0x55f   :  { %v1422_v33 = vpop.f32.mrf.mxu2 }
 0x560   :  { %v3890_v9 = vadd.f32 %v1422_v33, %v1346_v49  ;;  %v1363_v33 = vpop.f32.mrf.mxu3  ;;  %v1289_v58 = vpop.f32.mrf.mxu1 }
 0x562   :  { %v1482_v6 = vsel %vm163_vm1, %v3890_v9, -inf }
 0x563   :  { %1483 = vmax.xlane.f32.xlu1 %v1482_v6 }
 0x567   :  { %v1425_v60 = vpop.f32.mrf.mxu2 }
 0x568   :  { %v3939_v7 = vadd.f32 %v1425_v60, %v1349_v45  ;;  %v1366_v60 = vpop.f32.mrf.mxu3  ;;  %v1275_v45 = vadd.f32 %v3903_v32, %v3807_v57 }
 0x56a   :  { %v1485_v48 = vsel %vm163_vm1, %v3939_v7, -inf }
 0x56f   :  { %v3908_v3 = vpop.f32.mrf.mxu2 }
 0x577   :  { %v1431_v8 = vpop.f32.mrf.mxu2 }
 0x578   :  { %v3917_v53 = vadd.f32 %v1431_v8, %v1355_v15 }
 0x57f   :  { %v3930_v4 = vpop.f32.mrf.mxu2 }
 0x587   :  { %v1437_v21 = vpop.f32.mrf.mxu2 }
 0x588   :  { %v3946_v34 = vadd.f32 %v1437_v21, %v1361_v51  ;;  %v1281_v51 = vadd.f32 %v3923_v41, %v3807_v57 }
 0x596   :  { %v1460_v13 = vpop.xlane.xlu0 %1459 }
 0x597   :  { %v1518_v61 = vsub.f32 %v3836_v56, %v1460_v13 }
 0x599   :  { %v1538_v25 = vmul.f32 1.442695, %v1518_v61 }
 0x59b   :  { %2387 = vpow2.f32 %v1538_v25  ;;  %v1168_v42 = vpop.f32.mrf.mxu0  ;;  %v1292_v25 = vpop.f32.mrf.mxu1 }
 0x59c   :  { %1172 = vst.msk [vmem:[#allocation2] sm:$0x1] %vm1171_vm6, %v1168_v42 }
 0x59e   :  { %v1463_v10 = vpop.xlane.xlu1 %1462  ;;  %v3925_v18 = vpop.xlane.xlu0 %1181 }
 0x59f   :  { %v1519_v24 = vsub.f32 %v3845_v11, %v1463_v10  ;;  %v1293_v10 = vadd.f32 %v1292_v25, %v3807_v57  ;;  %v2532_v25 = vld [vmem:[%s4247_s9 + $0x8] sm:$0xff] }
 0x5a1   :  { %v3911_v17 = vpop.eup %2387  ;;  %v1540_v52 = vmul.f32 1.442695, %v1519_v24 }
 0x5a2   :  { %v1578_v56 = vsel %vm163_vm1, %v3911_v17, 0.0 }
 0x5a3   :  { %2389 = vpow2.f32 %v1540_v52  ;;  %1579 = vadd.xlane.f32.xlu0 %v1578_v56 }
 0x5a6   :  { %v1466_v14 = vpop.xlane.xlu2 %1465 }
 0x5a7   :  { %v1520_v62 = vsub.f32 %v3855_v26, %v1466_v14 }
 0x5a9   :  { %v3919_v11 = vpop.eup %2389  ;;  %v1542_v47 = vmul.f32 1.442695, %v1520_v62 }
 0x5aa   :  { %v1581_v23 = vsel %vm163_vm1, %v3919_v11, 0.0 }
 0x5ab   :  { %2391 = vpow2.f32 %v1542_v47  ;;  %1582 = vadd.xlane.f32.xlu2 %v1581_v23  ;;  %v1364_v47 = vadd.f32 %v1363_v33, %v1287_v1 }
 0x5ae   :  { %v3932_v26 = vpop.xlane.xlu2 %1184  ;;  %v1469_v12 = vpop.xlane.xlu1 %1468 }
 0x5af   :  { %1685 = vperm.xlu1 %2282, %v3932_v26   ;;  %v1521_v24 = vsub.f32 %v3864_v39, %v1469_v12 }
 0x5b1   :  { %v3935_v20 = vpop.eup %2391  ;;  %v1544_v5 = vmul.f32 1.442695, %v1521_v24 }
 0x5b2   :  { %v1584_v0 = vsel %vm163_vm1, %v3935_v20, 0.0 }
 0x5b3   :  { %1585 = vadd.xlane.f32.xlu2 %v1584_v0 }
 0x5b6   :  { %v1472_v50 = vpop.xlane.xlu0 %1471 }
 0x5b7   :  { %v1522_v36 = vsub.f32 %v3870_v40, %v1472_v50  ;;  %1680 = vperm.xlu0 %2281, %v3925_v18   ;;  %v1440_v40 = vpop.f32.mrf.mxu2 }
 0x5b8   :  { %v3975_v35 = vadd.f32 %v1440_v40, %v1364_v47 }
 0x5b9   :  { %v1546_v19 = vmul.f32 1.442695, %v1522_v36 }
 0x5ba   :  { %v1500_v16 = vsel %vm163_vm1, %v3975_v35, -inf }
 0x5bb   :  { %2393 = vpow2.f32 %v1546_v19  ;;  %1486 = vmax.xlane.f32.xlu2 %v1485_v48 }
 0x5be   :  { %v1475_v30 = vpop.xlane.xlu1 %1474 }
 0x5bf   :  { %v1523_v27 = vsub.f32 %v3875_v37, %v1475_v30  ;;  %v1443_v13 = vpop.f32.mrf.mxu2  ;;  %v1295_v30 = vpop.f32.mrf.mxu1 }
 0x5c1   :  { %v3949_v54 = vpop.eup %2393  ;;  %v1548_v49 = vmul.f32 1.442695, %v1523_v27 }
 0x5c2   :  { %v1590_v6 = vsel %vm163_vm1, %v3949_v54, 0.0 }
 0x5c3   :  { %2395 = vpow2.f32 %v1548_v49  ;;  %1591 = vadd.xlane.f32.xlu2 %v1590_v6 }
 0x5c6   :  { %v1478_v59 = vpop.xlane.xlu2 %1477 }
 0x5c7   :  { %v1524_v55 = vsub.f32 %v3880_v63, %v1478_v59  ;;  %v1369_v63 = vpop.f32.mrf.mxu3  ;;  %v1446_v8 = vpop.f32.mrf.mxu2 }
 0x5c8   :  { %v1370_v2 = vadd.f32 %v1369_v63, %v1293_v10 }
 0x5c9   :  { %v3954_v22 = vpop.eup %2395  ;;  %v1550_v61 = vmul.f32 1.442695, %v1524_v55 }
 0x5ca   :  { %v1593_v37 = vsel %vm163_vm1, %v3954_v22, 0.0  ;;  %v3962_v14 = vadd.f32 %v1446_v8, %v1370_v2 }
 0x5cb   :  { %1594 = vadd.xlane.f32.xlu2 %v1593_v37  ;;  %2397 = vpow2.f32 %v1550_v61  ;;  %v2530_v37 = vld [vmem:[%s4247_s9 + $0x18] sm:$0xff]  ;;  %v2531_v61 = vld [vmem:[%s4247_s9 + $0x10] sm:$0xff] }
 0x5ce   :  { %v1481_v42 = vpop.xlane.xlu1 %1480 }
 0x5cf   :  { %v1525_v52 = vsub.f32 %v3885_v44, %v1481_v42  ;;  %v1449_v48 = vpop.f32.mrf.mxu2  ;;  %v1372_v33 = vpop.f32.mrf.mxu3  ;;  %v2533_v42 = vld [vmem:[%s4247_s9] sm:$0xff] }
 0x5d1   :  { %v1552_v56 = vmul.f32 1.442695, %v1525_v52  ;;  %v3964_v15 = vpop.eup %2397 }
 0x5d2   :  { %v1596_v44 = vsel %vm163_vm1, %v3964_v15, 0.0 }
 0x5d3   :  { %2399 = vpow2.f32 %v1552_v56 }
 0x5d4   :  { %2401 = vpow2.f32 %v1544_v5 }
 0x5d6   :  { %v1484_v62 = vpop.xlane.xlu1 %1483 }
 0x5d7   :  { %v1526_v39 = vsub.f32 %v3890_v9, %v1484_v62  ;;  %v1352_v9 = vadd.f32 %v3906_v46, %v1275_v45  ;;  %v1358_v46 = vadd.f32 %v3928_v29, %v1281_v51  ;;  %v4002_v27 = vpop.f32.mrf.mxu2  ;;  %v1296_v29 = vadd.f32 %v1295_v30, %v3829_v43 }
 0x5d9   :  { %v3969_v23 = vpop.eup %2399  ;;  %v1554_v28 = vmul.f32 1.442695, %v1526_v39  ;;  %1597 = vadd.xlane.f32.xlu1 %v1596_v44  ;;  %v3987_v32 = vadd.f32 %v3908_v3, %v1352_v9  ;;  %v3997_v19 = vadd.f32 %v3930_v4, %v1358_v46  ;;  %v1290_v3 = vadd.f32 %v1289_v58, %v3829_v43 }
 0x5da   :  { %v1599_v0 = vsel %vm163_vm1, %v3969_v23, 0.0  ;;  %v3977_v38 = vpop.eup %2401  ;;  %v1373_v4 = vadd.f32 %v1372_v33, %v1296_v29  ;;  %v1298_v33 = vpop.f32.mrf.mxu1 }
 0x5db   :  { %2403 = vpow2.f32 %v1554_v28  ;;  %1600 = vadd.xlane.f32.xlu2 %v1599_v0  ;;  %v1587_v12 = vsel %vm163_vm1, %v3977_v38, 0.0  ;;  %v1488_v21 = vsel %vm163_vm1, %v3987_v32, -inf  ;;  %v1367_v31 = vadd.f32 %v1366_v60, %v1290_v3 }
 0x5dc   :  { %v1494_v41 = vsel %vm163_vm1, %v3997_v19, -inf  ;;  %v4009_v6 = vadd.f32 %v1449_v48, %v1373_v4 }
 0x5dd   :  { %v4004_v49 = vadd.f32 %v1443_v13, %v1367_v31  ;;  %v2529_v13 = vld [vmem:[%s4247_s9 + $0x20] sm:$0xff] }
 0x5de   :  { %v1509_v59 = vsel %vm163_vm1, %v4009_v6, -inf }
 0x5df   :  { %v1503_v40 = vsel %vm163_vm1, %v4004_v49, -inf  ;;  %v4011_v58 = vpop.f32.mrf.mxu2 }
 0x5e1   :  { %v3984_v50 = vpop.eup %2403  ;;  %1501 = vmax.xlane.f32.xlu1 %v1500_v16  ;;  %1588 = vadd.xlane.f32.xlu0 %v1587_v12  ;;  %v1497_v16 = vsel %vm163_vm1, %v3946_v34, -inf }
 0x5e2   :  { %v1602_v36 = vsel %vm163_vm1, %v3984_v50, 0.0 }
 0x5e3   :  { %1603 = vadd.xlane.f32.xlu2 %v1602_v36 }
 0x5e7   :  { %v1734_v55 = vpop.f32.mrf.mxu2 }
 0x5e9   :  { %1489 = vmax.xlane.f32.xlu0 %v1488_v21 }
 0x5ef   :  { %v1737_v60 = vpop.f32.mrf.mxu2 }
 0x5f0   :  { %1784 = vmatpush.msra.mxu0 %v1737_v60 }
 0x5f1   :  { %1495 = vmax.xlane.f32.xlu0 %v1494_v41 }
 0x5f2   :  { %1785 = vmatpush.msra.mxu0 %v1734_v55 }
 0x5f4   :  { %1880 = vmatpush.msrb.mxu0 %v2529_v13 }
 0x5f6   :  { %1881 = vmatpush.msrb.mxu0 %v2530_v37 }
 0x5f8   :  { %1882 = vmatpush.msrb.mxu0 %v2531_v61 }
 0x5f9   :  { %1504 = vmax.xlane.f32.xlu0 %v1503_v40 }
 0x5fa   :  { %1883 = vmatpush.msrb.mxu0 %v2532_v25 }
 0x5fc   :  { %1884 = vmatpush.msrb.mxu0 %v2533_v42 }
 0x601   :  { %1510 = vmax.xlane.f32.xlu0 %v1509_v59  ;;  %v1299_v59 = vadd.f32 %v1298_v33, %v3807_v57 }
 0x616   :  { %v1580_v10 = vpop.xlane.xlu0 %1579 }
 0x617   :  { %2405 = vrcp.f32 %v1580_v10 }
 0x61d   :  { %v2406_v52 = vpop.eup %2405 }
 0x61e   :  { %v1583_v24 = vpop.xlane.xlu2 %1582  ;;  %v1658_v63 = vmul.f32 %v2406_v52, %v3911_v17 }
 0x61f   :  { %2407 = vrcp.f32 %v1583_v24 }
 0x621   :  { %v4037_v39 = vpop.permute.xlu1 %1685 }
 0x625   :  { %v2408_v5 = vpop.eup %2407 }
 0x626   :  { %v1586_v56 = vpop.xlane.xlu2 %1585  ;;  %v1659_v62 = vmul.f32 %v2408_v5, %v3919_v11 }
 0x627   :  { %2409 = vrcp.f32 %v1586_v56 }
 0x628   :  { %v1689_v28 = vmul.f32 %v4037_v39, %v1659_v62 }
 0x629   :  { %v4031_v1 = vpop.permute.xlu0 %1680 }
 0x62a   :  { %v1688_v2 = vmul.f32 %v4031_v1, %v1658_v63 }
 0x62c   :  { %2241 = vmatmul.msk.f32.vlgmr.msra.gmra.mxu0 %vm163_vm1, %v1688_v2 }
 0x62d   :  { %v2410_v45 = vpop.eup %2409 }
 0x62e   :  { %v1487_v8 = vpop.xlane.xlu2 %1486  ;;  %v1660_v17 = vmul.f32 %v2410_v45, %v3935_v20  ;;  %v1506_v20 = vsel %vm163_vm1, %v3962_v14, -inf }
 0x62f   :  { %v1527_v47 = vsub.f32 %v3939_v7, %v1487_v8  ;;  %v1491_v7 = vsel %vm163_vm1, %v3917_v53, -inf }
 0x630   :  { %v1690_v11 = vmul.f32 %v4031_v1, %v1660_v17 }
 0x631   :  { %v1556_v44 = vmul.f32 1.442695, %v1527_v47 }
 0x633   :  { %2411 = vpow2.f32 %v1556_v44 }
 0x634   :  { %2242 = vmatmul.msk.f32.gmra.mxu0 %vm163_vm1, %v1689_v28 }
 0x636   :  { %v1592_v12 = vpop.xlane.xlu2 %1591 }
 0x639   :  { %v4042_v0 = vpop.eup %2411 }
 0x63a   :  { %v1605_v9 = vsel %vm163_vm1, %v4042_v0, 0.0 }
 0x63b   :  { %1606 = vadd.xlane.f32.xlu2 %v1605_v9 }
 0x63c   :  { %2243 = vmatmul.msk.f32.gmra.mxu0 %vm163_vm1, %v1690_v11 }
 0x63e   :  { %v1595_v3 = vpop.xlane.xlu2 %1594 }
 0x643   :  { %1492 = vmax.xlane.f32.xlu2 %v1491_v7 }
 0x64b   :  { %1498 = vmax.xlane.f32.xlu2 %v1497_v16 }
 0x64c   :  { %v1598_v36 = vpop.xlane.xlu1 %1597 }
 0x653   :  { %1507 = vmax.xlane.f32.xlu2 %v1506_v20 }
 0x654   :  { %v1589_v51 = vpop.xlane.xlu0 %1588  ;;  %v1502_v4 = vpop.xlane.xlu1 %1501 }
 0x655   :  { %2413 = vrcp.f32 %v1589_v51  ;;  %v1532_v61 = vsub.f32 %v3975_v35, %v1502_v4 }
 0x656   :  { %2415 = vrcp.f32 %v1592_v12 }
 0x657   :  { %2417 = vrcp.f32 %v1595_v3  ;;  %v1566_v10 = vmul.f32 1.442695, %v1532_v61  ;;  %v1301_v3 = vpop.f32.mrf.mxu1 }
 0x65b   :  { %v2414_v46 = vpop.eup %2413 }
 0x65c   :  { %v1661_v21 = vmul.f32 %v2414_v46, %v3977_v38  ;;  %v1490_v48 = vpop.xlane.xlu0 %1489  ;;  %v2416_v30 = vpop.eup %2415 }
 0x65d   :  { %v1528_v31 = vsub.f32 %v3987_v32, %v1490_v48  ;;  %v1662_v40 = vmul.f32 %v2416_v30, %v3949_v54  ;;  %v1375_v38 = vpop.f32.mrf.mxu3  ;;  %v2418_v13 = vpop.eup %2417 }
 0x65e   :  { %v1691_v41 = vmul.f32 %v4037_v39, %v1661_v21  ;;  %v1376_v42 = vadd.f32 %v1375_v38, %v1299_v59  ;;  %v1663_v57 = vmul.f32 %v2418_v13, %v3954_v22 }
 0x65f   :  { %v1558_v29 = vmul.f32 1.442695, %v1528_v31  ;;  %v1692_v32 = vmul.f32 %v4031_v1, %v1662_v40 }
 0x660   :  { %2244 = vmatmul.msk.f32.gmra.mxu0 %vm163_vm1, %v1691_v41  ;;  %v4070_v52 = vadd.f32 %v4002_v27, %v1376_v42  ;;  %v1693_v35 = vmul.f32 %v4037_v39, %v1663_v57  ;;  %v2298_v57 = vld [vmem:[%s4277_s23 + $0x1] ss:$0 sm:$0xff] }
 0x661   :  { %2419 = vpow2.f32 %v1558_v29 }
 0x662   :  { %2421 = vrcp.f32 %v1598_v36  ;;  %v1512_v2 = vsel %vm163_vm1, %v4070_v52, -inf }
 0x664   :  { %v1496_v55 = vpop.xlane.xlu0 %1495 }
 0x665   :  { %v1530_v60 = vsub.f32 %v3997_v19, %v1496_v55  ;;  %v1601_v19 = vpop.xlane.xlu2 %1600  ;;  %v1378_v41 = vpop.f32.mrf.mxu3 }
 0x667   :  { %v4062_v37 = vpop.eup %2419  ;;  %v1562_v25 = vmul.f32 1.442695, %v1530_v60 }
 0x668   :  { %2245 = vmatmul.msk.f32.gmra.mxu0 %vm163_vm1, %v1692_v32  ;;  %v1608_v54 = vsel %vm163_vm1, %v4062_v37, 0.0  ;;  %v2422_v56 = vpop.eup %2421 }
 0x669   :  { %2423 = vpow2.f32 %v1562_v25  ;;  %1609 = vadd.xlane.f32.xlu1 %v1608_v54  ;;  %v1664_v27 = vmul.f32 %v2422_v56, %v3964_v15  ;;  %v2297_v54 = vld [vmem:[%s4277_s23] ss:$0 sm:$0xff] }
 0x66a   :  { %2425 = vpow2.f32 %v1566_v10 }
 0x66b   :  { %2427 = vrcp.f32 %v1601_v19  ;;  %v1694_v44 = vmul.f32 %v4031_v1, %v1664_v27 }
 0x66c   :  { %v1505_v24 = vpop.xlane.xlu0 %1504 }
 0x66d   :  { %v1604_v62 = vpop.xlane.xlu2 %1603 }
 0x66e   :  { %2429 = vrcp.f32 %v1604_v62  ;;  %v2299_v62 = vld [vmem:[%s4277_s23 + $0x2] ss:$0 sm:$0xff] }
 0x66f   :  { %v4073_v63 = vpop.eup %2423 }
 0x670   :  { %2246 = vmatmul.msk.f32.gmra.mxu0 %vm163_vm1, %v1693_v35  ;;  %v1614_v22 = vsel %vm163_vm1, %v4073_v63, 0.0  ;;  %v4081_v8 = vpop.eup %2425 }
 0x671   :  { %1513 = vmax.xlane.f32.xlu1 %v1512_v2  ;;  %1615 = vadd.xlane.f32.xlu0 %v1614_v22  ;;  %v2428_v28 = vpop.eup %2427  ;;  %v1620_v17 = vsel %vm163_vm1, %v4081_v8, 0.0 }
 0x672   :  { %v1665_v15 = vmul.f32 %v2428_v28, %v3969_v23 }
 0x674   :  { %v1511_v5 = vpop.xlane.xlu0 %1510  ;;  %v2430_v9 = vpop.eup %2429  ;;  %v1695_v11 = vmul.f32 %v4037_v39, %v1665_v15 }
 0x675   :  { %v1535_v47 = vsub.f32 %v4009_v6, %v1511_v5  ;;  %v1666_v16 = vmul.f32 %v2430_v9, %v3984_v50  ;;  %v1302_v50 = vadd.f32 %v1301_v3, %v3829_v43  ;;  %v2534_v3 = vld [vmem:[%s4245_s7] ss:$0 sm:$0xff] }
 0x677   :  { %v1572_v45 = vmul.f32 1.442695, %v1535_v47  ;;  %v1696_v20 = vmul.f32 %v4031_v1, %v1666_v16 }
 0x678   :  { %2247 = vmatmul.msk.f32.gmra.mxu0 %vm163_vm1, %v1694_v44 }
 0x679   :  { %2431 = vpow2.f32 %v1572_v45  ;;  %1621 = vadd.xlane.f32.xlu0 %v1620_v17 }
 0x67f   :  { %v4090_v7 = vpop.eup %2431 }
 0x680   :  { %2248 = vmatmul.msk.f32.gmra.mxu0 %vm163_vm1, %v1695_v11  ;;  %v1629_v6 = vsel %vm163_vm1, %v4090_v7, 0.0 }
 0x681   :  { %1630 = vadd.xlane.f32.xlu0 %v1629_v6 }
 0x688   :  { %2249 = vmatmul.msk.f32.gmra.mxu0 %vm163_vm1, %v1696_v20 }
 0x6a9   :  { %v1787_v33 = vpop.f32.mrf.mxu0 }
 0x6aa   :  { %v1821_v6 = vmul.f32 %v2297_v54, %v1787_v33 }
 0x6ae   :  { %v1607_v12 = vpop.xlane.xlu2 %1606 }
 0x6af   :  { %2433 = vrcp.f32 %v1607_v12 }
 0x6b1   :  { %v1790_v32 = vpop.f32.mrf.mxu0 }
 0x6b5   :  { %v2434_v23 = vpop.eup %2433 }
 0x6b6   :  { %v1667_v51 = vmul.f32 %v2434_v23, %v4042_v0  ;;  %v1493_v36 = vpop.xlane.xlu2 %1492  ;;  %v1533_v0 = vsub.f32 %v4004_v49, %v1505_v24  ;;  %v1822_v24 = vmul.f32 %v2297_v54, %v1790_v32  ;;  %v2301_v23 = vld [vmem:[%s4277_s23 + $0x4] ss:$0 sm:$0xff] }
 0x6b7   :  { %v1529_v46 = vsub.f32 %v3917_v53, %v1493_v36  ;;  %v1379_v53 = vadd.f32 %v1378_v41, %v1302_v50 }
 0x6b8   :  { %v1697_v21 = vmul.f32 %v4037_v39, %v1667_v51  ;;  %v1568_v59 = vmul.f32 1.442695, %v1533_v0 }
 0x6b9   :  { %v1560_v48 = vmul.f32 1.442695, %v1529_v46  ;;  %v4110_v43 = vadd.f32 %v4011_v58, %v1379_v53  ;;  %v1793_v42 = vpop.f32.mrf.mxu0 }
 0x6ba   :  { %2250 = vmatmul.msk.f32.gmra.mxu0 %vm163_vm1, %v1697_v21  ;;  %v1827_v11 = vmul.f32 %v2298_v57, %v1793_v42 }
 0x6bb   :  { %2435 = vpow2.f32 %v1560_v48  ;;  %v1515_v49 = vsel %vm163_vm1, %v4110_v43, -inf }
 0x6bc   :  { %v1829_v20 = vadd.f32 %v1827_v11, %v1821_v6 }
 0x6be   :  { %v1499_v31 = vpop.xlane.xlu2 %1498 }
 0x6bf   :  { %v1531_v30 = vsub.f32 %v3946_v34, %v1499_v31  ;;  %v2535_v31 = vld [vmem:[%s4246_s8] ss:$0 sm:$0xff]  ;;  %s4279_s8 = sld [smem:[#allocation11_spill]] }
 0x6c1   :  { %v4104_v29 = vpop.eup %2435  ;;  %v1564_v40 = vmul.f32 1.442695, %v1531_v30 }
 0x6c2   :  { %v1611_v4 = vsel %vm163_vm1, %v4104_v29, 0.0 }
 0x6c3   :  { %2437 = vpow2.f32 %v1564_v40  ;;  %1612 = vadd.xlane.f32.xlu2 %v1611_v4 }
 0x6c4   :  { %2439 = vpow2.f32 %v1568_v59 }
 0x6c6   :  { %v1508_v55 = vpop.xlane.xlu2 %1507 }
 0x6c7   :  { %v1534_v38 = vsub.f32 %v3962_v14, %v1508_v55 }
 0x6c9   :  { %v4113_v34 = vpop.eup %2437  ;;  %v1570_v60 = vmul.f32 1.442695, %v1534_v38 }
 0x6ca   :  { %v1617_v13 = vsel %vm163_vm1, %v4113_v34, 0.0  ;;  %v4119_v61 = vpop.eup %2439 }
 0x6cb   :  { %2441 = vpow2.f32 %v1570_v60  ;;  %1516 = vmax.xlane.f32.xlu2 %v1515_v49  ;;  %1618 = vadd.xlane.f32.xlu1 %v1617_v13  ;;  %v1623_v25 = vsel %vm163_vm1, %v4119_v61, 0.0 }
 0x6d1   :  { %v4121_v58 = vpop.eup %2441 }
 0x6d2   :  { %v1626_v14 = vsel %vm163_vm1, %v4121_v58, 0.0 }
 0x6d3   :  { %1627 = vadd.xlane.f32.xlu1 %v1626_v14  ;;  %1624 = vadd.xlane.f32.xlu2 %v1623_v25 }
 0x6dc   :  { %v1610_v19 = vpop.xlane.xlu1 %1609 }
 0x6dd   :  { %v1796_v10 = vpop.f32.mrf.mxu0 }
 0x6de   :  { %v1828_v56 = vmul.f32 %v2298_v57, %v1796_v10 }
 0x6e0   :  { %v1830_v35 = vadd.f32 %v1828_v56, %v1822_v24 }
 0x6e4   :  { %v1514_v2 = vpop.xlane.xlu1 %1513  ;;  %v1616_v56 = vpop.xlane.xlu0 %1615 }
 0x6e5   :  { %v1536_v22 = vsub.f32 %v4070_v52, %v1514_v2  ;;  %v1799_v27 = vpop.f32.mrf.mxu0  ;;  %v2300_v52 = vld [vmem:[%s4277_s23 + $0x3] ss:$0 sm:$0xff]  ;;  %s2109_s23 = sshll.u32 %s4279_s8, 4  ;;  %s2110_s23 = int_to_ptr.hbm [resolvable:$true] %s2109_s23 }
 0x6e6   :  { %v1835_v16 = vmul.f32 %v2299_v62, %v1799_v27 }
 0x6e7   :  { %v1574_v5 = vmul.f32 1.442695, %v1536_v22 }
 0x6e8   :  { %v1837_v51 = vadd.f32 %v1835_v16, %v1829_v20 }
 0x6e9   :  { %2443 = vpow2.f32 %v1574_v5 }
 0x6ed   :  { %v1802_v47 = vpop.f32.mrf.mxu0 }
 0x6ee   :  { %v1836_v44 = vmul.f32 %v2299_v62, %v1802_v47  ;;  %v1622_v62 = vpop.xlane.xlu0 %1621 }
 0x6ef   :  { %v4137_v28 = vpop.eup %2443 }
 0x6f0   :  { %v1838_v45 = vadd.f32 %v1836_v44, %v1830_v35  ;;  %v1632_v17 = vsel %vm163_vm1, %v4137_v28, 0.0 }
 0x6f1   :  { %1633 = vadd.xlane.f32.xlu2 %v1632_v17 }
 0x6f5   :  { %v1805_v15 = vpop.f32.mrf.mxu0 }
 0x6f6   :  { %v1843_v12 = vmul.f32 %v2300_v52, %v1805_v15  ;;  %v1631_v16 = vpop.xlane.xlu0 %1630 }
 0x6f8   :  { %v1845_v46 = vadd.f32 %v1843_v12, %v1837_v51 }
 0x6fd   :  { %v1808_v9 = vpop.f32.mrf.mxu0 }
 0x6fe   :  { %v1844_v33 = vmul.f32 %v2300_v52, %v1808_v9 }
 0x700   :  { %v1846_v4 = vadd.f32 %v1844_v33, %v1838_v45 }
 0x705   :  { %v1811_v36 = vpop.f32.mrf.mxu0 }
 0x706   :  { %v1851_v21 = vmul.f32 %v2301_v23, %v1811_v36 }
 0x708   :  { %v1853_v48 = vadd.f32 %v1851_v21, %v1845_v46 }
 0x70a   :  { %v1855_v50 = vmul.f32 %v2534_v3, %v1853_v48 }
 0x70c   :  { %v1857_v41 = vadd.f32 %v2535_v31, %v1855_v50 }
 0x70e   :  { %v1859_v30 = vmax.f32 %v1857_v41, 0.0 }
 0x710   :  { %v1861_v0 = vmul.f32 %v1859_v30, %v3925_v18 }
 0x712   :  { %2255 = vmatmul.msk.f32.vlgmr.msrb.gmra.mxu0 %vm921_vm4, %v1861_v0 }
 0x736   :  { %v1613_v40 = vpop.xlane.xlu2 %1612 }
 0x737   :  { %v1814_v53 = vpop.f32.mrf.mxu0 }
 0x738   :  { %v1852_v59 = vmul.f32 %v2301_v23, %v1814_v53 }
 0x73a   :  { %v1854_v55 = vadd.f32 %v1852_v59, %v1846_v4 }
 0x73c   :  { %v1856_v38 = vmul.f32 %v2534_v3, %v1854_v55  ;;  %v2305_v55 = vld [vmem:[%s4278_s2 + $0x3] ss:$0 sm:$0xff] }
 0x73e   :  { %v1858_v60 = vadd.f32 %v2535_v31, %v1856_v38  ;;  %v1517_v49 = vpop.xlane.xlu2 %1516  ;;  %v1619_v27 = vpop.xlane.xlu1 %1618 }
 0x73f   :  { %v1537_v13 = vsub.f32 %v4110_v43, %v1517_v49 }
 0x740   :  { %v1860_v32 = vmax.f32 %v1858_v60, 0.0 }
 0x741   :  { %v1576_v14 = vmul.f32 1.442695, %v1537_v13 }
 0x742   :  { %v1862_v25 = vmul.f32 %v1860_v32, %v3932_v26  ;;  %v2306_v32 = vld [vmem:[%s4278_s2 + $0x4] ss:$0 sm:$0xff] }
 0x743   :  { %2445 = vpow2.f32 %v1576_v14 }
 0x744   :  { %2256 = vmatmul.msk.f32.vlgmr.msrb.gmra.mxu3 %vm921_vm4, %v1862_v25  ;;  %2447 = vrcp.f32 %v1610_v19 }
 0x745   :  { %2449 = vrcp.f32 %v1613_v40 }
 0x746   :  { %2451 = vrcp.f32 %v1616_v56  ;;  %v1625_v17 = vpop.xlane.xlu2 %1624  ;;  %v1628_v11 = vpop.xlane.xlu1 %1627 }
 0x747   :  { %2453 = vrcp.f32 %v1619_v27 }
 0x748   :  { %2455 = vrcp.f32 %v1622_v62 }
 0x749   :  { %v2446_v42 = vpop.eup %2445  ;;  %2457 = vrcp.f32 %v1625_v17 }
 0x74a   :  { %v1635_v54 = vsel %vm163_vm1, %v2446_v42, 0.0  ;;  %v2448_v57 = vpop.eup %2447  ;;  %2459 = vrcp.f32 %v1628_v11 }
 0x74b   :  { %1636 = vadd.xlane.f32.xlu1 %v1635_v54  ;;  %v1668_v10 = vmul.f32 %v2448_v57, %v4062_v37  ;;  %v2450_v2 = vpop.eup %2449  ;;  %2461 = vrcp.f32 %v1631_v16 }
 0x74c   :  { %v1669_v22 = vmul.f32 %v2450_v2, %v4104_v29  ;;  %v2452_v5 = vpop.eup %2451  ;;  %v2536_v2 = vld [vmem:[%s4248_s10] ss:$0 sm:$0xff] }
 0x74d   :  { %v1698_v43 = vmul.f32 %v4031_v1, %v1668_v10  ;;  %v1670_v37 = vmul.f32 %v2452_v5, %v4073_v63  ;;  %v2454_v44 = vpop.eup %2453 }
 0x74e   :  { %v1699_v19 = vmul.f32 %v4037_v39, %v1669_v22  ;;  %v1671_v45 = vmul.f32 %v2454_v44, %v4113_v34  ;;  %v2456_v15 = vpop.eup %2455 }
 0x74f   :  { %v1700_v47 = vmul.f32 %v4031_v1, %v1670_v37  ;;  %v1672_v9 = vmul.f32 %v2456_v15, %v4081_v8  ;;  %v2458_v52 = vpop.eup %2457  ;;  %v2537_v37 = vld [vmem:[%s4249_s11] ss:$0 sm:$0xff] }
 0x750   :  { %v1701_v29 = vmul.f32 %v4037_v39, %v1671_v45  ;;  %v1673_v6 = vmul.f32 %v2458_v52, %v4119_v61  ;;  %v2460_v20 = vpop.eup %2459 }
 0x751   :  { %v1702_v63 = vmul.f32 %v4031_v1, %v1672_v9  ;;  %v1674_v12 = vmul.f32 %v2460_v20, %v4121_v58  ;;  %v2462_v51 = vpop.eup %2461 }
 0x752   :  { %v1703_v34 = vmul.f32 %v4037_v39, %v1673_v6  ;;  %v1675_v36 = vmul.f32 %v2462_v51, %v4090_v7  ;;  %v2538_v51 = vld [vmem:[%s4250_s12] sm:$0x1] }
 0x753   :  { %v1704_v8 = vmul.f32 %v4031_v1, %v1674_v12 }
 0x754   :  { %v1705_v61 = vmul.f32 %v4037_v39, %v1675_v36 }
 0x764   :  { %v1634_v23 = vpop.xlane.xlu2 %1633 }
 0x765   :  { %2463 = vrcp.f32 %v1634_v23 }
 0x76b   :  { %v2464_v21 = vpop.eup %2463 }
 0x76c   :  { %v1676_v48 = vmul.f32 %v2464_v21, %v4137_v28  ;;  %v2303_v28 = vld [vmem:[%s4278_s2 + $0x1] ss:$0 sm:$0xff] }
 0x76e   :  { %v1706_v58 = vmul.f32 %v4031_v1, %v1676_v48  ;;  %v2302_v1 = vld [vmem:[%s4278_s2] ss:$0 sm:$0xff] }
 0x76f   :  { %v2541_v48 = vld [vmem:[%s4254_s16] sm:$0x1] }
 0x78f   :  { %v1886_v35 = vpop.f32.mrf.mxu0 }
 0x7be   :  { %v1637_v46 = vpop.xlane.xlu1 %1636 }
 0x7bf   :  { %2465 = vrcp.f32 %v1637_v46 }
 0x7c5   :  { %v2466_v3 = vpop.eup %2465 }
 0x7c6   :  { %v1677_v50 = vmul.f32 %v2466_v3, %v2446_v42 }
 0x7c7   :  { %v1889_v24 = vpop.f32.mrf.mxu3 }
 0x7c8   :  { %1936 = vmatpush.msra.mxu0 %v1889_v24  ;;  %v1707_v31 = vmul.f32 %v4037_v39, %v1677_v50  ;;  %v2304_v39 = vld [vmem:[%s4278_s2 + $0x2] ss:$0 sm:$0xff] }
 0x7ca   :  { %1937 = vmatpush.msra.mxu0 %v1886_v35 }
 0x7cb   :  { %2257 = vmatmul.msk.f32.vlgmr.msra.gmra.mxu0 %vm163_vm1, %v1698_v43 }
 0x7d3   :  { %2258 = vmatmul.msk.f32.gmra.mxu0 %vm163_vm1, %v1699_v19 }
 0x7db   :  { %2259 = vmatmul.msk.f32.gmra.mxu0 %vm163_vm1, %v1700_v47 }
 0x7e3   :  { %2260 = vmatmul.msk.f32.gmra.mxu0 %vm163_vm1, %v1701_v29 }
 0x7eb   :  { %2261 = vmatmul.msk.f32.gmra.mxu0 %vm163_vm1, %v1702_v63 }
 0x7f3   :  { %2262 = vmatmul.msk.f32.gmra.mxu0 %vm163_vm1, %v1703_v34 }
 0x7fb   :  { %2263 = vmatmul.msk.f32.gmra.mxu0 %vm163_vm1, %v1704_v8 }
 0x803   :  { %2264 = vmatmul.msk.f32.gmra.mxu0 %vm163_vm1, %v1705_v61  ;;  %v2540_v61 = vld [vmem:[%s4253_s15] sm:$0x1]  ;;  %s2571_s15 = smov [#allocation2]  }
 0x804   :  { %s2107_s16 = sshll.u32 %s2571_s15, 4  ;;  %s2108_s16 = int_to_ptr.vmem [resolvable:$true] %s2107_s16 }
 0x80b   :  { %2265 = vmatmul.msk.f32.gmra.mxu0 %vm163_vm1, %v1706_v58 }
 0x813   :  { %2266 = vmatmul.msk.f32.gmra.mxu0 %vm163_vm1, %v1707_v31  ;;  %v2542_v31 = vld [vmem:[%s4256_s18] sm:$0x1] }
 0x848   :  { %v1939_v7 = vpop.f32.mrf.mxu0 }
 0x849   :  { %v1973_v38 = vmul.f32 %v2302_v1, %v1939_v7 }
 0x850   :  { %v1942_v41 = vpop.f32.mrf.mxu0 }
 0x851   :  { %v1974_v10 = vmul.f32 %v2302_v1, %v1942_v41  ;;  %v2543_v41 = vld [vmem:[%s4257_s19] sm:$0x1] }
 0x858   :  { %v1945_v30 = vpop.f32.mrf.mxu0 }
 0x859   :  { %v1979_v59 = vmul.f32 %v2303_v28, %v1945_v30 }
 0x85b   :  { %v1981_v49 = vadd.f32 %v1979_v59, %v1973_v38 }
 0x860   :  { %v1948_v0 = vpop.f32.mrf.mxu0 }
 0x861   :  { %v1980_v42 = vmul.f32 %v2303_v28, %v1948_v0 }
 0x863   :  { %v1982_v56 = vadd.f32 %v1980_v42, %v1974_v10 }
 0x868   :  { %v1951_v33 = vpop.f32.mrf.mxu0 }
 0x869   :  { %v1987_v60 = vmul.f32 %v2304_v39, %v1951_v33 }
 0x86b   :  { %v1989_v14 = vadd.f32 %v1987_v60, %v1981_v49 }
 0x870   :  { %v1954_v40 = vpop.f32.mrf.mxu0 }
 0x871   :  { %v1988_v24 = vmul.f32 %v2304_v39, %v1954_v40 }
 0x873   :  { %v1990_v27 = vadd.f32 %v1988_v24, %v1982_v56 }
 0x878   :  { %v1957_v53 = vpop.f32.mrf.mxu0 }
 0x879   :  { %v1995_v13 = vmul.f32 %v2305_v55, %v1957_v53 }
 0x87b   :  { %v1997_v54 = vadd.f32 %v1995_v13, %v1989_v14 }
 0x880   :  { %v1960_v4 = vpop.f32.mrf.mxu0 }
 0x881   :  { %v1996_v35 = vmul.f32 %v2305_v55, %v1960_v4 }
 0x883   :  { %v1998_v5 = vadd.f32 %v1996_v35, %v1990_v27 }
 0x888   :  { %v1963_v25 = vpop.f32.mrf.mxu0 }
 0x889   :  { %v2003_v57 = vmul.f32 %v2306_v32, %v1963_v25 }
 0x88b   :  { %v2005_v43 = vadd.f32 %v2003_v57, %v1997_v54 }
 0x88d   :  { %v2007_v22 = vmul.f32 %v2536_v2, %v2005_v43 }
 0x88f   :  { %v2009_v62 = vadd.f32 %v2537_v37, %v2007_v22 }
 0x890   :  { %v1966_v19 = vpop.f32.mrf.mxu0 }
 0x891   :  { %v2004_v47 = vmul.f32 %v2306_v32, %v1966_v19  ;;  %v2011_v45 = vmax.f32 %v2009_v62, 0.0 }
 0x893   :  { %v2006_v44 = vadd.f32 %v2004_v47, %v1998_v5  ;;  %v2013_v15 = vmul.f32 %v2011_v45, %v3925_v18  ;;  %v2539_v18 = vld [vmem:[%s4251_s13] sm:$0x1] }
 0x895   :  { %v2008_v17 = vmul.f32 %v2536_v2, %v2006_v44  ;;  %v2015_v63 = vsel %vm921_vm4, %v2013_v15, 0.0 }
 0x897   :  { %v2010_v29 = vadd.f32 %v2537_v37, %v2008_v17 }
 0x899   :  { %v2012_v9 = vmax.f32 %v2010_v29, 0.0 }
 0x89b   :  { %v2014_v11 = vmul.f32 %v2012_v9, %v3932_v26 }
 0x89d   :  { %v2016_v52 = vsel %vm921_vm4, %v2014_v11, 0.0 }
 0x89e   :  { %v2017_v6 = vadd.f32 %v2016_v52, %v2015_v63 }
 0x8a0   :  { %v2018_v16 = vrot.slane %v2017_v6, 4 }
 0x8a2   :  { %v2019_v34 = vadd.f32 %v2018_v16, %v2017_v6 }
 0x8a4   :  { %v2020_v20 = vrot.slane %v2019_v34, 2 }
 0x8a6   :  { %v2021_v12 = vadd.f32 %v2020_v20, %v2019_v34 }
 0x8a8   :  { %v2022_v23 = vrot.slane %v2021_v12, 1 }
 0x8aa   :  { %v2023_v8 = vadd.f32 %v2022_v23, %v2021_v12 }
 0x8ac   :  { %v2024_v36 = vmul.f32 %v2538_v51, %v2023_v8 }
 0x8ae   :  { %v2025_v26 = vadd.f32 %v2539_v18, %v2024_v36 }
 0x8b0   :  { %2271 = vmatmul.msk.f32.vlgmr.msra.gmra.mxu1 %vm921_vm4, %v2025_v26 }
 0x92d   :  { %v2046_v46 = vpop.f32.mrf.mxu1 }
 0x92e   :  { %v2049_v21 = vmul.f32 %v2540_v61, %v2046_v46 }
 0x930   :  { %v2050_v58 = vadd.f32 %v2541_v48, %v2049_v21 }
 0x932   :  { %v2051_v3 = vmax.f32 %v2050_v58, 0.0 }
 0x934   :  { %2272 = vmatmul.msk.f32.vlgmr.msra.gmra.mxu3 %vm1121_vm5, %v2051_v3 }
 0x9b7   :  { %v2072_v50 = vpop.f32.mrf.mxu3 }
 0x9b8   :  { %v2075_v7 = vmul.f32 %v2542_v31, %v2072_v50 }
 0x9ba   :  { %v2076_v30 = vadd.f32 %v2543_v41, %v2075_v7 }
 0x9bc   :  { %v2077_v0 = vmax.f32 %v2076_v30, 0.0 }
 0x9be   :  { %2273 = vmatmul.msk.f32.vlgmr.msrb.gmra.mxu1 %vm163_vm1, %v2077_v0 }
 0xa3b   :  { %v2098_v33 = vpop.f32.mrf.mxu1 }
 0xa3c   :  { %2101 = vst.msk [vmem:[#allocation2 + $0x1] sm:$0x1] %vm1171_vm6, %v2098_v33 }
 0xa3d   :  { %2112 = dma.vmem_to_hbm [thread:$0]  %s2108_s16, 32, %s2110_s23, [#allocation3]  }
 0xa3e   :  { %2568 = dma.done.wait [#allocation3], 32  }
 0xa3f   :  { %2569 = vsyncadd [#allocation3], 4294967264 }
 0xa40   :  { %2117 = vsyncpa [#allocation3], 1 }

</bundles_post_ra>
